<compile_context>
chip_gen: v7x
topology: tpu7x:2x2x1
jax: 0.10.0
libtpu: 0.0.40
codegen_flags: <defaults>
</compile_context>

<pallas_src>
import math
import jax
import jax.numpy as jnp
from jax.experimental import pallas as pl
from jax.experimental.pallas import tpu as pltpu

NEG_SLOPE = 0.2
ACT_SCALE = math.sqrt(2.0)      # FusedLeakyReLU output scale
INV_SQRT2 = 1.0 / math.sqrt(2.0)


def _zero_halo(ref):
    """Zero only the 1-pixel border ring of a (Hp, Wp, C) VMEM scratch."""
    Hp, Wp, C = ref.shape
    z_row = jnp.zeros((1, Wp, C), ref.dtype)
    z_col = jnp.zeros((Hp, 1, C), ref.dtype)
    ref[0:1, :, :] = z_row
    ref[Hp - 1:Hp, :, :] = z_row
    ref[:, 0:1, :] = z_col
    ref[:, Wp - 1:Wp, :] = z_col


def resblock_kernel(x_ref, w1_ref, b1_ref, w2_ref, b2_ref, wsk_ref,
                    out_ref, xpad_ref, h1pad_ref):
    # x_ref    : (1, H, W, Cin)     bf16 input tile (one batch element, NHWC)
    # w1_ref   : (3, 3*Cin, Cout)   bf16 conv1 weight, kx taps concatenated on K
    # b1_ref   : (1, Cout)          f32 FusedLeakyReLU bias of conv1
    # w2_ref   : (3, 3*Cout, Cout)  bf16 conv2 weight (conv1's sqrt(2) folded in)
    # b2_ref   : (1, Cout)          f32 FusedLeakyReLU bias of conv2
    # wsk_ref  : (Cin, Cout)        bf16 1x1 skip weight (1/sqrt(2) folded in)
    # out_ref  : (1, H, W, Cout)    f32 output tile
    # xpad_ref : (H+2, W+2, Cin)    bf16 VMEM halo scratch for the input
    # h1pad_ref: (H+2, W+2, Cout)   bf16 VMEM halo scratch for conv1 activation
    H = out_ref.shape[1]
    W = out_ref.shape[2]
    Cin = x_ref.shape[3]
    Cout = out_ref.shape[3]

    # Zero only the halo ring (cheap) every grid step; interiors are fully
    # rewritten below.  Done per-step (not gated on program_id) so it remains
    # correct when the batch axis is megacore-sharded ("parallel").
    _zero_halo(xpad_ref)
    _zero_halo(h1pad_ref)

    # Stage the (unpadded) input tile into the halo scratch interior.
    xpad_ref[1:H + 1, 1:W + 1, :] = x_ref[0]

    # ---- conv1 (3x3, pad 1) + 1x1 skip: 3 MXU dots with K = 3*Cin ----
    acc1 = jnp.zeros((H * W, Cout), jnp.float32)
    skip = None
    for ky in range(3):
        slab = xpad_ref[ky:ky + H, :, :]                        # (H, W+2, Cin)
        left = slab[:, 0:W, :]
        mid = slab[:, 1:W + 1, :]
        right = slab[:, 2:W + 2, :]
        patch = jnp.concatenate([left, mid, right], axis=-1)    # (H, W, 3*Cin)
        acc1 = acc1 + jnp.dot(patch.reshape(H * W, 3 * Cin), w1_ref[ky],
                              preferred_element_type=jnp.float32)
        if ky == 1:
            # Reuse the center patch for the 1x1 skip conv (no bias, no
            # activation; the trailing 1/sqrt(2) is folded into wsk).
            skip = jnp.dot(mid.reshape(H * W, Cin), wsk_ref[...],
                           preferred_element_type=jnp.float32)

    # FusedLeakyReLU of conv1 (its sqrt(2) gain is folded into w2).
    h1 = acc1 + b1_ref[...]
    h1 = jnp.where(h1 >= 0, h1, h1 * NEG_SLOPE)
    h1pad_ref[1:H + 1, 1:W + 1, :] = (
        h1.reshape(H, W, Cout).astype(h1pad_ref.dtype))

    # ---- conv2 (3x3, pad 1): 3 MXU dots with K = 3*Cout ----
    acc2 = jnp.zeros((H * W, Cout), jnp.float32)
    for ky in range(3):
        slab = h1pad_ref[ky:ky + H, :, :]                       # (H, W+2, Cout)
        patch = jnp.concatenate(
            [slab[:, 0:W, :], slab[:, 1:W + 1, :], slab[:, 2:W + 2, :]],
            axis=-1)                                            # (H, W, 3*Cout)
        acc2 = acc2 + jnp.dot(patch.reshape(H * W, 3 * Cout), w2_ref[ky],
                              preferred_element_type=jnp.float32)

    # FusedLeakyReLU of conv2; its sqrt(2) cancels the final 1/sqrt(2).
    h2 = acc2 + b2_ref[...]
    h2 = jnp.where(h2 >= 0, h2, h2 * NEG_SLOPE)

    out_ref[0] = (h2 + skip).reshape(H, W, Cout).astype(out_ref.dtype)


def resblock_forward(x_nchw, w1_oihw, b1, w2_oihw, b2, wsk_oihw):
    """Pallas ResBlock forward.  x_nchw: (N, Cin, H, W) float32."""
    N, Cin, H, W = x_nchw.shape
    Cout = w1_oihw.shape[0]

    # Equal-LR scales (1 / sqrt(in_channels * k^2))
    s1 = 1.0 / math.sqrt(Cin * 3 * 3)
    s2 = 1.0 / math.sqrt(Cout * 3 * 3)
    ssk = 1.0 / math.sqrt(Cin * 1 * 1)

    # Parameter glue (trace-time):
    #  * OIHW -> HWIO, apply equal-lr scale
    #  * fold conv1's sqrt(2) activation gain into w2
    #  * fold the final 1/sqrt(2) into wsk (conv2-branch factor cancels)
    #  * concatenate the 3 kx taps along K -> (3, 3*C, Cout)
    #  * cast MXU operands to bf16 (biases and accumulation stay f32)
    w1 = jnp.transpose(w1_oihw, (2, 3, 1, 0)).astype(jnp.float32) * s1
    w2 = jnp.transpose(w2_oihw, (2, 3, 1, 0)).astype(jnp.float32) * (s2 * ACT_SCALE)
    w1r = w1.reshape(3, 3 * Cin, Cout).astype(jnp.bfloat16)      # (3, 3*Cin, Cout)
    w2r = w2.reshape(3, 3 * Cout, Cout).astype(jnp.bfloat16)     # (3, 3*Cout, Cout)
    wsk = (jnp.transpose(wsk_oihw[:, :, 0, 0], (1, 0)).astype(jnp.float32)
           * (ssk * INV_SQRT2)).astype(jnp.bfloat16)             # (Cin, Cout)
    b1v = b1.reshape(1, Cout).astype(jnp.float32)
    b2v = b2.reshape(1, Cout).astype(jnp.float32)

    # NCHW -> NHWC (channels-last = lane dim).  Spatial zero-padding is done
    # inside the kernel via a VMEM halo scratch, not with jnp.pad here.
    x_nhwc = jnp.transpose(x_nchw, (0, 2, 3, 1)).astype(jnp.bfloat16)

    flops = 2 * N * H * W * Cout * (9 * Cin + 9 * Cout + Cin)
    bytes_accessed = int(
        N * H * W * Cin * 2 + N * H * W * Cout * 4
        + (w1r.size + w2r.size + wsk.size) * 2
        + (b1v.size + b2v.size) * 4)

    out_nhwc = pl.pallas_call(
        resblock_kernel,
        out_shape=jax.ShapeDtypeStruct((N, H, W, Cout), jnp.float32),
        grid_spec=pltpu.PrefetchScalarGridSpec(
            num_scalar_prefetch=0,
            grid=(N,),
            in_specs=[
                pl.BlockSpec((1, H, W, Cin), lambda n: (n, 0, 0, 0)),
                pl.BlockSpec((3, 3 * Cin, Cout), lambda n: (0, 0, 0)),
                pl.BlockSpec((1, Cout), lambda n: (0, 0)),
                pl.BlockSpec((3, 3 * Cout, Cout), lambda n: (0, 0, 0)),
                pl.BlockSpec((1, Cout), lambda n: (0, 0)),
                pl.BlockSpec((Cin, Cout), lambda n: (0, 0)),
            ],
            out_specs=pl.BlockSpec((1, H, W, Cout), lambda n: (n, 0, 0, 0)),
            scratch_shapes=[
                pltpu.VMEM((H + 2, W + 2, Cin), jnp.bfloat16),
                pltpu.VMEM((H + 2, W + 2, Cout), jnp.bfloat16),
            ],
        ),
        compiler_params=pltpu.CompilerParams(
            dimension_semantics=("parallel",),
            vmem_limit_bytes=32 * 1024 * 1024,
        ),
        cost_estimate=pl.CostEstimate(
            flops=flops, transcendentals=0, bytes_accessed=bytes_accessed),
    )(x_nhwc, w1r, b1v, w2r, b2v, wsk)

    return jnp.transpose(out_nhwc, (0, 3, 1, 2))  # back to NCHW


def resblock_reference(x, w1, b1, w2, b2, wsk):
    """Pure-JAX f32 reference matching the PyTorch ResBlock (downsample=False)."""
    Cin = x.shape[1]
    Cout = w1.shape[0]
    s1 = 1.0 / math.sqrt(Cin * 9)
    s2 = 1.0 / math.sqrt(Cout * 9)
    ssk = 1.0 / math.sqrt(Cin)

    def conv(x, w, pad):
        return jax.lax.conv_general_dilated(
            x, w, (1, 1), [(pad, pad), (pad, pad)],
            dimension_numbers=('NCHW', 'OIHW', 'NCHW'))

    h = conv(x, w1 * s1, 1)
    h = jax.nn.leaky_relu(h + b1[None, :, None, None], NEG_SLOPE) * ACT_SCALE
    h = conv(h, w2 * s2, 1)
    h = jax.nn.leaky_relu(h + b2[None, :, None, None], NEG_SLOPE) * ACT_SCALE
    skip = conv(x, wsk * ssk, 0)
    return (h + skip) * INV_SQRT2


if __name__ == "__main__":
    N, Cin, Cout, H, W = 2, 4, 8, 16, 16

    key = jax.random.PRNGKey(0)
    k_x, k_w1, k_w2, k_wsk = jax.random.split(key, 4)

    # Deterministic synthetic parameters matching the module's __init__:
    #   EqualConv2d weights ~ randn, FusedLeakyReLU biases init to zero.
    x = jax.random.normal(k_x, (N, Cin, H, W), jnp.float32)
    w1 = jax.random.normal(k_w1, (Cout, Cin, 3, 3), jnp.float32)    # OIHW
    w2 = jax.random.normal(k_w2, (Cout, Cout, 3, 3), jnp.float32)   # OIHW
    wsk = jax.random.normal(k_wsk, (Cout, Cin, 1, 1), jnp.float32)  # OIHW
    b1 = jnp.zeros((Cout,), jnp.float32)
    b2 = jnp.zeros((Cout,), jnp.float32)

    out = resblock_forward(x, w1, b1, w2, b2, wsk)
    jax.block_until_ready(out)

    ref = resblock_reference(x, w1, b1, w2, b2, wsk)
    assert out.shape == (N, Cout, H, W)
    # bf16 MXU operands (with f32 accumulation) vs. an all-f32 reference:
    # relaxed tolerance; expected max abs error here is ~1e-2.
    assert jnp.allclose(out, ref, atol=5e-2, rtol=5e-2), \
        f"max abs err {jnp.max(jnp.abs(out - ref))}"

    print("KERNEL_OK")
</pallas_src>

<mosaic_0001>
module attributes {stable_mosaic.version = 11 : i64} {
  func.func @resblock_kernel(%arg0: i32, %arg1: memref<1x16x16x4xbf16, #tpu.memory_space<vmem>>, %arg2: memref<3x12x8xbf16, #tpu.memory_space<vmem>>, %arg3: memref<1x8xf32, #tpu.memory_space<vmem>>, %arg4: memref<3x24x8xbf16, #tpu.memory_space<vmem>>, %arg5: memref<1x8xf32, #tpu.memory_space<vmem>>, %arg6: memref<4x8xbf16, #tpu.memory_space<vmem>>, %arg7: memref<1x16x16x8xf32, #tpu.memory_space<vmem>>, %arg8: memref<18x18x4xbf16, #tpu.memory_space<vmem>>, %arg9: memref<18x18x8xbf16, #tpu.memory_space<vmem>>) attributes {dimension_semantics = [#tpu.dimension_semantics<parallel>], iteration_bounds = array<i64: 2>, scalar_prefetch = 0 : i64, scratch_operands = 2 : i64, tpu.core_type = #tpu.core_type<tc>, window_params = [{transform_indices = @transform_0, window_bounds = array<i64: 1, 16, 16, 4>}, {pipeline_mode = #tpu.pipeline_mode<synchronous>, transform_indices = @transform_1, window_bounds = array<i64: 3, 12, 8>}, {pipeline_mode = #tpu.pipeline_mode<synchronous>, transform_indices = @transform_2, window_bounds = array<i64: 1, 8>}, {pipeline_mode = #tpu.pipeline_mode<synchronous>, transform_indices = @transform_3, window_bounds = array<i64: 3, 24, 8>}, {pipeline_mode = #tpu.pipeline_mode<synchronous>, transform_indices = @transform_4, window_bounds = array<i64: 1, 8>}, {pipeline_mode = #tpu.pipeline_mode<synchronous>, transform_indices = @transform_5, window_bounds = array<i64: 4, 8>}, {transform_indices = @transform_6, window_bounds = array<i64: 1, 16, 16, 8>}]} {
    %cst = arith.constant 0.000000e+00 : bf16
    %0 = vector.broadcast %cst : bf16 to vector<1x18x4xbf16>
    %cst_0 = arith.constant 0.000000e+00 : bf16
    %1 = vector.broadcast %cst_0 : bf16 to vector<18x1x4xbf16>
    %c0 = arith.constant 0 : index
    %c0_1 = arith.constant 0 : index
    %c0_2 = arith.constant 0 : index
    %2 = vector.load %arg8[%c0, %c0_1, %c0_2] : memref<18x18x4xbf16, #tpu.memory_space<vmem>>, vector<1x18x4xbf16>
    tpu.vector_store %arg8[%c0, %c0_1, %c0_2], %0 {strides = array<i32>} : memref<18x18x4xbf16, #tpu.memory_space<vmem>>, vector<1x18x4xbf16>,
    %c17 = arith.constant 17 : index
    %c0_3 = arith.constant 0 : index
    %c0_4 = arith.constant 0 : index
    %3 = vector.load %arg8[%c17, %c0_3, %c0_4] : memref<18x18x4xbf16, #tpu.memory_space<vmem>>, vector<1x18x4xbf16>
    tpu.vector_store %arg8[%c17, %c0_3, %c0_4], %0 {strides = array<i32>} : memref<18x18x4xbf16, #tpu.memory_space<vmem>>, vector<1x18x4xbf16>,
    %c0_5 = arith.constant 0 : index
    %c0_6 = arith.constant 0 : index
    %c0_7 = arith.constant 0 : index
    %4 = vector.load %arg8[%c0_5, %c0_6, %c0_7] : memref<18x18x4xbf16, #tpu.memory_space<vmem>>, vector<18x1x4xbf16>
    tpu.vector_store %arg8[%c0_5, %c0_6, %c0_7], %1 {strides = array<i32>} : memref<18x18x4xbf16, #tpu.memory_space<vmem>>, vector<18x1x4xbf16>,
    %c0_8 = arith.constant 0 : index
    %c17_9 = arith.constant 17 : index
    %c0_10 = arith.constant 0 : index
    %5 = vector.load %arg8[%c0_8, %c17_9, %c0_10] : memref<18x18x4xbf16, #tpu.memory_space<vmem>>, vector<18x1x4xbf16>
    tpu.vector_store %arg8[%c0_8, %c17_9, %c0_10], %1 {strides = array<i32>} : memref<18x18x4xbf16, #tpu.memory_space<vmem>>, vector<18x1x4xbf16>,
    %cst_11 = arith.constant 0.000000e+00 : bf16
    %6 = vector.broadcast %cst_11 : bf16 to vector<1x18x8xbf16>
    %cst_12 = arith.constant 0.000000e+00 : bf16
    %7 = vector.broadcast %cst_12 : bf16 to vector<18x1x8xbf16>
    %c0_13 = arith.constant 0 : index
    %c0_14 = arith.constant 0 : index
    %c0_15 = arith.constant 0 : index
    %8 = vector.load %arg9[%c0_13, %c0_14, %c0_15] : memref<18x18x8xbf16, #tpu.memory_space<vmem>>, vector<1x18x8xbf16>
    tpu.vector_store %arg9[%c0_13, %c0_14, %c0_15], %6 {strides = array<i32>} : memref<18x18x8xbf16, #tpu.memory_space<vmem>>, vector<1x18x8xbf16>,
    %c17_16 = arith.constant 17 : index
    %c0_17 = arith.constant 0 : index
    %c0_18 = arith.constant 0 : index
    %9 = vector.load %arg9[%c17_16, %c0_17, %c0_18] : memref<18x18x8xbf16, #tpu.memory_space<vmem>>, vector<1x18x8xbf16>
    tpu.vector_store %arg9[%c17_16, %c0_17, %c0_18], %6 {strides = array<i32>} : memref<18x18x8xbf16, #tpu.memory_space<vmem>>, vector<1x18x8xbf16>,
    %c0_19 = arith.constant 0 : index
    %c0_20 = arith.constant 0 : index
    %c0_21 = arith.constant 0 : index
    %10 = vector.load %arg9[%c0_19, %c0_20, %c0_21] : memref<18x18x8xbf16, #tpu.memory_space<vmem>>, vector<18x1x8xbf16>
    tpu.vector_store %arg9[%c0_19, %c0_20, %c0_21], %7 {strides = array<i32>} : memref<18x18x8xbf16, #tpu.memory_space<vmem>>, vector<18x1x8xbf16>,
    %c0_22 = arith.constant 0 : index
    %c17_23 = arith.constant 17 : index
    %c0_24 = arith.constant 0 : index
    %11 = vector.load %arg9[%c0_22, %c17_23, %c0_24] : memref<18x18x8xbf16, #tpu.memory_space<vmem>>, vector<18x1x8xbf16>
    tpu.vector_store %arg9[%c0_22, %c17_23, %c0_24], %7 {strides = array<i32>} : memref<18x18x8xbf16, #tpu.memory_space<vmem>>, vector<18x1x8xbf16>,
    %c0_25 = arith.constant 0 : index
    %c0_26 = arith.constant 0 : index
    %c0_27 = arith.constant 0 : index
    %c0_28 = arith.constant 0 : index
    %12 = vector.load %arg1[%c0_25, %c0_26, %c0_27, %c0_28] : memref<1x16x16x4xbf16, #tpu.memory_space<vmem>>, vector<1x16x16x4xbf16>
    %13 = vector.shape_cast %12 : vector<1x16x16x4xbf16> to vector<16x16x4xbf16>
    %c1 = arith.constant 1 : index
    %c1_29 = arith.constant 1 : index
    %c0_30 = arith.constant 0 : index
    %14 = vector.load %arg8[%c1, %c1_29, %c0_30] : memref<18x18x4xbf16, #tpu.memory_space<vmem>>, vector<16x16x4xbf16>
    tpu.vector_store %arg8[%c1, %c1_29, %c0_30], %13 {strides = array<i32>} : memref<18x18x4xbf16, #tpu.memory_space<vmem>>, vector<16x16x4xbf16>,
    %cst_31 = arith.constant 0.000000e+00 : f32
    %15 = vector.broadcast %cst_31 : f32 to vector<256x8xf32>
    %c0_32 = arith.constant 0 : index
    %c0_33 = arith.constant 0 : index
    %c0_34 = arith.constant 0 : index
    %16 = vector.load %arg8[%c0_32, %c0_33, %c0_34] : memref<18x18x4xbf16, #tpu.memory_space<vmem>>, vector<16x18x4xbf16>
    %17 = vector.extract_strided_slice %16 {offsets = [0, 0, 0], sizes = [16, 16, 4], strides = [1, 1, 1]} : vector<16x18x4xbf16> to vector<16x16x4xbf16>
    %18 = vector.extract_strided_slice %16 {offsets = [0, 1, 0], sizes = [16, 16, 4], strides = [1, 1, 1]} : vector<16x18x4xbf16> to vector<16x16x4xbf16>
    %19 = vector.extract_strided_slice %16 {offsets = [0, 2, 0], sizes = [16, 16, 4], strides = [1, 1, 1]} : vector<16x18x4xbf16> to vector<16x16x4xbf16>
    %20 = tpu.concatenate %17, %18, %19 in 2 : vector<16x16x4xbf16>, vector<16x16x4xbf16>, vector<16x16x4xbf16> -> vector<16x16x12xbf16>
    %21 = vector.shape_cast %20 : vector<16x16x12xbf16> to vector<256x12xbf16>
    %c0_35 = arith.constant 0 : index
    %c0_36 = arith.constant 0 : index
    %c0_37 = arith.constant 0 : index
    %22 = vector.load %arg2[%c0_35, %c0_36, %c0_37] : memref<3x12x8xbf16, #tpu.memory_space<vmem>>, vector<1x12x8xbf16>
    %23 = vector.shape_cast %22 : vector<1x12x8xbf16> to vector<12x8xbf16>
    %cst_38 = arith.constant dense<0.000000e+00> : vector<256x8xf32>
    %24 = tpu.matmul %21, %23, %cst_38 {dimension_numbers = #tpu.dot_dimension_numbers<[1], [0], [0], [1], [0, 0, 1, 1], [], []>} : vector<256x12xbf16>, vector<12x8xbf16>, vector<256x8xf32> -> vector<256x8xf32>
    %25 = arith.addf %15, %24 : vector<256x8xf32>
    %c1_39 = arith.constant 1 : index
    %c0_40 = arith.constant 0 : index
    %c0_41 = arith.constant 0 : index
    %26 = vector.load %arg8[%c1_39, %c0_40, %c0_41] : memref<18x18x4xbf16, #tpu.memory_space<vmem>>, vector<16x18x4xbf16>
    %27 = vector.extract_strided_slice %26 {offsets = [0, 0, 0], sizes = [16, 16, 4], strides = [1, 1, 1]} : vector<16x18x4xbf16> to vector<16x16x4xbf16>
    %28 = vector.extract_strided_slice %26 {offsets = [0, 1, 0], sizes = [16, 16, 4], strides = [1, 1, 1]} : vector<16x18x4xbf16> to vector<16x16x4xbf16>
    %29 = vector.extract_strided_slice %26 {offsets = [0, 2, 0], sizes = [16, 16, 4], strides = [1, 1, 1]} : vector<16x18x4xbf16> to vector<16x16x4xbf16>
    %30 = tpu.concatenate %27, %28, %29 in 2 : vector<16x16x4xbf16>, vector<16x16x4xbf16>, vector<16x16x4xbf16> -> vector<16x16x12xbf16>
    %31 = vector.shape_cast %30 : vector<16x16x12xbf16> to vector<256x12xbf16>
    %c1_42 = arith.constant 1 : index
    %c0_43 = arith.constant 0 : index
    %c0_44 = arith.constant 0 : index
    %32 = vector.load %arg2[%c1_42, %c0_43, %c0_44] : memref<3x12x8xbf16, #tpu.memory_space<vmem>>, vector<1x12x8xbf16>
    %33 = vector.shape_cast %32 : vector<1x12x8xbf16> to vector<12x8xbf16>
    %cst_45 = arith.constant dense<0.000000e+00> : vector<256x8xf32>
    %34 = tpu.matmul %31, %33, %cst_45 {dimension_numbers = #tpu.dot_dimension_numbers<[1], [0], [0], [1], [0, 0, 1, 1], [], []>} : vector<256x12xbf16>, vector<12x8xbf16>, vector<256x8xf32> -> vector<256x8xf32>
    %35 = arith.addf %25, %34 : vector<256x8xf32>
    %36 = vector.shape_cast %28 : vector<16x16x4xbf16> to vector<256x4xbf16>
    %c0_46 = arith.constant 0 : index
    %c0_47 = arith.constant 0 : index
    %37 = vector.load %arg6[%c0_46, %c0_47] : memref<4x8xbf16, #tpu.memory_space<vmem>>, vector<4x8xbf16>
    %cst_48 = arith.constant dense<0.000000e+00> : vector<256x8xf32>
    %38 = tpu.matmul %36, %37, %cst_48 {dimension_numbers = #tpu.dot_dimension_numbers<[1], [0], [0], [1], [0, 0, 1, 1], [], []>} : vector<256x4xbf16>, vector<4x8xbf16>, vector<256x8xf32> -> vector<256x8xf32>
    %c2 = arith.constant 2 : index
    %c0_49 = arith.constant 0 : index
    %c0_50 = arith.constant 0 : index
    %39 = vector.load %arg8[%c2, %c0_49, %c0_50] : memref<18x18x4xbf16, #tpu.memory_space<vmem>>, vector<16x18x4xbf16>
    %40 = vector.extract_strided_slice %39 {offsets = [0, 0, 0], sizes = [16, 16, 4], strides = [1, 1, 1]} : vector<16x18x4xbf16> to vector<16x16x4xbf16>
    %41 = vector.extract_strided_slice %39 {offsets = [0, 1, 0], sizes = [16, 16, 4], strides = [1, 1, 1]} : vector<16x18x4xbf16> to vector<16x16x4xbf16>
    %42 = vector.extract_strided_slice %39 {offsets = [0, 2, 0], sizes = [16, 16, 4], strides = [1, 1, 1]} : vector<16x18x4xbf16> to vector<16x16x4xbf16>
    %43 = tpu.concatenate %40, %41, %42 in 2 : vector<16x16x4xbf16>, vector<16x16x4xbf16>, vector<16x16x4xbf16> -> vector<16x16x12xbf16>
    %44 = vector.shape_cast %43 : vector<16x16x12xbf16> to vector<256x12xbf16>
    %c2_51 = arith.constant 2 : index
    %c0_52 = arith.constant 0 : index
    %c0_53 = arith.constant 0 : index
    %45 = vector.load %arg2[%c2_51, %c0_52, %c0_53] : memref<3x12x8xbf16, #tpu.memory_space<vmem>>, vector<1x12x8xbf16>
    %46 = vector.shape_cast %45 : vector<1x12x8xbf16> to vector<12x8xbf16>
    %cst_54 = arith.constant dense<0.000000e+00> : vector<256x8xf32>
    %47 = tpu.matmul %44, %46, %cst_54 {dimension_numbers = #tpu.dot_dimension_numbers<[1], [0], [0], [1], [0, 0, 1, 1], [], []>} : vector<256x12xbf16>, vector<12x8xbf16>, vector<256x8xf32> -> vector<256x8xf32>
    %48 = arith.addf %35, %47 : vector<256x8xf32>
    %c0_55 = arith.constant 0 : index
    %c0_56 = arith.constant 0 : index
    %49 = vector.load %arg3[%c0_55, %c0_56] : memref<1x8xf32, #tpu.memory_space<vmem>>, vector<1x8xf32>
    %50 = vector.broadcast %49 : vector<1x8xf32> to vector<256x8xf32>
    %51 = arith.addf %48, %50 : vector<256x8xf32>
    %cst_57 = arith.constant 0.000000e+00 : f32
    %52 = vector.broadcast %cst_57 : f32 to vector<256x8xf32>
    %53 = arith.cmpf oge, %51, %52 : vector<256x8xf32>
    %cst_58 = arith.constant 2.000000e-01 : f32
    %54 = vector.broadcast %cst_58 : f32 to vector<256x8xf32>
    %55 = arith.mulf %51, %54 : vector<256x8xf32>
    %56 = arith.select %53, %51, %55 : vector<256x8xi1>, vector<256x8xf32>
    %57 = vector.shape_cast %56 : vector<256x8xf32> to vector<16x16x8xf32>
    %58 = arith.truncf %57 : vector<16x16x8xf32> to vector<16x16x8xbf16>
    %c1_59 = arith.constant 1 : index
    %c1_60 = arith.constant 1 : index
    %c0_61 = arith.constant 0 : index
    %59 = vector.load %arg9[%c1_59, %c1_60, %c0_61] : memref<18x18x8xbf16, #tpu.memory_space<vmem>>, vector<16x16x8xbf16>
    tpu.vector_store %arg9[%c1_59, %c1_60, %c0_61], %58 {strides = array<i32>} : memref<18x18x8xbf16, #tpu.memory_space<vmem>>, vector<16x16x8xbf16>,
    %cst_62 = arith.constant 0.000000e+00 : f32
    %60 = vector.broadcast %cst_62 : f32 to vector<256x8xf32>
    %c0_63 = arith.constant 0 : index
    %c0_64 = arith.constant 0 : index
    %c0_65 = arith.constant 0 : index
    %61 = vector.load %arg9[%c0_63, %c0_64, %c0_65] : memref<18x18x8xbf16, #tpu.memory_space<vmem>>, vector<16x18x8xbf16>
    %62 = vector.extract_strided_slice %61 {offsets = [0, 0, 0], sizes = [16, 16, 8], strides = [1, 1, 1]} : vector<16x18x8xbf16> to vector<16x16x8xbf16>
    %63 = vector.extract_strided_slice %61 {offsets = [0, 1, 0], sizes = [16, 16, 8], strides = [1, 1, 1]} : vector<16x18x8xbf16> to vector<16x16x8xbf16>
    %64 = vector.extract_strided_slice %61 {offsets = [0, 2, 0], sizes = [16, 16, 8], strides = [1, 1, 1]} : vector<16x18x8xbf16> to vector<16x16x8xbf16>
    %65 = tpu.concatenate %62, %63, %64 in 2 : vector<16x16x8xbf16>, vector<16x16x8xbf16>, vector<16x16x8xbf16> -> vector<16x16x24xbf16>
    %66 = vector.shape_cast %65 : vector<16x16x24xbf16> to vector<256x24xbf16>
    %c0_66 = arith.constant 0 : index
    %c0_67 = arith.constant 0 : index
    %c0_68 = arith.constant 0 : index
    %67 = vector.load %arg4[%c0_66, %c0_67, %c0_68] : memref<3x24x8xbf16, #tpu.memory_space<vmem>>, vector<1x24x8xbf16>
    %68 = vector.shape_cast %67 : vector<1x24x8xbf16> to vector<24x8xbf16>
    %cst_69 = arith.constant dense<0.000000e+00> : vector<256x8xf32>
    %69 = tpu.matmul %66, %68, %cst_69 {dimension_numbers = #tpu.dot_dimension_numbers<[1], [0], [0], [1], [0, 0, 1, 1], [], []>} : vector<256x24xbf16>, vector<24x8xbf16>, vector<256x8xf32> -> vector<256x8xf32>
    %70 = arith.addf %60, %69 : vector<256x8xf32>
    %c1_70 = arith.constant 1 : index
    %c0_71 = arith.constant 0 : index
    %c0_72 = arith.constant 0 : index
    %71 = vector.load %arg9[%c1_70, %c0_71, %c0_72] : memref<18x18x8xbf16, #tpu.memory_space<vmem>>, vector<16x18x8xbf16>
    %72 = vector.extract_strided_slice %71 {offsets = [0, 0, 0], sizes = [16, 16, 8], strides = [1, 1, 1]} : vector<16x18x8xbf16> to vector<16x16x8xbf16>
    %73 = vector.extract_strided_slice %71 {offsets = [0, 1, 0], sizes = [16, 16, 8], strides = [1, 1, 1]} : vector<16x18x8xbf16> to vector<16x16x8xbf16>
    %74 = vector.extract_strided_slice %71 {offsets = [0, 2, 0], sizes = [16, 16, 8], strides = [1, 1, 1]} : vector<16x18x8xbf16> to vector<16x16x8xbf16>
    %75 = tpu.concatenate %72, %73, %74 in 2 : vector<16x16x8xbf16>, vector<16x16x8xbf16>, vector<16x16x8xbf16> -> vector<16x16x24xbf16>
    %76 = vector.shape_cast %75 : vector<16x16x24xbf16> to vector<256x24xbf16>
    %c1_73 = arith.constant 1 : index
    %c0_74 = arith.constant 0 : index
    %c0_75 = arith.constant 0 : index
    %77 = vector.load %arg4[%c1_73, %c0_74, %c0_75] : memref<3x24x8xbf16, #tpu.memory_space<vmem>>, vector<1x24x8xbf16>
    %78 = vector.shape_cast %77 : vector<1x24x8xbf16> to vector<24x8xbf16>
    %cst_76 = arith.constant dense<0.000000e+00> : vector<256x8xf32>
    %79 = tpu.matmul %76, %78, %cst_76 {dimension_numbers = #tpu.dot_dimension_numbers<[1], [0], [0], [1], [0, 0, 1, 1], [], []>} : vector<256x24xbf16>, vector<24x8xbf16>, vector<256x8xf32> -> vector<256x8xf32>
    %80 = arith.addf %70, %79 : vector<256x8xf32>
    %c2_77 = arith.constant 2 : index
    %c0_78 = arith.constant 0 : index
    %c0_79 = arith.constant 0 : index
    %81 = vector.load %arg9[%c2_77, %c0_78, %c0_79] : memref<18x18x8xbf16, #tpu.memory_space<vmem>>, vector<16x18x8xbf16>
    %82 = vector.extract_strided_slice %81 {offsets = [0, 0, 0], sizes = [16, 16, 8], strides = [1, 1, 1]} : vector<16x18x8xbf16> to vector<16x16x8xbf16>
    %83 = vector.extract_strided_slice %81 {offsets = [0, 1, 0], sizes = [16, 16, 8], strides = [1, 1, 1]} : vector<16x18x8xbf16> to vector<16x16x8xbf16>
    %84 = vector.extract_strided_slice %81 {offsets = [0, 2, 0], sizes = [16, 16, 8], strides = [1, 1, 1]} : vector<16x18x8xbf16> to vector<16x16x8xbf16>
    %85 = tpu.concatenate %82, %83, %84 in 2 : vector<16x16x8xbf16>, vector<16x16x8xbf16>, vector<16x16x8xbf16> -> vector<16x16x24xbf16>
    %86 = vector.shape_cast %85 : vector<16x16x24xbf16> to vector<256x24xbf16>
    %c2_80 = arith.constant 2 : index
    %c0_81 = arith.constant 0 : index
    %c0_82 = arith.constant 0 : index
    %87 = vector.load %arg4[%c2_80, %c0_81, %c0_82] : memref<3x24x8xbf16, #tpu.memory_space<vmem>>, vector<1x24x8xbf16>
    %88 = vector.shape_cast %87 : vector<1x24x8xbf16> to vector<24x8xbf16>
    %cst_83 = arith.constant dense<0.000000e+00> : vector<256x8xf32>
    %89 = tpu.matmul %86, %88, %cst_83 {dimension_numbers = #tpu.dot_dimension_numbers<[1], [0], [0], [1], [0, 0, 1, 1], [], []>} : vector<256x24xbf16>, vector<24x8xbf16>, vector<256x8xf32> -> vector<256x8xf32>
    %90 = arith.addf %80, %89 : vector<256x8xf32>
    %c0_84 = arith.constant 0 : index
    %c0_85 = arith.constant 0 : index
    %91 = vector.load %arg5[%c0_84, %c0_85] : memref<1x8xf32, #tpu.memory_space<vmem>>, vector<1x8xf32>
    %92 = vector.broadcast %91 : vector<1x8xf32> to vector<256x8xf32>
    %93 = arith.addf %90, %92 : vector<256x8xf32>
    %cst_86 = arith.constant 0.000000e+00 : f32
    %94 = vector.broadcast %cst_86 : f32 to vector<256x8xf32>
    %95 = arith.cmpf oge, %93, %94 : vector<256x8xf32>
    %cst_87 = arith.constant 2.000000e-01 : f32
    %96 = vector.broadcast %cst_87 : f32 to vector<256x8xf32>
    %97 = arith.mulf %93, %96 : vector<256x8xf32>
    %98 = arith.select %95, %93, %97 : vector<256x8xi1>, vector<256x8xf32>
    %99 = arith.addf %98, %38 : vector<256x8xf32>
    %100 = vector.shape_cast %99 : vector<256x8xf32> to vector<16x16x8xf32>
    %c0_88 = arith.constant 0 : index
    %c0_89 = arith.constant 0 : index
    %c0_90 = arith.constant 0 : index
    %c0_91 = arith.constant 0 : index
    %101 = vector.load %arg7[%c0_88, %c0_89, %c0_90, %c0_91] : memref<1x16x16x8xf32, #tpu.memory_space<vmem>>, vector<1x16x16x8xf32>
    %102 = vector.shape_cast %101 : vector<1x16x16x8xf32> to vector<16x16x8xf32>
    %103 = vector.shape_cast %100 : vector<16x16x8xf32> to vector<1x16x16x8xf32>
    tpu.vector_store %arg7[%c0_88, %c0_89, %c0_90, %c0_91], %103 {strides = array<i32>} : memref<1x16x16x8xf32, #tpu.memory_space<vmem>>, vector<1x16x16x8xf32>,
    return
  }
  func.func @transform_0(%arg0: i32) -> (i32, i32, i32, i32) {
    %c0_i32 = arith.constant 0 : i32
    %c0_i32_0 = arith.constant 0 : i32
    %c0_i32_1 = arith.constant 0 : i32
    %c0_i32_2 = arith.constant 0 : i32
    return %arg0, %c0_i32, %c0_i32_0, %c0_i32_1 : i32, i32, i32, i32
  }
  func.func @transform_1(%arg0: i32) -> (i32, i32, i32) {
    %c0_i32 = arith.constant 0 : i32
    %c0_i32_0 = arith.constant 0 : i32
    %c0_i32_1 = arith.constant 0 : i32
    %c0_i32_2 = arith.constant 0 : i32
    return %c0_i32, %c0_i32_0, %c0_i32_1 : i32, i32, i32
  }
  func.func @transform_2(%arg0: i32) -> (i32, i32) {
    %c0_i32 = arith.constant 0 : i32
    %c0_i32_0 = arith.constant 0 : i32
    %c0_i32_1 = arith.constant 0 : i32
    return %c0_i32, %c0_i32_0 : i32, i32
  }
  func.func @transform_3(%arg0: i32) -> (i32, i32, i32) {
    %c0_i32 = arith.constant 0 : i32
    %c0_i32_0 = arith.constant 0 : i32
    %c0_i32_1 = arith.constant 0 : i32
    %c0_i32_2 = arith.constant 0 : i32
    return %c0_i32, %c0_i32_0, %c0_i32_1 : i32, i32, i32
  }
  func.func @transform_4(%arg0: i32) -> (i32, i32) {
    %c0_i32 = arith.constant 0 : i32
    %c0_i32_0 = arith.constant 0 : i32
    %c0_i32_1 = arith.constant 0 : i32
    return %c0_i32, %c0_i32_0 : i32, i32
  }
  func.func @transform_5(%arg0: i32) -> (i32, i32) {
    %c0_i32 = arith.constant 0 : i32
    %c0_i32_0 = arith.constant 0 : i32
    %c0_i32_1 = arith.constant 0 : i32
    return %c0_i32, %c0_i32_0 : i32, i32
  }
  func.func @transform_6(%arg0: i32) -> (i32, i32, i32, i32) {
    %c0_i32 = arith.constant 0 : i32
    %c0_i32_0 = arith.constant 0 : i32
    %c0_i32_1 = arith.constant 0 : i32
    %c0_i32_2 = arith.constant 0 : i32
    return %arg0, %c0_i32, %c0_i32_0, %c0_i32_1 : i32, i32, i32, i32
  }
}

</mosaic_0001>

<bundles_post_ra>
// kernel: tpu_custom_call.1
= control target key start
LH: loop header
LB: loop body
LE: loop exit
PB: predicated region body
PF: predicated region fallthrough
CT: control target
= control target key end

     0   :  { %s8382_s21 = smov 0   ;;  %s10883_s0 = inlined_call_operand.vmem [shape: bf16[2,16,16,4], index: 0, kind: input, shape index: {}]   ;;  %s10884_s1 = inlined_call_operand.vmem [shape: bf16[3,12,8], index: 1, kind: input, shape index: {}]   ;;  %s10885_s2 = inlined_call_operand.vmem [shape: f32[1,8], index: 2, kind: input, shape index: {}]   ;;  %s10886_s3 = inlined_call_operand.vmem [shape: bf16[3,24,8], index: 3, kind: input, shape index: {}]   ;;  %s10887_s4 = inlined_call_operand.vmem [shape: f32[1,8], index: 4, kind: input, shape index: {}]   ;;  %s10888_s5 = inlined_call_operand.vmem [shape: bf16[4,8], index: 5, kind: input, shape index: {}]   ;;  %s10889_s6 = inlined_call_operand.vmem [shape: f32[2,16,16,8], index: 6, kind: output, shape index: {}]  }
   0x1 LB: > { %s7109_s22 = sadd.s32 4294967295, %s8341_s21   ;;  %p7113_p0 = scmp.ge.s32.totalorder %s8341_s21, 1  ;;  %s8341_s21 = sphi %s8382_s21, %s16_s21  }
   0x2   : > { %p212_p1 = scmp.lt.s32.totalorder %s8341_s21, 3 }
   0x4   : > { %p213_p2 = pnand %p7113_p0, %p212_p1 }
   0x6   : > { %216 = sbr.rel (%p213_p2) target bundleno = 1216 (0x4c0), region = 44 }
   0xd   : > { %p242_p3 = scmp.lt.s32.totalorder %s7109_s22, 1  ;;  %vm256_vm0 = vcmask 24576   ;;  %vm263_vm1 = vsmask.f32 256  ;;  %v268_v1 = vld [vmem:[#allocation2 + $0xc] sm:$0x1] }
   0xe   : > { %vm8392_vm2 = vmand %vm256_vm0, %vm263_vm1  ;;  %vm319_vm3 = vsmask.f32 7938  ;;  %v324_v2 = vld [vmem:[#allocation2 + $0x14] sm:$0x1]  ;;  %vm253_vm5 = vcmask 27648   ;;  %v8343_v9 = vmov 0  }
   0xf   : > { %s10916_s22 = smov (!%p242_p3, %s7109_s22), 1  ;;  %v269_v3 = vsel %vm8392_vm2, 0, %v268_v1  ;;  %vm8402_vm4 = vmand %vm256_vm0, %vm319_vm3  ;;  %v271_v6 = vld [vmem:[#allocation2 + $0x18] sm:$0x1]  ;;  %v327_v8 = vld [vmem:[#allocation2 + $0x20] sm:$0x1] }
  0x10   : > { %270 = vst [vmem:[#allocation2 + $0xc] sm:$0x1] %v269_v3  ;;  %v325_v5 = vsel %vm8402_vm4, 0, %v324_v2  ;;  %s7493_s23 = sshll.u32 %s10916_s22, 7  ;;  %v272_v7 = vsel %vm8392_vm2, 0, %v271_v6  ;;  %v328_v10 = vsel %vm8402_vm4, 0, %v327_v8  ;;  %vm8447_vm8 = vmand %vm253_vm5, %vm319_vm3 }
  0x11   : > { %326 = vst [vmem:[#allocation2 + $0x14] sm:$0x1] %v325_v5  ;;  %254 = vst.msk [vmem:[#allocation2] sm:$0xf] %vm253_vm5, %v8343_v9  ;;  %s8426_s26 = scalar_lea.vmem %s10883_s0, %s7493_s23  ;;  %vm527_vm6 = vsmask.f32 4368 }
  0x12   : > { %255 = vst.msk [vmem:[#allocation2 + $0x4] sm:$0xf] %vm253_vm5, %v8343_v9  ;;  %259 = vst.msk [vmem:[#allocation2 + $0xcc] sm:$0xf] %vm253_vm5, %v8343_v9  ;;  %v277_v11 = vld [vmem:[#allocation2 + $0x30] sm:$0x1] }
  0x13   : > { %257 = vst.msk [vmem:[#allocation2 + $0x8] sm:$0x1] %vm256_vm0, %v8343_v9  ;;  %261 = vst.msk [vmem:[#allocation2 + $0xd4] sm:$0x1] %vm256_vm0, %v8343_v9  ;;  %v495_v12 = vld [vmem:[%s8426_s26] sm:$0xf] }
  0x14   : > { %260 = vst.msk [vmem:[#allocation2 + $0xd0] sm:$0xf] %vm253_vm5, %v8343_v9  ;;  %273 = vst [vmem:[#allocation2 + $0x18] sm:$0x1] %v272_v7  ;;  %v496_v13 = vld [vmem:[%s8426_s26 + $0x4] sm:$0xf] }
  0x15   : > { %329 = vst [vmem:[#allocation2 + $0x20] sm:$0x1] %v328_v10  ;;  %v497_v14 = vld [vmem:[%s8426_s26 + $0x8] sm:$0xf]  ;;  %v530_v15 = vshrl.u32 %v495_v12, 16  ;;  %v533_v16 = vshll.u32 %v495_v12, 16  ;;  %vm8436_vm7 = vmor %vm263_vm1, %vm527_vm6 }
  0x16   : > { %v538_v17 = vshrl.u32 %v496_v13, 16  ;;  %v541_v18 = vshll.u32 %v496_v13, 16  ;;  %v498_v19 = vld [vmem:[%s8426_s26 + $0xc] sm:$0xf]  ;;  %v547_v20 = vshrl.u32 %v497_v14, 16  ;;  %v550_v21 = vshll.u32 %v497_v14, 16 }
  0x17   : > { %v555_v22 = vshrl.u32 %v498_v19, 16  ;;  %v558_v23 = vshll.u32 %v498_v19, 16  ;;  %v333_v24 = vld [vmem:[#allocation2 + $0x38] sm:$0x1]  ;;  %v532_v26 = vrot.slane %v530_v15, 7  ;;  %v278_v28 = vsel %vm8392_vm2, 0, %v277_v11 }
  0x18   : > { %v540_v27 = vrot.slane %v538_v17, 7  ;;  %v334_v29 = vsel %vm8402_vm4, 0, %v333_v24  ;;  %v501_v30 = vld [vmem:[%s8426_s26 + $0x18] sm:$0xf]  ;;  %v852_v32 = vld [vmem:[#allocation2 + $0xc] sm:$0xf] }
  0x19   : > { %v549_v33 = vrot.slane %v547_v20, 7  ;;  %v557_v34 = vrot.slane %v555_v22, 7  ;;  %279 = vst [vmem:[#allocation2 + $0x30] sm:$0x1] %v278_v28  ;;  %335 = vst [vmem:[#allocation2 + $0x38] sm:$0x1] %v334_v29  ;;  %v535_v36 = vor.u32 %v533_v16, %v532_v26 }
  0x1a   : > { %v502_v35 = vld [vmem:[%s8426_s26 + $0x1c] sm:$0xf]  ;;  %v536_v37 = vrot.slane %v532_v26, 4  ;;  %v543_v38 = vor.u32 %v541_v18, %v540_v27  ;;  %v545_v39 = vrot.slane %v540_v27, 4  ;;  %v856_v40 = vld [vmem:[#allocation2 + $0x14] sm:$0x1] }
  0x1b   : > { %v274_v41 = vld [vmem:[#allocation2 + $0x24] sm:$0x1]  ;;  %v552_v42 = vor.u32 %v550_v21, %v549_v33  ;;  %v553_v43 = vrot.slane %v549_v33, 4  ;;  %v560_v44 = vor.u32 %v558_v23, %v557_v34  ;;  %v562_v45 = vrot.slane %v557_v34, 4  ;;  %v859_v46 = vld [vmem:[#allocation2 + $0x18] sm:$0xf] }
  0x1c   : > { %v330_v47 = vld [vmem:[#allocation2 + $0x2c] sm:$0x1]  ;;  %v544_v48 = vsel %vm8436_vm7, %v536_v37, %v543_v38  ;;  %v853_v49 = vsel %vm8447_vm8, %v535_v36, %v852_v32  ;;  %v857_v50 = vsel %vm8392_vm2, %v545_v39, %v856_v40  ;;  %v863_v51 = vld [vmem:[#allocation2 + $0x20] sm:$0x1]  ;;  %v581_v52 = vshrl.u32 %v501_v30, 16  ;;  %s8344_s27 = smov 8  }
  0x1d   : > { %v499_v53 = vld [vmem:[%s8426_s26 + $0x10] sm:$0xf]  ;;  %854 = vst [vmem:[#allocation2 + $0xc] sm:$0xf] %v853_v49  ;;  %855 = vst.msk [vmem:[#allocation2 + $0x10] sm:$0xf] %vm253_vm5, %v544_v48  ;;  %v561_v54 = vsel %vm8436_vm7, %v553_v43, %v560_v44  ;;  %v860_v55 = vsel %vm8447_vm8, %v552_v42, %v859_v46  ;;  %v864_v56 = vsel %vm8392_vm2, %v562_v45, %v863_v51 }
  0x1e   : > { %858 = vst [vmem:[#allocation2 + $0x14] sm:$0x1] %v857_v50  ;;  %v584_v57 = vshll.u32 %v501_v30, 16  ;;  %v500_v58 = vld [vmem:[%s8426_s26 + $0x14] sm:$0xf]  ;;  %v583_v59 = vrot.slane %v581_v52, 7 }
  0x1f   : > { %861 = vst [vmem:[#allocation2 + $0x18] sm:$0xf] %v860_v55  ;;  %862 = vst.msk [vmem:[#allocation2 + $0x1c] sm:$0xf] %vm253_vm5, %v561_v54  ;;  %v589_v60 = vshrl.u32 %v502_v35, 16  ;;  %v592_v61 = vshll.u32 %v502_v35, 16 }
  0x20   : > { %865 = vst [vmem:[#allocation2 + $0x20] sm:$0x1] %v864_v56  ;;  %v275_v62 = vsel %vm8392_vm2, 0, %v274_v41  ;;  %v283_v63 = vld [vmem:[#allocation2 + $0x48] sm:$0x1]  ;;  %vm1365_vm9 = vcmask 1046528   ;;  %v586_v6 = vor.u32 %v584_v57, %v583_v59 }
  0x21   : > { %276 = vst [vmem:[#allocation2 + $0x24] sm:$0x1] %v275_v62  ;;  %v331_v1 = vsel %vm8402_vm4, 0, %v330_v47  ;;  %v564_v2 = vshrl.u32 %v499_v53, 16  ;;  %v572_v3 = vshrl.u32 %v500_v58, 16  ;;  %v587_v7 = vrot.slane %v583_v59, 4 }
  0x22   : > { %v339_v5 = vld [vmem:[#allocation2 + $0x50] sm:$0x1]  ;;  %v591_v8 = vrot.slane %v589_v60, 7  ;;  %332 = vst [vmem:[#allocation2 + $0x2c] sm:$0x1] %v331_v1  ;;  %v567_v11 = vshll.u32 %v499_v53, 16 }
  0x23   : > { %v873_v10 = vld [vmem:[#allocation2 + $0x30] sm:$0xf]  ;;  %v877_v12 = vld [vmem:[#allocation2 + $0x38] sm:$0x1]  ;;  %v566_v13 = vrot.slane %v564_v2, 7  ;;  %v8472_v14 = vrot.slane %v572_v3, 7 }
  0x24   : > { %v575_v15 = vshll.u32 %v500_v58, 16  ;;  %v284_v16 = vsel %vm8392_vm2, 0, %v283_v63  ;;  %v594_v17 = vor.u32 %v592_v61, %v591_v8  ;;  %v596_v18 = vrot.slane %v591_v8, 4  ;;  %v1514_v23 = vld [vmem:[#allocation2 + $0xc] sm:$0xf]  ;;  %s8345_s28 = smov 4  }
  0x25   : > { %v874_v19 = vsel %vm8447_vm8, %v586_v6, %v873_v10  ;;  %285 = vst [vmem:[#allocation2 + $0x48] sm:$0x1] %v284_v16  ;;  %v340_v20 = vsel %vm8402_vm4, 0, %v339_v5  ;;  %vm1140_vm10 = vsmask.f32 7424  ;;  %v570_v21 = vrot.slane %v566_v13, 4 }
  0x26   : > { %vm2465_vm11 = vsmask.f32 3328  ;;  %vm2466_vm12 = vsmask.f32 7440  ;;  %875 = vst [vmem:[#allocation2 + $0x30] sm:$0xf] %v874_v19  ;;  %v577_v22 = vor.u32 %v575_v15, %v8472_v14  ;;  %v595_v27 = vsel %vm8436_vm7, %v587_v7, %v594_v17 }
  0x27   : > { %341 = vst [vmem:[#allocation2 + $0x50] sm:$0x1] %v340_v20  ;;  %v1515_v24 = vld [vmem:[#allocation2 + $0x10] sm:$0xf]  ;;  %v1516_v26 = vld [vmem:[#allocation2 + $0x14] sm:$0x1]  ;;  %v878_v28 = vsel %vm8392_vm2, %v596_v18, %v877_v12  ;;  %v569_v34 = vor.u32 %v567_v11, %v566_v13  ;;  %vm8505_vm13 = vmor %vm2465_vm11, %vm2466_vm12 }
  0x28   : > { %v8485_v29 = vcombine.low %v1514_v23, %v1515_v24  ;;  %v7166_v30 = vcombine.low %v1516_v26, %v1516_v26  ;;  %v1517_v32 = vld [vmem:[#allocation2 + $0x18] sm:$0xf]  ;;  %v1518_v33 = vld [vmem:[#allocation2 + $0x1c] sm:$0xf]  ;;  %876 = vst.msk [vmem:[#allocation2 + $0x34] sm:$0xf] %vm253_vm5, %v595_v27  ;;  %v578_v35 = vsel %vm8436_vm7, %v570_v21, %v577_v22 }
  0x29   : > { %879 = vst [vmem:[#allocation2 + $0x38] sm:$0x1] %v878_v28  ;;  %v1519_v36 = vld [vmem:[#allocation2 + $0x20] sm:$0x1]  ;;  %v8490_v37 = vcombine.low %v1517_v32, %v1518_v33  ;;  %v2493_v38 = vshrl.u32 %v1517_v32, 16  ;;  %v2496_v39 = vshll.u32 %v1517_v32, 16 }
  0x2a   : > { %v2502_v40 = vshll.u32 %v1518_v33, 16  ;;  %869 = vst.msk [vmem:[#allocation2 + $0x28] sm:$0xf] %vm253_vm5, %v578_v35  ;;  %v1914_v41 = vrot.slane %v8485_v29, 1  ;;  %v1915_v42 = vrot.slane %v7166_v30, 1  ;;  %v1691_v43 = vshrl.u32 %v8485_v29, 16 }
  0x2b   : > { %v579_v44 = vrot.slane %v8472_v14, 4  ;;  %v1693_v45 = vshll.u32 %v8485_v29, 16  ;;  %v1698_v46 = vshll.u32 %v7166_v30, 16  ;;  %v7167_v47 = vcombine.low %v1519_v36, %v1519_v36  ;;  %v866_v12 = vld [vmem:[#allocation2 + $0x24] sm:$0xf]  ;;  %s8346_s17 = smov 16  }
  0x2c   : > { %v1917_v48 = vrot.slane %v8490_v37, 1  ;;  %v1916_v49 = vsel %vm1365_vm9, %v1914_v41, %v1915_v42  ;;  %v2495_v50 = vrot.slane %v2493_v38, 4  ;;  %v2498_v51 = vrot.slane %v2496_v39, 5  ;;  %v870_v17 = vld [vmem:[#allocation2 + $0x2c] sm:$0x1]  ;;  %s7494_s12 = sshll.u32 %s10916_s22, 8 }
  0x2d   : > { %v2504_v52 = vrot.slane %v2502_v40, 5  ;;  %1962 = vrot.lane.b32.xlu1 %v1916_v49, %s8344_s27  ;;  %v1695_v53 = vrot.slane %v1693_v45, 1  ;;  %v1700_v54 = vrot.slane %v1698_v46, 1  ;;  %v1918_v55 = vrot.slane %v7167_v47, 1  ;;  %v1523_v57 = vld [vmem:[#allocation2 + $0x30] sm:$0xf]  ;;  %s10754_s15 = scalar_lea.vmem %s10889_s6, %s7494_s12 }
  0x2e   : > { %v2506_v56 = vshrl.u32 %v1518_v33, 16  ;;  %v2499_v58 = vor.u32 %v2498_v51, %v2495_v50  ;;  %v2512_v59 = vshll.u32 %v1519_v36, 16  ;;  %v1703_v60 = vshrl.u32 %v8490_v37, 16  ;;  %v505_v26 = vld [vmem:[%s8426_s26 + $0x28] sm:$0xf] }
  0x2f   : > { %v1705_v61 = vshll.u32 %v8490_v37, 16  ;;  %v1696_v62 = vor.u32 %v1695_v53, %v1691_v43  ;;  %v1919_v63 = vsel %vm1365_vm9, %v1917_v48, %v1918_v55  ;;  %v1710_v3 = vshll.u32 %v7167_v47, 16  ;;  %v1524_v5 = vld [vmem:[#allocation2 + $0x34] sm:$0xf]  ;;  %v506_v33 = vld [vmem:[%s8426_s26 + $0x2c] sm:$0xf] }
  0x30   : > { %v2508_v2 = vrot.slane %v2506_v56, 4  ;;  %v1525_v6 = vld [vmem:[#allocation2 + $0x38] sm:$0x1]  ;;  %v2500_v7 = vrot.slane %v2499_v58, 4  ;;  %v2514_v8 = vrot.slane %v2512_v59, 5  ;;  %v8509_v11 = vcombine.low %v1523_v57, %v1524_v5 }
  0x31   : > { %v1707_v10 = vrot.slane %v1705_v61, 1  ;;  %v1701_v13 = vsel %vm1140_vm10, %v1696_v62, %v1700_v54  ;;  %1964 = vrot.lane.b32.xlu1 %v1919_v63, %s8344_s27  ;;  %v1712_v15 = vrot.slane %v1710_v3, 1  ;;  %v7169_v16 = vcombine.low %v1525_v6, %v1525_v6  ;;  %v280_v35 = vld [vmem:[#allocation2 + $0x3c] sm:$0x1]  ;;  %v503_v40 = vld [vmem:[%s8426_s26 + $0x20] sm:$0xf] }
  0x32   : > { %v2509_v14 = vor.u32 %v2508_v2, %v2504_v52  ;;  %1882 = vrot.lane.b32.xlu0 %v1701_v13, %s8345_s28  ;;  %v2505_v18 = vsel %vm8505_vm13, %v2500_v7, %v2504_v52  ;;  %v1727_v20 = vshrl.u32 %v8509_v11, 16  ;;  %v1729_v21 = vshll.u32 %v8509_v11, 16  ;;  %v887_v49 = vld [vmem:[#allocation2 + $0x48] sm:$0xf]  ;;  %v289_v51 = vld [vmem:[#allocation2 + $0x60] sm:$0x1] }
  0x33   : > { %v1708_v19 = vor.u32 %v1707_v10, %v1703_v60  ;;  %v1734_v23 = vshll.u32 %v7169_v16, 16  ;;  %v867_v24 = vsel %vm8447_vm8, %v569_v34, %v866_v12  ;;  %v871_v30 = vsel %vm8392_vm2, %v579_v44, %v870_v17  ;;  %v336_v34 = vld [vmem:[#allocation2 + $0x44] sm:$0x1]  ;;  %v345_v56 = vld [vmem:[#allocation2 + $0x68] sm:$0x1] }
  0x34   : > { %v2510_v22 = vrot.slane %v2509_v14, 4  ;;  %v1731_v28 = vrot.slane %v1729_v21, 1  ;;  %868 = vst [vmem:[#allocation2 + $0x24] sm:$0xf] %v867_v24  ;;  %v1923_v32 = vrot.slane %v8509_v11, 1  ;;  %v1924_v39 = vrot.slane %v7169_v16, 1 }
  0x35   : > { %v1713_v27 = vsel %vm1140_vm10, %v1708_v19, %v1712_v15  ;;  %v1736_v38 = vrot.slane %v1734_v23, 1  ;;  %872 = vst [vmem:[#allocation2 + $0x2c] sm:$0x1] %v871_v30  ;;  %v615_v43 = vshrl.u32 %v505_v26, 16  ;;  %v618_v45 = vshll.u32 %v505_v26, 16 }
  0x36   : > { %v2515_v36 = vsel %vm8505_vm13, %v2510_v22, %v2514_v8  ;;  %1884 = vrot.lane.b32.xlu0 %v1713_v27, %s8345_s28  ;;  %v1732_v42 = vor.u32 %v1731_v28, %v1727_v20  ;;  %v504_v44 = vld [vmem:[%s8426_s26 + $0x24] sm:$0xf]  ;;  %v1925_v46 = vsel %vm1365_vm9, %v1923_v32, %v1924_v39  ;;  %v623_v47 = vshrl.u32 %v506_v33, 16  ;;  %v1521_v57 = vld [vmem:[#allocation2 + $0x28] sm:$0xf] }
  0x37   : > { %v8529_v41 = vcombine.low %v2505_v18, %v2515_v36  ;;  %v626_v48 = vshll.u32 %v506_v33, 16  ;;  %v281_v50 = vsel %vm8392_vm2, 0, %v280_v35  ;;  %v617_v53 = vrot.slane %v615_v43, 7  ;;  %v891_v2 = vld [vmem:[#allocation2 + $0x50] sm:$0x1] }
  0x38   : > { %v1737_v52 = vsel %vm1140_vm10, %v1732_v42, %v1736_v38  ;;  %282 = vst [vmem:[#allocation2 + $0x3c] sm:$0x1] %v281_v50  ;;  %v337_v54 = vsel %vm8402_vm4, 0, %v336_v34  ;;  %v598_v55 = vshrl.u32 %v503_v40, 16  ;;  %v625_v58 = vrot.slane %v623_v47, 7 }
  0x39   : > { %1888 = vrot.lane.b32.xlu1 %v1737_v52, %s8345_s28  ;;  %338 = vst [vmem:[#allocation2 + $0x44] sm:$0x1] %v337_v54  ;;  %v601_v59 = vshll.u32 %v503_v40, 16  ;;  %v606_v60 = vshrl.u32 %v504_v44, 16  ;;  %v609_v61 = vshll.u32 %v504_v44, 16  ;;  %v620_v62 = vor.u32 %v618_v45, %v617_v53 }
  0x3a   : > { %v621_v63 = vrot.slane %v617_v53, 4  ;;  %v600_v3 = vrot.slane %v598_v55, 7  ;;  %v290_v5 = vsel %vm8392_vm2, 0, %v289_v51  ;;  %v628_v7 = vor.u32 %v626_v48, %v625_v58  ;;  %v509_v21 = vld [vmem:[%s8426_s26 + $0x38] sm:$0xf] }
  0x3b   : > { %v1520_v6 = vld [vmem:[#allocation2 + $0x24] sm:$0xf]  ;;  %v630_v8 = vrot.slane %v625_v58, 4  ;;  %v608_v10 = vrot.slane %v606_v60, 7  ;;  %291 = vst [vmem:[#allocation2 + $0x60] sm:$0x1] %v290_v5  ;;  %v888_v15 = vsel %vm8447_vm8, %v620_v62, %v887_v49 }
  0x3c   : > { %v346_v12 = vsel %vm8402_vm4, 0, %v345_v56  ;;  %v1522_v13 = vld [vmem:[#allocation2 + $0x2c] sm:$0x1]  ;;  %v8544_v14 = vcombine.low %v1520_v6, %v1521_v57  ;;  %v603_v16 = vor.u32 %v601_v59, %v600_v3  ;;  %v604_v17 = vrot.slane %v600_v3, 4  ;;  %889 = vst [vmem:[#allocation2 + $0x48] sm:$0xf] %v888_v15 }
  0x3d   : > { %347 = vst [vmem:[#allocation2 + $0x68] sm:$0x1] %v346_v12  ;;  %v7168_v18 = vcombine.low %v1522_v13, %v1522_v13  ;;  %1968 = vrot.lane.b32.xlu1 %v1925_v46, %s8344_s27  ;;  %v629_v19 = vsel %vm8436_vm7, %v621_v63, %v628_v7  ;;  %v892_v20 = vsel %vm8392_vm2, %v630_v8, %v891_v2  ;;  %v510_v22 = vld [vmem:[%s8426_s26 + $0x3c] sm:$0xf]  ;;  %v286_v27 = vld [vmem:[#allocation2 + $0x54] sm:$0x1] }
  0x3e   : > { %v1715_v23 = vshrl.u32 %v8544_v14, 16  ;;  %v1717_v24 = vshll.u32 %v8544_v14, 16  ;;  %890 = vst.msk [vmem:[#allocation2 + $0x4c] sm:$0xf] %vm253_vm5, %v629_v19  ;;  %893 = vst [vmem:[#allocation2 + $0x50] sm:$0x1] %v892_v20  ;;  %v611_v26 = vor.u32 %v609_v61, %v608_v10 }
  0x3f   : > { %v342_v28 = vld [vmem:[#allocation2 + $0x5c] sm:$0x1]  ;;  %v1722_v30 = vshll.u32 %v7168_v18, 16  ;;  %v1920_v32 = vrot.slane %v8544_v14, 1  ;;  %v613_v33 = vrot.slane %v608_v10, 4  ;;  %v649_v40 = vshrl.u32 %v509_v21, 16 }
  0x40   : > { %v880_v35 = vld [vmem:[#allocation2 + $0x3c] sm:$0xf]  ;;  %v1719_v36 = vrot.slane %v1717_v24, 1  ;;  %v612_v38 = vsel %vm8436_vm7, %v604_v17, %v611_v26  ;;  %v884_v34 = vld [vmem:[#allocation2 + $0x44] sm:$0x1]  ;;  %v1921_v45 = vrot.slane %v7168_v18, 1 }
  0x41   : > { %v881_v39 = vsel %vm8447_vm8, %v603_v16, %v880_v35  ;;  %v507_v42 = vld [vmem:[%s8426_s26 + $0x30] sm:$0xf]  ;;  %v1724_v43 = vrot.slane %v1722_v30, 1  ;;  %883 = vst.msk [vmem:[#allocation2 + $0x40] sm:$0xf] %vm253_vm5, %v612_v38  ;;  %v885_v44 = vsel %vm8392_vm2, %v613_v33, %v884_v34  ;;  %v652_v46 = vshll.u32 %v509_v21, 16 }
  0x42   : > { %882 = vst [vmem:[#allocation2 + $0x3c] sm:$0xf] %v881_v39  ;;  %v1720_v47 = vor.u32 %v1719_v36, %v1715_v23  ;;  %886 = vst [vmem:[#allocation2 + $0x44] sm:$0x1] %v885_v44  ;;  %v651_v48 = vrot.slane %v649_v40, 7  ;;  %v657_v49 = vshrl.u32 %v510_v22, 16  ;;  %v1922_v60 = vsel %vm1365_vm9, %v1920_v32, %v1921_v45 }
  0x43   : > { %v660_v50 = vshll.u32 %v510_v22, 16  ;;  %v287_v51 = vsel %vm8392_vm2, 0, %v286_v27  ;;  %v343_v52 = vsel %vm8402_vm4, 0, %v342_v28  ;;  %v508_v53 = vld [vmem:[%s8426_s26 + $0x34] sm:$0xf]  ;;  %v632_v54 = vshrl.u32 %v507_v42, 16 }
  0x44   : > { %v1725_v55 = vsel %vm1140_vm10, %v1720_v47, %v1724_v43  ;;  %v1529_v56 = vld [vmem:[#allocation2 + $0x48] sm:$0xf]  ;;  %v654_v57 = vor.u32 %v652_v46, %v651_v48  ;;  %v659_v58 = vrot.slane %v657_v49, 7  ;;  %v901_v59 = vld [vmem:[#allocation2 + $0x60] sm:$0xf]  ;;  %v655_v63 = vrot.slane %v651_v48, 4 }
  0x45   : > { %288 = vst [vmem:[#allocation2 + $0x54] sm:$0x1] %v287_v51  ;;  %344 = vst [vmem:[#allocation2 + $0x5c] sm:$0x1] %v343_v52  ;;  %1886 = vrot.lane.b32.xlu0 %v1725_v55, %s8345_s28  ;;  %v1530_v61 = vld [vmem:[#allocation2 + $0x4c] sm:$0xf] }
  0x46   : > { %v1531_v62 = vld [vmem:[#allocation2 + $0x50] sm:$0x1]  ;;  %v8575_v2 = vcombine.low %v1529_v56, %v1530_v61  ;;  %v662_v5 = vor.u32 %v660_v50, %v659_v58  ;;  %v905_v6 = vld [vmem:[#allocation2 + $0x68] sm:$0x1]  ;;  %v635_v7 = vshll.u32 %v507_v42, 16  ;;  %v664_v8 = vrot.slane %v659_v58, 4 }
  0x47   : > { %v7171_v3 = vcombine.low %v1531_v62, %v1531_v62  ;;  %v902_v10 = vsel %vm8447_vm8, %v654_v57, %v901_v59  ;;  %v634_v12 = vrot.slane %v632_v54, 7  ;;  %v640_v13 = vshrl.u32 %v508_v53, 16  ;;  %v295_v32 = vld [vmem:[#allocation2 + $0x78] sm:$0x1]  ;;  %v351_v39 = vld [vmem:[#allocation2 + $0x80] sm:$0x1] }
  0x48   : > { %v1751_v15 = vshrl.u32 %v8575_v2, 16  ;;  %v1753_v16 = vshll.u32 %v8575_v2, 16  ;;  %903 = vst [vmem:[#allocation2 + $0x60] sm:$0xf] %v902_v10  ;;  %v1527_v19 = vld [vmem:[#allocation2 + $0x40] sm:$0xf]  ;;  %v663_v23 = vsel %vm8436_vm7, %v655_v63, %v662_v5  ;;  %v906_v24 = vsel %vm8392_vm2, %v664_v8, %v905_v6 }
  0x49   : > { %v1758_v17 = vshll.u32 %v7171_v3, 16  ;;  %v1526_v18 = vld [vmem:[#allocation2 + $0x3c] sm:$0xf]  ;;  %1966 = vrot.lane.b32.xlu0 %v1922_v60, %s8344_s27  ;;  %v1528_v20 = vld [vmem:[#allocation2 + $0x44] sm:$0x1]  ;;  %v1929_v21 = vrot.slane %v8575_v2, 1  ;;  %v637_v33 = vor.u32 %v635_v7, %v634_v12 }
  0x4a   : > { %v1930_v22 = vrot.slane %v7171_v3, 1  ;;  %v1755_v26 = vrot.slane %v1753_v16, 1  ;;  %v8587_v28 = vcombine.low %v1526_v18, %v1527_v19  ;;  %v7170_v30 = vcombine.low %v1528_v20, %v1528_v20  ;;  %904 = vst.msk [vmem:[#allocation2 + $0x64] sm:$0xf] %vm253_vm5, %v663_v23  ;;  %907 = vst [vmem:[#allocation2 + $0x68] sm:$0x1] %v906_v24 }
  0x4b   : > { %v1760_v27 = vrot.slane %v1758_v17, 1  ;;  %v638_v35 = vrot.slane %v634_v12, 4  ;;  %v642_v36 = vrot.slane %v640_v13, 7  ;;  %v643_v38 = vshll.u32 %v508_v53, 16  ;;  %v513_v49 = vld [vmem:[%s8426_s26 + $0x48] sm:$0xf] }
  0x4c   : > { %v1756_v34 = vor.u32 %v1755_v26, %v1751_v15  ;;  %v1739_v40 = vshrl.u32 %v8587_v28, 16  ;;  %v1741_v42 = vshll.u32 %v8587_v28, 16  ;;  %v1746_v43 = vshll.u32 %v7170_v30, 16  ;;  %v894_v45 = vld [vmem:[#allocation2 + $0x54] sm:$0xf] }
  0x4d   : > { %v1931_v44 = vsel %vm1365_vm9, %v1929_v21, %v1930_v22  ;;  %v1926_v46 = vrot.slane %v8587_v28, 1  ;;  %v645_v47 = vor.u32 %v643_v38, %v642_v36  ;;  %v898_v48 = vld [vmem:[#allocation2 + $0x5c] sm:$0x1]  ;;  %v647_v53 = vrot.slane %v642_v36, 4  ;;  %v514_v54 = vld [vmem:[%s8426_s26 + $0x4c] sm:$0xf] }
  0x4e   : > { %v1761_v50 = vsel %vm1140_vm10, %v1756_v34, %v1760_v27  ;;  %v1743_v51 = vrot.slane %v1741_v42, 1  ;;  %v1748_v52 = vrot.slane %v1746_v43, 1  ;;  %v1927_v55 = vrot.slane %v7170_v30, 1  ;;  %v292_v3 = vld [vmem:[#allocation2 + $0x6c] sm:$0x1] }
  0x4f   : > { %1892 = vrot.lane.b32.xlu1 %v1761_v50, %s8345_s28  ;;  %v1535_v56 = vld [vmem:[#allocation2 + $0x60] sm:$0xf]  ;;  %v646_v57 = vsel %vm8436_vm7, %v638_v35, %v645_v47  ;;  %v895_v58 = vsel %vm8447_vm8, %v637_v33, %v894_v45  ;;  %v296_v59 = vsel %vm8392_vm2, 0, %v295_v32  ;;  %v899_v61 = vsel %vm8392_vm2, %v647_v53, %v898_v48  ;;  %v348_v30 = vld [vmem:[#allocation2 + $0x74] sm:$0x1] }
  0x50   : > { %v1744_v60 = vor.u32 %v1743_v51, %v1739_v40  ;;  %896 = vst [vmem:[#allocation2 + $0x54] sm:$0xf] %v895_v58  ;;  %897 = vst.msk [vmem:[#allocation2 + $0x58] sm:$0xf] %vm253_vm5, %v646_v57  ;;  %v352_v62 = vsel %vm8402_vm4, 0, %v351_v39  ;;  %v683_v63 = vshrl.u32 %v513_v49, 16  ;;  %v1928_v19 = vsel %vm1365_vm9, %v1926_v46, %v1927_v55 }
  0x51   : > { %297 = vst [vmem:[#allocation2 + $0x78] sm:$0x1] %v296_v59  ;;  %v1536_v5 = vld [vmem:[#allocation2 + $0x64] sm:$0xf]  ;;  %v1537_v6 = vld [vmem:[#allocation2 + $0x68] sm:$0x1] }
  0x52   : > { %900 = vst [vmem:[#allocation2 + $0x5c] sm:$0x1] %v899_v61  ;;  %353 = vst [vmem:[#allocation2 + $0x80] sm:$0x1] %v352_v62  ;;  %v686_v7 = vshll.u32 %v513_v49, 16  ;;  %v691_v8 = vshrl.u32 %v514_v54, 16  ;;  %v1749_v10 = vsel %vm1140_vm10, %v1744_v60, %v1748_v52  ;;  %v8610_v12 = vcombine.low %v1535_v56, %v1536_v5 }
  0x53   : > { %v7173_v13 = vcombine.low %v1537_v6, %v1537_v6  ;;  %1890 = vrot.lane.b32.xlu0 %v1749_v10, %s8345_s28  ;;  %1972 = vrot.lane.b32.xlu1 %v1931_v44, %s8344_s27  ;;  %v685_v15 = vrot.slane %v683_v63, 7  ;;  %v694_v17 = vshll.u32 %v514_v54, 16  ;;  %v293_v18 = vsel %vm8392_vm2, 0, %v292_v3  ;;  %v511_v38 = vld [vmem:[%s8426_s26 + $0x40] sm:$0xf] }
  0x54   : > { %v693_v16 = vrot.slane %v691_v8, 7  ;;  %v1775_v20 = vshrl.u32 %v8610_v12, 16  ;;  %v1777_v21 = vshll.u32 %v8610_v12, 16  ;;  %294 = vst [vmem:[#allocation2 + $0x6c] sm:$0x1] %v293_v18  ;;  %v1935_v23 = vrot.slane %v8610_v12, 1 }
  0x55   : > { %v1782_v22 = vshll.u32 %v7173_v13, 16  ;;  %v1936_v24 = vrot.slane %v7173_v13, 1  ;;  %v688_v26 = vor.u32 %v686_v7, %v685_v15  ;;  %v689_v27 = vrot.slane %v685_v15, 4  ;;  %v512_v42 = vld [vmem:[%s8426_s26 + $0x44] sm:$0xf] }
  0x56   : > { %v1779_v32 = vrot.slane %v1777_v21, 1  ;;  %v696_v35 = vor.u32 %v694_v17, %v693_v16  ;;  %v698_v36 = vrot.slane %v693_v16, 4  ;;  %v301_v49 = vld [vmem:[#allocation2 + $0x90] sm:$0x1]  ;;  %v349_v52 = vsel %vm8402_vm4, 0, %v348_v30 }
  0x57   : > { %v1784_v33 = vrot.slane %v1782_v22, 1  ;;  %1970 = vrot.lane.b32.xlu0 %v1928_v19, %s8344_s27  ;;  %v1532_v39 = vld [vmem:[#allocation2 + $0x54] sm:$0xf]  ;;  %v1533_v34 = vld [vmem:[#allocation2 + $0x58] sm:$0xf]  ;;  %v1937_v58 = vsel %vm1365_vm9, %v1935_v23, %v1936_v24  ;;  %v666_v60 = vshrl.u32 %v511_v38, 16 }
  0x58   : > { %v915_v40 = vld [vmem:[#allocation2 + $0x78] sm:$0xf]  ;;  %v1780_v43 = vor.u32 %v1779_v32, %v1775_v20  ;;  %v8623_v44 = vcombine.low %v1532_v39, %v1533_v34  ;;  %v697_v46 = vsel %vm8436_vm7, %v689_v27, %v696_v35  ;;  %350 = vst [vmem:[#allocation2 + $0x74] sm:$0x1] %v349_v52  ;;  %v669_v63 = vshll.u32 %v511_v38, 16 }
  0x59   : > { %v1534_v45 = vld [vmem:[#allocation2 + $0x5c] sm:$0x1]  ;;  %v916_v47 = vsel %vm8447_vm8, %v688_v26, %v915_v40  ;;  %v919_v48 = vld [vmem:[#allocation2 + $0x80] sm:$0x1]  ;;  %918 = vst.msk [vmem:[#allocation2 + $0x7c] sm:$0xf] %vm253_vm5, %v697_v46 }
  0x5a   : > { %v7172_v50 = vcombine.low %v1534_v45, %v1534_v45  ;;  %917 = vst [vmem:[#allocation2 + $0x78] sm:$0xf] %v916_v47  ;;  %v920_v51 = vsel %vm8392_vm2, %v698_v36, %v919_v48  ;;  %v1785_v53 = vsel %vm1140_vm10, %v1780_v43, %v1784_v33  ;;  %v1763_v54 = vshrl.u32 %v8623_v44, 16  ;;  %v357_v56 = vld [vmem:[#allocation2 + $0x98] sm:$0x1] }
  0x5b   : > { %v1765_v55 = vshll.u32 %v8623_v44, 16  ;;  %921 = vst [vmem:[#allocation2 + $0x80] sm:$0x1] %v920_v51  ;;  %1896 = vrot.lane.b32.xlu1 %v1785_v53, %s8345_s28  ;;  %v1932_v59 = vrot.slane %v8623_v44, 1  ;;  %v517_v61 = vld [vmem:[%s8426_s26 + $0x58] sm:$0xf] }
  0x5c   : > { %v1770_v57 = vshll.u32 %v7172_v50, 16  ;;  %v674_v3 = vshrl.u32 %v512_v42, 16  ;;  %v677_v5 = vshll.u32 %v512_v42, 16  ;;  %v518_v6 = vld [vmem:[%s8426_s26 + $0x5c] sm:$0xf]  ;;  %v1933_v8 = vrot.slane %v7172_v50, 1 }
  0x5d   : > { %v1767_v62 = vrot.slane %v1765_v55, 1  ;;  %v668_v10 = vrot.slane %v666_v60, 7  ;;  %v302_v13 = vsel %vm8392_vm2, 0, %v301_v49  ;;  %v908_v17 = vld [vmem:[#allocation2 + $0x6c] sm:$0xf]  ;;  %v358_v18 = vsel %vm8402_vm4, 0, %v357_v56 }
  0x5e   : > { %v1772_v7 = vrot.slane %v1770_v57, 1  ;;  %v676_v16 = vrot.slane %v674_v3, 7  ;;  %303 = vst [vmem:[#allocation2 + $0x90] sm:$0x1] %v302_v13  ;;  %v717_v19 = vshrl.u32 %v517_v61, 16  ;;  %v720_v22 = vshll.u32 %v517_v61, 16 }
  0x5f   : > { %v1768_v15 = vor.u32 %v1767_v62, %v1763_v54  ;;  %1976 = vrot.lane.b32.xlu1 %v1937_v58, %s8344_s27  ;;  %v671_v20 = vor.u32 %v669_v63, %v668_v10  ;;  %v672_v21 = vrot.slane %v668_v10, 4  ;;  %359 = vst [vmem:[#allocation2 + $0x98] sm:$0x1] %v358_v18  ;;  %v725_v23 = vshrl.u32 %v518_v6, 16  ;;  %v298_v35 = vld [vmem:[#allocation2 + $0x84] sm:$0x1] }
  0x60   : > { %v1542_v27 = vld [vmem:[#allocation2 + $0x7c] sm:$0xf]  ;;  %v679_v30 = vor.u32 %v677_v5, %v676_v16  ;;  %v681_v32 = vrot.slane %v676_v16, 4  ;;  %v719_v33 = vrot.slane %v717_v19, 7  ;;  %v912_v34 = vld [vmem:[#allocation2 + $0x74] sm:$0x1]  ;;  %v1934_v45 = vsel %vm1365_vm9, %v1932_v59, %v1933_v8 }
  0x61   : > { %v1773_v24 = vsel %vm1140_vm10, %v1768_v15, %v1772_v7  ;;  %v1541_v26 = vld [vmem:[#allocation2 + $0x78] sm:$0xf]  ;;  %v909_v39 = vsel %vm8447_vm8, %v671_v20, %v908_v17  ;;  %v727_v40 = vrot.slane %v725_v23, 7  ;;  %v728_v42 = vshll.u32 %v518_v6, 16  ;;  %v354_v43 = vld [vmem:[#allocation2 + $0x8c] sm:$0x1] }
  0x62   : > { %1894 = vrot.lane.b32.xlu0 %v1773_v24, %s8345_s28  ;;  %v1543_v36 = vld [vmem:[#allocation2 + $0x80] sm:$0x1]  ;;  %v8649_v38 = vcombine.low %v1541_v26, %v1542_v27  ;;  %v680_v47 = vsel %vm8436_vm7, %v672_v21, %v679_v30  ;;  %910 = vst [vmem:[#allocation2 + $0x6c] sm:$0xf] %v909_v39  ;;  %v913_v48 = vsel %vm8392_vm2, %v681_v32, %v912_v34  ;;  %v515_v49 = vld [vmem:[%s8426_s26 + $0x50] sm:$0xf] }
  0x63   : > { %v7175_v46 = vcombine.low %v1543_v36, %v1543_v36  ;;  %911 = vst.msk [vmem:[#allocation2 + $0x70] sm:$0xf] %vm253_vm5, %v680_v47  ;;  %914 = vst [vmem:[#allocation2 + $0x74] sm:$0x1] %v913_v48  ;;  %v722_v52 = vor.u32 %v720_v22, %v719_v33  ;;  %v516_v53 = vld [vmem:[%s8426_s26 + $0x54] sm:$0xf]  ;;  %v730_v62 = vor.u32 %v728_v42, %v727_v40 }
  0x64   : > { %v1799_v50 = vshrl.u32 %v8649_v38, 16  ;;  %v1801_v51 = vshll.u32 %v8649_v38, 16  ;;  %v307_v54 = vld [vmem:[#allocation2 + $0xa8] sm:$0x1]  ;;  %v1941_v56 = vrot.slane %v8649_v38, 1  ;;  %v723_v58 = vrot.slane %v719_v33, 4 }
  0x65   : > { %v1806_v55 = vshll.u32 %v7175_v46, 16  ;;  %v1942_v57 = vrot.slane %v7175_v46, 1  ;;  %v363_v59 = vld [vmem:[#allocation2 + $0xb0] sm:$0x1]  ;;  %v8665_v60 = vld [vmem:[%s8426_s26 + $0x68] sm:$0xf] }
  0x66   : > { %1974 = vrot.lane.b32.xlu0 %v1934_v45, %s8344_s27  ;;  %v1803_v61 = vrot.slane %v1801_v51, 1  ;;  %v732_v63 = vrot.slane %v727_v40, 4  ;;  %v929_v3 = vld [vmem:[#allocation2 + $0x90] sm:$0xf]  ;;  %v299_v5 = vsel %vm8392_vm2, 0, %v298_v35  ;;  %v355_v10 = vsel %vm8402_vm4, 0, %v354_v43 }
  0x67   : > { %v1808_v6 = vrot.slane %v1806_v55, 1  ;;  %v930_v7 = vsel %vm8447_vm8, %v722_v52, %v929_v3  ;;  %v933_v8 = vld [vmem:[#allocation2 + $0x98] sm:$0x1]  ;;  %300 = vst [vmem:[#allocation2 + $0x84] sm:$0x1] %v299_v5  ;;  %v731_v15 = vsel %vm8436_vm7, %v723_v58, %v730_v62  ;;  %v700_v17 = vshrl.u32 %v515_v49, 16 }
  0x68   : > { %v1804_v13 = vor.u32 %v1803_v61, %v1799_v50  ;;  %931 = vst [vmem:[#allocation2 + $0x90] sm:$0xf] %v930_v7  ;;  %v934_v16 = vsel %vm8392_vm2, %v732_v63, %v933_v8  ;;  %356 = vst [vmem:[#allocation2 + $0x8c] sm:$0x1] %v355_v10  ;;  %v703_v18 = vshll.u32 %v515_v49, 16  ;;  %v708_v19 = vshrl.u32 %v516_v53, 16 }
  0x69   : > { %932 = vst.msk [vmem:[#allocation2 + $0x94] sm:$0xf] %vm253_vm5, %v731_v15  ;;  %935 = vst [vmem:[#allocation2 + $0x98] sm:$0x1] %v934_v16  ;;  %v711_v20 = vshll.u32 %v516_v53, 16  ;;  %v308_v21 = vsel %vm8392_vm2, 0, %v307_v54  ;;  %v1943_v35 = vsel %vm1365_vm9, %v1941_v56, %v1942_v57 }
  0x6a   : > { %v522_v22 = vld [vmem:[%s8426_s26 + $0x6c] sm:$0xf]  ;;  %v1809_v23 = vsel %vm1140_vm10, %v1804_v13, %v1808_v6  ;;  %v702_v26 = vrot.slane %v700_v17, 7  ;;  %309 = vst [vmem:[#allocation2 + $0xa8] sm:$0x1] %v308_v21  ;;  %v364_v27 = vsel %vm8402_vm4, 0, %v363_v59 }
  0x6b   : > { %v1538_v24 = vld [vmem:[#allocation2 + $0x6c] sm:$0xf]  ;;  %v751_v30 = vshrl.u32 %v8665_v60, 16  ;;  %1900 = vrot.lane.b32.xlu1 %v1809_v23, %s8345_s28  ;;  %v1539_v32 = vld [vmem:[#allocation2 + $0x70] sm:$0xf]  ;;  %v710_v36 = vrot.slane %v708_v19, 7 }
  0x6c   : > { %v1540_v33 = vld [vmem:[#allocation2 + $0x74] sm:$0x1]  ;;  %365 = vst [vmem:[#allocation2 + $0xb0] sm:$0x1] %v364_v27  ;;  %v8688_v39 = vcombine.low %v1538_v24, %v1539_v32  ;;  %v705_v40 = vor.u32 %v703_v18, %v702_v26  ;;  %v706_v42 = vrot.slane %v702_v26, 4  ;;  %v754_v47 = vshll.u32 %v8665_v60, 16 }
  0x6d   : > { %v7174_v34 = vcombine.low %v1540_v33, %v1540_v33  ;;  %v713_v43 = vor.u32 %v711_v20, %v710_v36  ;;  %v715_v45 = vrot.slane %v710_v36, 4  ;;  %v753_v46 = vrot.slane %v751_v30, 7  ;;  %v304_v8 = vld [vmem:[#allocation2 + $0x9c] sm:$0x1]  ;;  %v360_v10 = vld [vmem:[#allocation2 + $0xa4] sm:$0x1] }
  0x6e   : > { %v1787_v48 = vshrl.u32 %v8688_v39, 16  ;;  %v1789_v49 = vshll.u32 %v8688_v39, 16  ;;  %v922_v51 = vld [vmem:[#allocation2 + $0x84] sm:$0xf]  ;;  %v759_v52 = vshrl.u32 %v522_v22, 16  ;;  %v1938_v53 = vrot.slane %v8688_v39, 1 }
  0x6f   : > { %v1794_v50 = vshll.u32 %v7174_v34, 16  ;;  %1980 = vrot.lane.b32.xlu1 %v1943_v35, %s8344_s27  ;;  %v1547_v54 = vld [vmem:[#allocation2 + $0x90] sm:$0xf]  ;;  %v714_v55 = vsel %vm8436_vm7, %v706_v42, %v713_v43  ;;  %v923_v56 = vsel %vm8447_vm8, %v705_v40, %v922_v51  ;;  %v926_v57 = vld [vmem:[#allocation2 + $0x8c] sm:$0x1]  ;;  %v1939_v63 = vrot.slane %v7174_v34, 1 }
  0x70   : > { %v1791_v58 = vrot.slane %v1789_v49, 1  ;;  %v1548_v60 = vld [vmem:[#allocation2 + $0x94] sm:$0xf]  ;;  %v1549_v61 = vld [vmem:[#allocation2 + $0x98] sm:$0x1]  ;;  %v927_v62 = vsel %vm8392_vm2, %v715_v45, %v926_v57  ;;  %v756_v6 = vor.u32 %v754_v47, %v753_v46  ;;  %v757_v15 = vrot.slane %v753_v46, 4 }
  0x71   : > { %v1796_v59 = vrot.slane %v1794_v50, 1  ;;  %924 = vst [vmem:[#allocation2 + $0x84] sm:$0xf] %v923_v56  ;;  %925 = vst.msk [vmem:[#allocation2 + $0x88] sm:$0xf] %vm253_vm5, %v714_v55  ;;  %v8702_v3 = vcombine.low %v1547_v54, %v1548_v60  ;;  %v7177_v5 = vcombine.low %v1549_v61, %v1549_v61  ;;  %v761_v16 = vrot.slane %v759_v52, 7 }
  0x72   : > { %928 = vst [vmem:[#allocation2 + $0x8c] sm:$0x1] %v927_v62  ;;  %v943_v7 = vld [vmem:[#allocation2 + $0xa8] sm:$0xf]  ;;  %v1792_v13 = vor.u32 %v1791_v58, %v1787_v48  ;;  %v762_v17 = vshll.u32 %v522_v22, 16  ;;  %v1940_v40 = vsel %vm1365_vm9, %v1938_v53, %v1939_v63  ;;  %v305_v43 = vsel %vm8392_vm2, 0, %v304_v8 }
  0x73   : > { %v947_v18 = vld [vmem:[#allocation2 + $0xb0] sm:$0x1]  ;;  %v519_v19 = vld [vmem:[%s8426_s26 + $0x60] sm:$0xf]  ;;  %v1823_v20 = vshrl.u32 %v8702_v3, 16  ;;  %v1825_v21 = vshll.u32 %v8702_v3, 16  ;;  %v944_v22 = vsel %vm8447_vm8, %v756_v6, %v943_v7 }
  0x74   : > { %v1830_v23 = vshll.u32 %v7177_v5, 16  ;;  %v520_v24 = vld [vmem:[%s8426_s26 + $0x64] sm:$0xf]  ;;  %v1797_v26 = vsel %vm1140_vm10, %v1792_v13, %v1796_v59  ;;  %v1947_v27 = vrot.slane %v8702_v3, 1  ;;  %v1948_v30 = vrot.slane %v7177_v5, 1 }
  0x75   : > { %v764_v32 = vor.u32 %v762_v17, %v761_v16  ;;  %1898 = vrot.lane.b32.xlu0 %v1797_v26, %s8345_s28  ;;  %v1827_v33 = vrot.slane %v1825_v21, 1  ;;  %v766_v36 = vrot.slane %v761_v16, 4  ;;  %v313_v34 = vld [vmem:[#allocation2 + $0xc0] sm:$0x1]  ;;  %945 = vst [vmem:[#allocation2 + $0xa8] sm:$0xf] %v944_v22 }
  0x76   : > { %v1832_v35 = vrot.slane %v1830_v23, 1  ;;  %v361_v45 = vsel %vm8402_vm4, 0, %v360_v10  ;;  %306 = vst [vmem:[#allocation2 + $0x9c] sm:$0x1] %v305_v43  ;;  %v734_v50 = vshrl.u32 %v519_v19, 16  ;;  %v737_v51 = vshll.u32 %v519_v19, 16 }
  0x77   : > { %v765_v42 = vsel %vm8436_vm7, %v757_v15, %v764_v32  ;;  %v1828_v46 = vor.u32 %v1827_v33, %v1823_v20  ;;  %v948_v49 = vsel %vm8392_vm2, %v766_v36, %v947_v18  ;;  %362 = vst [vmem:[#allocation2 + $0xa4] sm:$0x1] %v361_v45  ;;  %v742_v54 = vshrl.u32 %v520_v24, 16  ;;  %v369_v57 = vld [vmem:[#allocation2 + $0xc8] sm:$0x1] }
  0x78   : > { %v1544_v47 = vld [vmem:[#allocation2 + $0x84] sm:$0xf]  ;;  %v1545_v48 = vld [vmem:[#allocation2 + $0x88] sm:$0xf]  ;;  %946 = vst.msk [vmem:[#allocation2 + $0xac] sm:$0xf] %vm253_vm5, %v765_v42  ;;  %v1949_v7 = vsel %vm1365_vm9, %v1947_v27, %v1948_v30 }
  0x79   : > { %v1546_v52 = vld [vmem:[#allocation2 + $0x8c] sm:$0x1]  ;;  %v8723_v53 = vcombine.low %v1544_v47, %v1545_v48  ;;  %949 = vst [vmem:[#allocation2 + $0xb0] sm:$0x1] %v948_v49  ;;  %v745_v55 = vshll.u32 %v520_v24, 16  ;;  %v314_v56 = vsel %vm8392_vm2, 0, %v313_v34  ;;  %1978 = vrot.lane.b32.xlu0 %v1940_v40, %s8344_s27  ;;  %v1833_v59 = vsel %vm1140_vm10, %v1828_v46, %v1832_v35 }
  0x7a   : > { %v525_v58 = vld [vmem:[%s8426_s26 + $0x78] sm:$0xf]  ;;  %v7176_v60 = vcombine.low %v1546_v52, %v1546_v52  ;;  %v736_v61 = vrot.slane %v734_v50, 7  ;;  %315 = vst [vmem:[#allocation2 + $0xc0] sm:$0x1] %v314_v56  ;;  %1904 = vrot.lane.b32.xlu1 %v1833_v59, %s8345_s28  ;;  %v744_v5 = vrot.slane %v742_v54, 7 }
  0x7b   : > { %v1811_v62 = vshrl.u32 %v8723_v53, 16  ;;  %v1813_v63 = vshll.u32 %v8723_v53, 16  ;;  %v1944_v8 = vrot.slane %v8723_v53, 1  ;;  %v370_v21 = vsel %vm8402_vm4, 0, %v369_v57  ;;  %v526_v33 = vld [vmem:[%s8426_s26 + $0x7c] sm:$0xf] }
  0x7c   : > { %v1818_v6 = vshll.u32 %v7176_v60, 16  ;;  %v739_v10 = vor.u32 %v737_v51, %v736_v61  ;;  %v740_v15 = vrot.slane %v736_v61, 4  ;;  %v747_v16 = vor.u32 %v745_v55, %v744_v5  ;;  %v1553_v20 = vld [vmem:[#allocation2 + $0xa8] sm:$0xf]  ;;  %371 = vst [vmem:[#allocation2 + $0xc8] sm:$0x1] %v370_v21 }
  0x7d   : > { %v1815_v13 = vrot.slane %v1813_v63, 1  ;;  %v749_v17 = vrot.slane %v744_v5, 4  ;;  %v1945_v19 = vrot.slane %v7176_v60, 1  ;;  %v785_v23 = vshrl.u32 %v525_v58, 16  ;;  %v936_v30 = vld [vmem:[#allocation2 + $0x9c] sm:$0xf] }
  0x7e   : > { %v1820_v18 = vrot.slane %v1818_v6, 1  ;;  %1984 = vrot.lane.b32.xlu1 %v1949_v7, %s8344_s27  ;;  %v748_v27 = vsel %vm8436_vm7, %v740_v15, %v747_v16  ;;  %v940_v32 = vld [vmem:[#allocation2 + $0xa4] sm:$0x1]  ;;  %v310_v35 = vld [vmem:[#allocation2 + $0xb4] sm:$0x1]  ;;  %v937_v34 = vsel %vm8447_vm8, %v739_v10, %v936_v30  ;;  %v788_v47 = vshll.u32 %v525_v58, 16 }
  0x7f   : > { %v1816_v24 = vor.u32 %v1815_v13, %v1811_v62  ;;  %v1554_v26 = vld [vmem:[#allocation2 + $0xac] sm:$0xf]  ;;  %939 = vst.msk [vmem:[#allocation2 + $0xa0] sm:$0xf] %vm253_vm5, %v748_v27  ;;  %v941_v40 = vsel %vm8392_vm2, %v749_v17, %v940_v32  ;;  %v787_v42 = vrot.slane %v785_v23, 7  ;;  %v1946_v49 = vsel %vm1365_vm9, %v1944_v8, %v1945_v19 }
  0x80   : > { %v1555_v36 = vld [vmem:[#allocation2 + $0xb0] sm:$0x1]  ;;  %v8741_v22 = vcombine.low %v1553_v20, %v1554_v26  ;;  %v366_v43 = vld [vmem:[#allocation2 + $0xbc] sm:$0x1]  ;;  %938 = vst [vmem:[#allocation2 + $0x9c] sm:$0xf] %v937_v34 }
  0x81   : > { %v1821_v45 = vsel %vm1140_vm10, %v1816_v24, %v1820_v18  ;;  %v7179_v46 = vcombine.low %v1555_v36, %v1555_v36  ;;  %942 = vst [vmem:[#allocation2 + $0xa4] sm:$0x1] %v941_v40  ;;  %v523_v48 = vld [vmem:[%s8426_s26 + $0x70] sm:$0xf]  ;;  %v957_v52 = vld [vmem:[#allocation2 + $0xc0] sm:$0xf]  ;;  %v790_v57 = vor.u32 %v788_v47, %v787_v42 }
  0x82   : > { %1902 = vrot.lane.b32.xlu0 %v1821_v45, %s8345_s28  ;;  %v1847_v50 = vshrl.u32 %v8741_v22, 16  ;;  %v1849_v51 = vshll.u32 %v8741_v22, 16  ;;  %v524_v54 = vld [vmem:[%s8426_s26 + $0x74] sm:$0xf]  ;;  %v1953_v56 = vrot.slane %v8741_v22, 1  ;;  %v791_v59 = vrot.slane %v787_v42, 4 }
  0x83   : > { %v1854_v55 = vshll.u32 %v7179_v46, 16  ;;  %v793_v61 = vshrl.u32 %v526_v33, 16  ;;  %v796_v62 = vshll.u32 %v526_v33, 16  ;;  %v311_v58 = vsel %vm8392_vm2, 0, %v310_v35  ;;  %v961_v17 = vld [vmem:[#allocation2 + $0xc8] sm:$0x1] }
  0x84   : > { %v1851_v60 = vrot.slane %v1849_v51, 1  ;;  %v1954_v5 = vrot.slane %v7179_v46, 1  ;;  %v958_v6 = vsel %vm8447_vm8, %v790_v57, %v957_v52  ;;  %312 = vst [vmem:[#allocation2 + $0xb4] sm:$0x1] %v311_v58  ;;  %v367_v7 = vsel %vm8402_vm4, 0, %v366_v43 }
  0x85   : > { %v1856_v63 = vrot.slane %v1854_v55, 1  ;;  %v795_v10 = vrot.slane %v793_v61, 7  ;;  %959 = vst [vmem:[#allocation2 + $0xc0] sm:$0xf] %v958_v6  ;;  %368 = vst [vmem:[#allocation2 + $0xbc] sm:$0x1] %v367_v7 }
  0x86   : > { %1982 = vrot.lane.b32.xlu0 %v1946_v49, %s8344_s27  ;;  %v1852_v8 = vor.u32 %v1851_v60, %v1847_v50  ;;  %v768_v13 = vshrl.u32 %v523_v48, 16  ;;  %v771_v15 = vshll.u32 %v523_v48, 16  ;;  %v1551_v16 = vld [vmem:[#allocation2 + $0xa0] sm:$0xf]  ;;  %v776_v18 = vshrl.u32 %v524_v54, 16  ;;  %v8783_v61 = vld [vmem:[#allocation2 + $0xc] sm:$0xff]  }
  0x87   : > { %v779_v19 = vshll.u32 %v524_v54, 16  ;;  %v1550_v21 = vld [vmem:[#allocation2 + $0x9c] sm:$0xf]  ;;  %v798_v24 = vor.u32 %v796_v62, %v795_v10  ;;  %v800_v26 = vrot.slane %v795_v10, 4  ;;  %v1955_v33 = vsel %vm1365_vm9, %v1953_v56, %v1954_v5  ;;  %v265_v43 = vld [vmem:[#allocation2] sm:$0x1] }
  0x88   : > { %v1857_v20 = vsel %vm1140_vm10, %v1852_v8, %v1856_v63  ;;  %v1552_v23 = vld [vmem:[#allocation2 + $0xa4] sm:$0x1]  ;;  %v770_v27 = vrot.slane %v768_v13, 7  ;;  %v8765_v30 = vcombine.low %v1550_v21, %v1551_v16  ;;  %v778_v35 = vrot.slane %v776_v18, 7  ;;  %v321_v51 = vld [vmem:[#allocation2 + $0x8] sm:$0x1] }
  0x89   : > { %1908 = vrot.lane.b32.xlu1 %v1857_v20, %s8345_s28  ;;  %v7178_v32 = vcombine.low %v1552_v23, %v1552_v23  ;;  %v799_v36 = vsel %vm8436_vm7, %v791_v59, %v798_v24  ;;  %v962_v34 = vsel %vm8392_vm2, %v800_v26, %v961_v17  ;;  %v266_v31 = vsel %vm8392_vm2, 0, %v265_v43  ;;  %v8791_v7 = vld [vmem:[#allocation2 + $0x14] ss:$0 sps:$4 sm:$0x11]   ;;  %v8798_v18 = vld [vmem:[#allocation2 + $0x24] sm:$0xff]  }
  0x8a   : > { %v773_v40 = vor.u32 %v771_v15, %v770_v27  ;;  %v774_v42 = vrot.slane %v770_v27, 4  ;;  %v1835_v45 = vshrl.u32 %v8765_v30, 16  ;;  %v1837_v46 = vshll.u32 %v8765_v30, 16  ;;  %960 = vst.msk [vmem:[#allocation2 + $0xc4] sm:$0xf] %vm253_vm5, %v799_v36 }
  0x8b   : > { %v1842_v47 = vshll.u32 %v7178_v32, 16  ;;  %963 = vst [vmem:[#allocation2 + $0xc8] sm:$0x1] %v962_v34  ;;  %v781_v48 = vor.u32 %v779_v19, %v778_v35  ;;  %v783_v49 = vrot.slane %v778_v35, 4  ;;  %v950_v50 = vld [vmem:[#allocation2 + $0xb4] sm:$0xf] }
  0x8c   : > { %v1839_v52 = vrot.slane %v1837_v46, 1  ;;  %v951_v55 = vsel %vm8447_vm8, %v773_v40, %v950_v50  ;;  %v954_v56 = vld [vmem:[#allocation2 + $0xbc] sm:$0x1]  ;;  %v1950_v57 = vrot.slane %v8765_v30, 1  ;;  %v1951_v58 = vrot.slane %v7178_v32, 1 }
  0x8d   : > { %v1844_v54 = vrot.slane %v1842_v47, 1  ;;  %1988 = vrot.lane.b32.xlu1 %v1955_v33, %s8344_s27  ;;  %v782_v59 = vsel %vm8436_vm7, %v774_v42, %v781_v48  ;;  %952 = vst [vmem:[#allocation2 + $0xb4] sm:$0xf] %v951_v55  ;;  %v955_v60 = vsel %vm8392_vm2, %v783_v49, %v954_v56  ;;  %v322_v63 = vsel %vm8402_vm4, 0, %v321_v51  ;;  %v1559_v5 = vld [vmem:[#allocation2 + $0xc0] sm:$0xf] }
  0x8e   : > { %v1840_v62 = vor.u32 %v1839_v52, %v1835_v45  ;;  %953 = vst.msk [vmem:[#allocation2 + $0xb8] sm:$0xf] %vm253_vm5, %v782_v59  ;;  %956 = vst [vmem:[#allocation2 + $0xbc] sm:$0x1] %v955_v60  ;;  %v1156_v13 = vshll.u32 %v8783_v61, 16  ;;  %v1952_v15 = vsel %vm1365_vm9, %v1950_v57, %v1951_v58  ;;  %v1154_v24 = vshrl.u32 %v8783_v61, 16 }
  0x8f   : > { %267 = vst [vmem:[#allocation2] sm:$0x1] %v266_v31  ;;  %323 = vst [vmem:[#allocation2 + $0x8] sm:$0x1] %v322_v63  ;;  %v1161_v33 = vshll.u32 %v8791_v7, 16  ;;  %v1180_v52 = vshll.u32 %v8798_v18, 16 }
  0x90   : > { %v1845_v6 = vsel %vm1140_vm10, %v1840_v62, %v1844_v54  ;;  %v1158_v32 = vrot.slane %v1156_v13, 1  ;;  %v8811_v54 = vld [vmem:[#allocation2 + $0x18] sm:$0xff]   ;;  %v8080_v60 = vld [vmem:[#allocation2 + $0x2c] ss:$0 sps:$4 sm:$0x11]   ;;  %v1178_v13 = vshrl.u32 %v8798_v18, 16 }
  0x91   : > { %1906 = vrot.lane.b32.xlu0 %v1845_v6, %s8345_s28  ;;  %v1560_v8 = vld [vmem:[#allocation2 + $0xc4] sm:$0xf]  ;;  %v1163_v31 = vrot.slane %v1161_v33, 1  ;;  %vm1446_vm14 = vcmask 31744   ;;  %vm2099_vm15 = vcmask 1045504   ;;  %vm1479_vm0 = vcmask 64512  }
  0x92   : > { %v1561_v10 = vld [vmem:[#allocation2 + $0xc8] sm:$0x1]  ;;  %v8796_v16 = vcombine.low %v1559_v5, %v1560_v8  ;;  %v1159_v51 = vor.u32 %v1158_v32, %v1154_v24  ;;  %v1370_v24 = vrot.slane %v8791_v7, 1  ;;  %vm2066_vm5 = vcmask 97280  }
  0x93   : > { %v7181_v17 = vcombine.low %v1561_v10, %v1561_v10  ;;  %vm2949_vm6 = vcmask 1041408  }
  0x94   : > { %v1871_v19 = vshrl.u32 %v8796_v16, 16  ;;  %v1873_v20 = vshll.u32 %v8796_v16, 16  ;;  %v1556_v23 = vld [vmem:[#allocation2 + $0xb4] sm:$0xf]  ;;  %v1959_v42 = vrot.slane %v8796_v16, 1 }
  0x95   : > { %v1878_v21 = vshll.u32 %v7181_v17, 16  ;;  %1986 = vrot.lane.b32.xlu0 %v1952_v15, %s8344_s27  ;;  %v1557_v26 = vld [vmem:[#allocation2 + $0xb8] sm:$0xf]  ;;  %v1558_v27 = vld [vmem:[#allocation2 + $0xbc] sm:$0x1]  ;;  %v1960_v43 = vrot.slane %v7181_v17, 1 }
  0x96   : > { %v1875_v35 = vrot.slane %v1873_v20, 1  ;;  %v8805_v34 = vcombine.low %v1556_v23, %v1557_v26  ;;  %v7180_v40 = vcombine.low %v1558_v27, %v1558_v27  ;;  %v8077_v45 = vld [vmem:[#allocation2] sm:$0xff]   ;;  %v8078_v46 = vld [vmem:[#allocation2 + $0x8] ss:$0 sps:$4 sm:$0x11]   ;;  %v1185_v20 = vshll.u32 %v8080_v60, 16 }
  0x97   : > { %v1880_v36 = vrot.slane %v1878_v21, 1  ;;  %v1144_v59 = vshll.u32 %v8077_v45, 16  ;;  %v1142_v63 = vshrl.u32 %v8077_v45, 16  ;;  %v1961_v6 = vsel %vm1365_vm9, %v1959_v42, %v1960_v43  ;;  %v8082_v15 = vld [vmem:[#allocation2 + $0x20] ss:$0 sps:$4 sm:$0x11]  }
  0x98   : > { %v1876_v47 = vor.u32 %v1875_v35, %v1871_v19  ;;  %v1859_v48 = vshrl.u32 %v8805_v34, 16  ;;  %v1861_v49 = vshll.u32 %v8805_v34, 16  ;;  %v1866_v50 = vshll.u32 %v7180_v40, 16  ;;  %v8826_v35 = vld [vmem:[#allocation2 + $0x3c] sm:$0xff]  }
  0x99   : > { %v1956_v62 = vrot.slane %v8805_v34, 1  ;;  %v1957_v58 = vrot.slane %v7180_v40, 1  ;;  %v1146_v8 = vrot.slane %v1144_v59, 1  ;;  %v1149_v10 = vshll.u32 %v8078_v46, 16 }
  0x9a   : > { %v1881_v55 = vsel %vm1140_vm10, %v1876_v47, %v1880_v36  ;;  %v1863_v56 = vrot.slane %v1861_v49, 1  ;;  %v1868_v57 = vrot.slane %v1866_v50, 1  ;;  %v1182_v19 = vrot.slane %v1180_v52, 1 }
  0x9b   : > { %1912 = vrot.lane.b32.xlu1 %v1881_v55, %s8345_s28  ;;  %v1168_v21 = vshll.u32 %v8811_v54, 16  ;;  %v1369_v23 = vrot.slane %v8783_v61, 1  ;;  %v1958_v26 = vsel %vm1365_vm9, %v1956_v62, %v1957_v58  ;;  %v1164_v27 = vsel %vm1140_vm10, %v1159_v51, %v1163_v31  ;;  %v8084_v51 = vld [vmem:[#allocation2 + $0x44] ss:$0 sps:$4 sm:$0x11]  }
  0x9c   : > { %v1864_v5 = vor.u32 %v1863_v56, %v1859_v48  ;;  %v1147_v32 = vor.u32 %v1146_v8, %v1142_v63  ;;  %v1151_v33 = vrot.slane %v1149_v10, 1  ;;  %v1183_v36 = vor.u32 %v1182_v19, %v1178_v13  ;;  %v8831_v48 = vld [vmem:[#allocation2 + $0x30] sm:$0xff]   ;;  %v8086_v58 = vld [vmem:[#allocation2 + $0x38] ss:$0 sps:$4 sm:$0x11]  }
  0x9d   : > { %v1187_v40 = vrot.slane %v1185_v20, 1  ;;  %v1166_v42 = vshrl.u32 %v8811_v54, 16  ;;  %v1170_v43 = vrot.slane %v1168_v21, 1  ;;  %v1366_v61 = vrot.slane %v8077_v45, 1  ;;  %v8853_v20 = vld [vmem:[#allocation2 + $0x48] sm:$0xff]  }
  0x9e   : > { %v1869_v17 = vsel %vm1140_vm10, %v1864_v5, %v1868_v57  ;;  %v1367_v47 = vrot.slane %v8078_v46, 1  ;;  %v1173_v7 = vshll.u32 %v8082_v15, 16  ;;  %v1152_v49 = vsel %vm1140_vm10, %v1147_v32, %v1151_v33  ;;  %v8837_v57 = vld [vmem:[#allocation2 + $0x54] sm:$0xff]   ;;  %v8846_v13 = vld [vmem:[#allocation2 + $0x5c] ss:$0 sps:$4 sm:$0x11]  }
  0x9f   : > { %1910 = vrot.lane.b32.xlu0 %v1869_v17, %s8345_s28  ;;  %1992 = vrot.lane.b32.xlu1 %v1961_v6, %s8344_s27  ;;  %v1371_v50 = vsel %vm1365_vm9, %v1369_v23, %v1370_v24  ;;  %v1204_v52 = vshll.u32 %v8826_v35, 16  ;;  %v1188_v55 = vsel %vm1140_vm10, %v1183_v36, %v1187_v40  ;;  %v1171_v56 = vor.u32 %v1170_v43, %v1166_v42  ;;  %v8855_v21 = vpop.permute.xlu1 %1962  ;;  %v8860_v33 = vld [vmem:[#allocation2 + $0x50] ss:$0 sps:$4 sm:$0x11]  }
  0xa0   : > { %v1368_v45 = vsel %vm1365_vm9, %v1366_v61, %v1367_v47  ;;  %v1175_v46 = vrot.slane %v1173_v7, 1  ;;  %v1375_v59 = vrot.slane %v8798_v18, 1  ;;  %v1376_v62 = vrot.slane %v8080_v60, 1 }
  0xa1   : > { %v1202_v31 = vshrl.u32 %v8826_v35, 16  ;;  %v1206_v63 = vrot.slane %v1204_v52, 1  ;;  %v1209_v5 = vshll.u32 %v8084_v51, 16  ;;  %v1192_v6 = vshll.u32 %v8831_v48, 16 }
  0xa2   : > { %v1372_v8 = vrot.slane %v8811_v54, 1  ;;  %v1373_v10 = vrot.slane %v8082_v15, 1  ;;  %v1176_v17 = vsel %vm1140_vm10, %v1171_v56, %v1175_v46  ;;  %v1377_v18 = vsel %vm1365_vm9, %v1375_v59, %v1376_v62 }
  0xa3   : > { %1990 = vrot.lane.b32.xlu0 %v1958_v26, %s8344_s27  ;;  %1335 = vrot.lane.b32.xlu1 %v1164_v27, %s8345_s28  ;;  %v1190_v60 = vshrl.u32 %v8831_v48, 16  ;;  %v1197_v19 = vshll.u32 %v8086_v58, 16  ;;  %v1207_v23 = vor.u32 %v1206_v63, %v1202_v31  ;;  %v1211_v54 = vrot.slane %v1209_v5, 1  ;;  %v1965_v52 = vpop.permute.xlu1 %1964 }
  0xa4   : > { %v1194_v15 = vrot.slane %v1192_v6, 1  ;;  %v1228_v24 = vshll.u32 %v8837_v57, 16  ;;  %v1883_v26 = vpop.permute.xlu0 %1882  ;;  %v1374_v27 = vsel %vm1365_vm9, %v1372_v8, %v1373_v10  ;;  %v1381_v32 = vrot.slane %v8826_v35, 1  ;;  %v8870_v35 = vld [vmem:[#allocation2 + $0x60] sm:$0xff]  }
  0xa5   : > { %v1199_v36 = vrot.slane %v1197_v19, 1  ;;  %v1382_v40 = vrot.slane %v8084_v51, 1  ;;  %v1226_v42 = vshrl.u32 %v8837_v57, 16  ;;  %v1216_v43 = vshll.u32 %v8853_v20, 16 }
  0xa6   : > { %v1212_v61 = vsel %vm1140_vm10, %v1207_v23, %v1211_v54  ;;  %v1195_v47 = vor.u32 %v1194_v15, %v1190_v60  ;;  %v1230_v7 = vrot.slane %v1228_v24, 1  ;;  %v1379_v56 = vrot.slane %v8086_v58, 1  ;;  %v8103_v58 = vld [vmem:[%s10884_s1 + $0x8] sm:$0x3f]  }
  0xa7   : > { %1333 = vrot.lane.b32.xlu0 %v1152_v49, %s8345_s28  ;;  %1416 = vrot.lane.b32.xlu1 %v1371_v50, %s8344_s27  ;;  %v1233_v49 = vshll.u32 %v8846_v13, 16  ;;  %v8868_v50 = vld [vmem:[#allocation2 + $0x6c] sm:$0xff]   ;;  %v1221_v51 = vshll.u32 %v8860_v33, 16  ;;  %v1383_v59 = vsel %vm1365_vm9, %v1381_v32, %v1382_v40  ;;  %v1214_v62 = vshrl.u32 %v8853_v20, 16 }
  0xa8   : > { %v1885_v46 = vpop.permute.xlu0 %1884  ;;  %v1218_v31 = vrot.slane %v1216_v43, 1  ;;  %v1200_v63 = vsel %vm1140_vm10, %v1195_v47, %v1199_v36  ;;  %v1231_v5 = vor.u32 %v1230_v7, %v1226_v42  ;;  %v1387_v8 = vrot.slane %v8837_v57, 1  ;;  %v8901_v36 = vld [vmem:[#allocation2 + $0x84] sm:$0xff]   ;;  %8023 = vmatprep.subr.msk.bf16.mxu0 %vm2099_vm15, %v8103_v58  ;;  %v8906_v42 = vld [vmem:[#allocation2 + $0x78] sm:$0xff]  }
  0xa9   : > { %v1235_v6 = vrot.slane %v1233_v49, 1  ;;  %v1388_v10 = vrot.slane %v8846_v13, 1  ;;  %v1223_v19 = vrot.slane %v1221_v51, 1  ;;  %v1250_v23 = vshrl.u32 %v8868_v50, 16 }
  0xaa   : > { %v1995_v54 = vsel %vm1446_vm14, %v8485_v29, %v1883_v26  ;;  %v1219_v57 = vor.u32 %v1218_v31, %v1214_v62  ;;  %v1240_v15 = vshll.u32 %v8870_v35, 16  ;;  %v2101_v29 = vsel %vm2099_vm15, %v8103_v58, 0 }
  0xab   : > { %1414 = vrot.lane.b32.xlu0 %v1368_v45, %s8344_s27  ;;  %1339 = vrot.lane.b32.xlu1 %v1188_v55, %s8345_s28  ;;  %v1378_v55 = vrot.slane %v8831_v48, 1  ;;  %v8874_v45 = vld [vmem:[#allocation2 + $0x74] ss:$0 sps:$4 sm:$0x11]   ;;  %v1252_v48 = vshll.u32 %v8868_v50, 16  ;;  %v1889_v24 = vpop.permute.xlu1 %1888  ;;  %v1384_v40 = vrot.slane %v8853_v20, 1  ;;  %v2027_v43 = vsel %vm1479_vm0, %v1995_v54, %v8855_v21 }
  0xac   : > { %v1257_v13 = vshll.u32 %v8874_v45, 16  ;;  %7650 = vmatpush3.bf16.msra.mxu0 %v2101_v29  ;;  %v1385_v47 = vrot.slane %v8860_v33, 1  ;;  %v1238_v7 = vshrl.u32 %v8870_v35, 16  ;;  %7651 = vmatprep.mubr.msk.bf16.mxu0 %vm2066_vm5, %v2027_v43  ;;  %v1997_v49 = vsel %vm1446_vm14, %v8490_v37, %v1885_v46  ;;  %v8921_v33 = vld [vmem:[#allocation2 + $0x8c] ss:$0 sps:$4 sm:$0x11]  }
  0xad   : > { %v1380_v60 = vsel %vm1365_vm9, %v1378_v55, %v1379_v56  ;;  %v1254_v32 = vrot.slane %v1252_v48, 1  ;;  %v1224_v20 = vsel %vm1140_vm10, %v1219_v57, %v1223_v19  ;;  %v1242_v55 = vrot.slane %v1240_v15, 1  ;;  %v8930_v48 = vld [vmem:[#allocation2 + $0x80] ss:$0 sps:$4 sm:$0x11]   ;;  %v8957_v43 = vld [vmem:[#allocation2 + $0x90] sm:$0xff]  }
  0xae   : > { %v1259_v21 = vrot.slane %v1257_v13, 1  ;;  %v2029_v62 = vsel %vm1479_vm0, %v1997_v49, %v1965_v52  ;;  %v1281_v19 = vshll.u32 %v8921_v33, 16  ;;  %v1390_v57 = vrot.slane %v8870_v35, 1  ;;  %v8949_v15 = vld [vmem:[#allocation2 + $0xa4] ss:$0 sps:$4 sm:$0x11]  }
  0xaf   : > { %1337 = vrot.lane.b32.xlu0 %v1176_v17, %s8345_s28  ;;  %1420 = vrot.lane.b32.xlu1 %v1377_v18, %s8344_s27  ;;  %v8887_v17 = vld [vmem:[#allocation2 + $0x68] ss:$0 sps:$4 sm:$0x11]   ;;  %v8106_v18 = vld [vmem:[%s10884_s1] sm:$0x3f]   ;;  %v1255_v51 = vor.u32 %v1254_v32, %v1250_v23  ;;  %v1969_v31 = vpop.permute.xlu1 %1968  ;;  %v1243_v52 = vor.u32 %v1242_v55, %v1238_v7  ;;  %v1262_v32 = vshrl.u32 %v8906_v42, 16 }
  0xb0   : > { %8024 = vmatprep.subr.msk.bf16.mxu0 %vm2099_vm15, %v8106_v18  ;;  %v1245_v56 = vshll.u32 %v8887_v17, 16  ;;  %v2302_v37 = vsel %vm2099_vm15, %v8106_v18, 0  ;;  %7652 = vmatmul.mubr.msk.bf16.vlgmr.msra.gmra.mrb[0].mxu0 %vm2066_vm5, %v2029_v62  ;;  %v8941_v23 = vld [vmem:[#allocation2 + $0x9c] sm:$0xff]   ;;  %v1391_v13 = vrot.slane %v8887_v17, 1  ;;  %v1399_v7 = vrot.slane %v8901_v36, 1 }
  0xb1   : > { %7684 = vmatpush3.bf16.msra.mxu0 %v2302_v37  ;;  %v1300_v35 = vshll.u32 %v8941_v23, 16  ;;  %v1400_v49 = vrot.slane %v8921_v33, 1  ;;  %v1305_v37 = vshll.u32 %v8949_v15, 16  ;;  %v1396_v33 = vrot.slane %v8906_v42, 1 }
  0xb3   : > { %1418 = vrot.lane.b32.xlu0 %v1374_v27, %s8344_s27  ;;  %1343 = vrot.lane.b32.xlu1 %v1212_v61, %s8345_s28  ;;  %v1236_v27 = vsel %vm1140_vm10, %v1231_v5, %v1235_v6  ;;  %v1389_v61 = vsel %vm1365_vm9, %v1387_v8, %v1388_v10  ;;  %v1393_v5 = vrot.slane %v8868_v50, 1  ;;  %v1394_v6 = vrot.slane %v8874_v45, 1 }
  0xb4   : > { %v1247_v8 = vrot.slane %v1245_v56, 1  ;;  %v1264_v10 = vshll.u32 %v8906_v42, 16  ;;  %v1260_v50 = vsel %vm1140_vm10, %v1255_v51, %v1259_v21  ;;  %v1274_v45 = vshrl.u32 %v8901_v36, 16 }
  0xb5   : > { %v1395_v54 = vsel %vm1365_vm9, %v1393_v5, %v1394_v6  ;;  %v1392_v21 = vsel %vm1365_vm9, %v1390_v57, %v1391_v13  ;;  %v1298_v51 = vshrl.u32 %v8941_v23, 16  ;;  %v1302_v62 = vrot.slane %v1300_v35, 1  ;;  %v8999_v57 = vld [vmem:[#allocation2 + $0x24] sm:$0xff]  }
  0xb6   : > { %v1266_v29 = vrot.slane %v1264_v10, 1  ;;  %v1401_v5 = vsel %vm1365_vm9, %v1399_v7, %v1400_v49  ;;  %v1397_v6 = vrot.slane %v8930_v48, 1  ;;  %v1402_v35 = vrot.slane %v8957_v43, 1  ;;  %v2852_v7 = vld [vmem:[%s10888_s5] sm:$0x3] }
  0xb7   : > { %1341 = vrot.lane.b32.xlu0 %v1200_v63, %s8345_s28  ;;  %1424 = vrot.lane.b32.xlu1 %v1383_v59, %s8344_s27  ;;  %v1887_v26 = vpop.permute.xlu0 %1886  ;;  %v1276_v59 = vshll.u32 %v8901_v36, 16  ;;  %v1386_v63 = vsel %vm1365_vm9, %v1384_v40, %v1385_v47  ;;  %v1283_v40 = vrot.slane %v1281_v19, 1  ;;  %v8962_v47 = vld [vmem:[#allocation2 + $0xb4] sm:$0xff]   ;;  %v1288_v36 = vshll.u32 %v8957_v43, 16 }
  0xb8   : > { %v1999_v58 = vsel %vm1446_vm14, %v8544_v14, %v1887_v26  ;;  %v2001_v14 = vsel %vm1446_vm14, %v8509_v11, %v1889_v24  ;;  %v1269_v26 = vshll.u32 %v8930_v48, 16  ;;  %v1267_v55 = vor.u32 %v1266_v29, %v1262_v32  ;;  %8025 = vmatprep.subr.msk.bf16.mxu0 %vm2949_vm6, %v2852_v7  ;;  %8026 = vmatprep.subr.msk.bf16.mxu1 %vm2949_vm6, %v2852_v7 }
  0xb9   : > { %v2033_v17 = vsel %vm1479_vm0, %v2001_v14, %v1969_v31  ;;  %v1398_v19 = vsel %vm1365_vm9, %v1396_v33, %v1397_v6  ;;  %v1405_v14 = vrot.slane %v8941_v23, 1  ;;  %v1322_v13 = vshrl.u32 %v8962_v47, 16 }
  0xba   : > { %v1271_v56 = vrot.slane %v1269_v26, 1  ;;  %v9024_v33 = vsel %vm2949_vm6, %v2852_v7, 0 }
  0xbb   : > { %1422 = vrot.lane.b32.xlu0 %v1380_v60, %s8344_s27  ;;  %1347 = vrot.lane.b32.xlu1 %v1236_v27, %s8345_s28  ;;  %v1967_v46 = vpop.permute.xlu0 %1966  ;;  %v1278_v60 = vrot.slane %v1276_v59, 1  ;;  %v1248_v27 = vsel %vm1140_vm10, %v1243_v52, %v1247_v8 }
  0xbc   : > { %v2031_v18 = vsel %vm1479_vm0, %v1999_v58, %v1967_v46  ;;  %v8975_v46 = vld [vmem:[#allocation2 + $0xbc] ss:$0 sps:$4 sm:$0x11]   ;;  %v1286_v58 = vshrl.u32 %v8957_v43, 16  ;;  %v1272_v42 = vsel %vm1140_vm10, %v1267_v55, %v1271_v56  ;;  %7894 = vmatpush3.bf16.msra.mxu1 %v9024_v33 }
  0xbd   : > { %7655 = vmatprep.mubr.msk.bf16.mxu0 %vm2066_vm5, %v2031_v18  ;;  %v1279_v24 = vor.u32 %v1278_v60, %v1274_v45  ;;  %v8989_v18 = vld [vmem:[#allocation2 + $0xa8] sm:$0xff]   ;;  %v1307_v45 = vrot.slane %v1305_v37, 1  ;;  %v1290_v60 = vrot.slane %v1288_v36, 1  ;;  %v1329_v32 = vshll.u32 %v8975_v46, 16 }
  0xbe   : > { %7656 = vmatmul.mubr.msk.bf16.gmra.mrb[4].mxu0 %vm2066_vm5, %v2033_v17  ;;  %v1312_v29 = vshll.u32 %v8989_v18, 16  ;;  %v9009_v17 = vld [vmem:[#allocation2 + $0x18] sm:$0xff]   ;;  %v9021_v36 = vld [vmem:[#allocation2 + $0x2c] ss:$0 sps:$4 sm:$0x11]   ;;  %v1412_v6 = vrot.slane %v8975_v46, 1 }
  0xbf   : > { %1345 = vrot.lane.b32.xlu0 %v1224_v20, %s8345_s28  ;;  %1428 = vrot.lane.b32.xlu1 %v1389_v61, %s8344_s27  ;;  %v8960_v61 = vld [vmem:[#allocation2 + $0x98] ss:$0 sps:$4 sm:$0x11]   ;;  %v1284_v59 = vsel %vm1140_vm10, %v1279_v24, %v1283_v40  ;;  %v1406_v40 = vrot.slane %v8949_v15, 1  ;;  %v1331_v56 = vrot.slane %v1329_v32, 1  ;;  %v3292_v32 = vshrl.u32 %v9009_v17, 16 }
  0xc0   : > { %v1293_v10 = vshll.u32 %v8960_v61, 16  ;;  %v1403_v49 = vrot.slane %v8960_v61, 1  ;;  %v3306_v61 = vshll.u32 %v8999_v57, 16 }
  0xc1   : > { %v1893_v11 = vpop.permute.xlu1 %1892 }
  0xc2   : > { %v2005_v31 = vsel %vm1446_vm14, %v8575_v2, %v1893_v11  ;;  %v1324_v2 = vshll.u32 %v8962_v47, 16  ;;  %v1291_v11 = vor.u32 %v1290_v60, %v1286_v58  ;;  %v1295_v24 = vrot.slane %v1293_v10, 1  ;;  %v9040_v60 = vld [vmem:[#allocation2 + $0x3c] sm:$0xff]  }
  0xc3   : > { %1426 = vrot.lane.b32.xlu0 %v1386_v63, %s8344_s27  ;;  %1351 = vrot.lane.b32.xlu1 %v1260_v50, %s8345_s28  ;;  %v1303_v50 = vor.u32 %v1302_v62, %v1298_v51  ;;  %v1314_v51 = vrot.slane %v1312_v29, 1  ;;  %v1407_v62 = vsel %vm1365_vm9, %v1405_v14, %v1406_v40  ;;  %v3304_v10 = vshrl.u32 %v8999_v57, 16 }
  0xc4   : > { %v1408_v14 = vrot.slane %v8989_v18, 1  ;;  %v3330_v40 = vshll.u32 %v9040_v60, 16 }
  0xc5   : > { %v1891_v20 = vpop.permute.xlu0 %1890  ;;  %v1973_v63 = vpop.permute.xlu1 %1972  ;;  %v1308_v26 = vsel %vm1140_vm10, %v1303_v50, %v1307_v45  ;;  %v3308_v50 = vrot.slane %v3306_v61, 1  ;;  %v3311_v45 = vshll.u32 %v9021_v36, 16  ;;  %v3515_v61 = vrot.slane %v9009_v17, 1 }
  0xc6   : > { %v2003_v52 = vsel %vm1446_vm14, %v8587_v28, %v1891_v20  ;;  %v2037_v28 = vsel %vm1479_vm0, %v2005_v31, %v1973_v63  ;;  %v1310_v20 = vshrl.u32 %v8989_v18, 16  ;;  %v1404_v31 = vsel %vm1365_vm9, %v1402_v35, %v1403_v49  ;;  %v9058_v35 = vld [vmem:[#allocation2 + $0x38] ss:$0 sps:$4 sm:$0x11]  }
  0xc7   : > { %1349 = vrot.lane.b32.xlu0 %v1248_v27, %s8345_s28  ;;  %1432 = vrot.lane.b32.xlu1 %v1395_v54, %s8344_s27  ;;  %v8997_v54 = vld [vmem:[#allocation2 + $0xb0] ss:$0 sps:$4 sm:$0x11]   ;;  %v1326_v27 = vrot.slane %v1324_v2, 1  ;;  %v3522_v4 = vrot.slane %v9058_v35, 1 }
  0xc9   : > { %v1971_v8 = vpop.permute.xlu0 %1970  ;;  %v1327_v15 = vor.u32 %v1326_v27, %v1322_v13  ;;  %v1409_v13 = vrot.slane %v8997_v54, 1 }
  0xca   : > { %v2035_v48 = vsel %vm1479_vm0, %v2003_v52, %v1971_v8  ;;  %v1315_v52 = vor.u32 %v1314_v51, %v1310_v20  ;;  %v8110_v8 = vld [vmem:[#allocation2 + $0x20] ss:$0 sps:$4 sm:$0x11]   ;;  %v3328_v51 = vshrl.u32 %v9040_v60, 16 }
  0xcb   : > { %1430 = vrot.lane.b32.xlu0 %v1392_v21, %s8344_s27  ;;  %1355 = vrot.lane.b32.xlu1 %v1284_v59, %s8345_s28  ;;  %v1317_v21 = vshll.u32 %v8997_v54, 16  ;;  %v1296_v59 = vsel %vm1140_vm10, %v1291_v11, %v1295_v24  ;;  %v1332_v58 = vsel %vm1140_vm10, %v1327_v15, %v1331_v56  ;;  %v3309_v54 = vor.u32 %v3308_v50, %v3304_v10 }
  0xcc   : > { %7659 = vmatprep.mubr.msk.bf16.mxu0 %vm2066_vm5, %v2035_v48  ;;  %v3313_v24 = vrot.slane %v3311_v45, 1  ;;  %v1410_v7 = vsel %vm1365_vm9, %v1408_v14, %v1409_v13  ;;  %v3519_v15 = vrot.slane %v9021_v36, 1  ;;  %v9077_v36 = vld [vmem:[#allocation2 + $0x48] sm:$0xff]   ;;  %v3524_v45 = vrot.slane %v9040_v60, 1 }
  0xcd   : > { %7660 = vmatmul.mubr.msk.bf16.gmra.mrb[8].mxu0 %vm2066_vm5, %v2037_v28  ;;  %v1897_v55 = vpop.permute.xlu1 %1896  ;;  %v1319_v63 = vrot.slane %v1317_v21, 1  ;;  %v3342_v13 = vshll.u32 %v9077_v36, 16 }
  0xce   : > { %v2009_v2 = vsel %vm1446_vm14, %v8610_v12, %v1897_v55  ;;  %v9047_v12 = vld [vmem:[#allocation2 + $0x30] sm:$0xff]   ;;  %v3518_v55 = vrot.slane %v8999_v57, 1  ;;  %v3314_v56 = vsel %vm1140_vm10, %v3309_v54, %v3313_v24 }
  0xcf   : > { %1353 = vrot.lane.b32.xlu0 %v1272_v42, %s8345_s28  ;;  %1436 = vrot.lane.b32.xlu1 %v1401_v5, %s8344_s27  ;;  %v1411_v5 = vrot.slane %v8962_v47, 1  ;;  %v3294_v42 = vshll.u32 %v9009_v17, 16  ;;  %v1320_v11 = vsel %vm1140_vm10, %v1315_v52, %v1319_v63  ;;  %v3318_v49 = vshll.u32 %v9047_v12, 16  ;;  %v9098_v54 = vld [vmem:[#allocation2 + $0x6c] sm:$0xff]  }
  0xd0   : > { %v3316_v63 = vshrl.u32 %v9047_v12, 16 }
  0xd1   : > { %v1977_v46 = vpop.permute.xlu1 %1976  ;;  %v3296_v29 = vrot.slane %v3294_v42, 1  ;;  %v3520_v42 = vsel %vm1365_vm9, %v3518_v55, %v3519_v15  ;;  %v3344_v15 = vrot.slane %v3342_v13, 1  ;;  %v9141_v13 = vld [vmem:[#allocation2 + $0x78] sm:$0xff]  }
  0xd2   : > { %v2041_v27 = vsel %vm1479_vm0, %v2009_v2, %v1977_v46  ;;  %v316_v2 = vld [vmem:[#allocation2 + $0xcc] sm:$0x1] }
  0xd3   : > { %1434 = vrot.lane.b32.xlu0 %v1398_v19, %s8344_s27  ;;  %1359 = vrot.lane.b32.xlu1 %v1308_v26, %s8345_s28  ;;  %v1413_v19 = vsel %vm1365_vm9, %v1411_v5, %v1412_v6  ;;  %v3299_v26 = vshll.u32 %v8110_v8, 16  ;;  %v3297_v20 = vor.u32 %v3296_v29, %v3292_v32  ;;  %v3320_v5 = vrot.slane %v3318_v49, 1  ;;  %v9106_v49 = vld [vmem:[#allocation2 + $0x60] sm:$0xff]  }
  0xd4   : > { %v1895_v37 = vpop.permute.xlu0 %1894  ;;  %v3323_v6 = vshll.u32 %v9058_v35, 16 }
  0xd5   : > { %v2007_v47 = vsel %vm1446_vm14, %v8623_v44, %v1895_v37  ;;  %v9049_v44 = vld [vmem:[#allocation2 + $0x44] ss:$0 sps:$4 sm:$0x11]   ;;  %v3301_v21 = vrot.slane %v3299_v26, 1  ;;  %v9069_v37 = vld [vmem:[#allocation2 + $0x54] sm:$0xff]  }
  0xd6   : > { %v3354_v10 = vshll.u32 %v9069_v37, 16  ;;  %v3325_v50 = vrot.slane %v3323_v6, 1  ;;  %v3525_v14 = vrot.slane %v9049_v44, 1  ;;  %v3352_v60 = vshrl.u32 %v9069_v37, 16 }
  0xd7   : > { %1357 = vrot.lane.b32.xlu0 %v1296_v59, %s8345_s28  ;;  %1440 = vrot.lane.b32.xlu1 %v1407_v62, %s8344_s27  ;;  %v3332_v59 = vrot.slane %v3330_v40, 1  ;;  %v3335_v62 = vshll.u32 %v9049_v44, 16  ;;  %v3302_v57 = vsel %vm1140_vm10, %v3297_v20, %v3301_v21  ;;  %v3521_v44 = vrot.slane %v9047_v12, 1 }
  0xd8   : > { %v1975_v48 = vpop.permute.xlu0 %1974  ;;  %v3356_v26 = vrot.slane %v3354_v10, 1  ;;  %v3340_v40 = vshrl.u32 %v9077_v36, 16 }
  0xd9   : > { %v2039_v28 = vsel %vm1479_vm0, %v2007_v47, %v1975_v48  ;;  %v3333_v17 = vor.u32 %v3332_v59, %v3328_v51  ;;  %v372_v47 = vld [vmem:[#allocation2 + $0xd4] sm:$0x1]  ;;  %v3321_v48 = vor.u32 %v3320_v5, %v3316_v63  ;;  %v3366_v63 = vshll.u32 %v9106_v49, 16 }
  0xda   : > { %7663 = vmatprep.mubr.msk.bf16.mxu0 %vm2066_vm5, %v2039_v28  ;;  %v9085_v28 = vld [vmem:[#allocation2 + $0x50] ss:$0 sps:$4 sm:$0x11]   ;;  %v373_v32 = vsel %vm8402_vm4, 0, %v372_v47  ;;  %v3523_v5 = vsel %vm1365_vm9, %v3521_v44, %v3522_v4  ;;  %v3345_v6 = vor.u32 %v3344_v15, %v3340_v40  ;;  %v9132_v47 = vld [vmem:[#allocation2 + $0x84] sm:$0xff]   ;;  %v3536_v4 = vrot.slane %v9098_v54, 1 }
  0xdb   : > { %1438 = vrot.lane.b32.xlu0 %v1404_v31, %s8344_s27  ;;  %1363 = vrot.lane.b32.xlu1 %v1332_v58, %s8345_s28  ;;  %v3516_v31 = vrot.slane %v8110_v8, 1  ;;  %v9079_v58 = vld [vmem:[#allocation2 + $0x5c] ss:$0 sps:$4 sm:$0x11]   ;;  %v3337_v8 = vrot.slane %v3335_v62, 1  ;;  %v3326_v55 = vsel %vm1140_vm10, %v3321_v48, %v3325_v50  ;;  %v3378_v62 = vshll.u32 %v9098_v54, 16 }
  0xdc   : > { %7664 = vmatmul.mubr.msk.bf16.gmra.mrb[12].mxu0 %vm2066_vm5, %v2041_v27  ;;  %v317_v27 = vsel %vm8392_vm2, 0, %v316_v2  ;;  %374 = vst [vmem:[#allocation2 + $0xd4] sm:$0x1] %v373_v32  ;;  %v9115_v59 = vld [vmem:[#allocation2 + $0x74] ss:$0 sps:$4 sm:$0x11]  }
  0xdd   : > { %v1901_v52 = vpop.permute.xlu1 %1900  ;;  %v3517_v46 = vsel %vm1365_vm9, %v3515_v61, %v3516_v31  ;;  %v3338_v29 = vsel %vm1140_vm10, %v3333_v17, %v3337_v8  ;;  %318 = vst [vmem:[#allocation2 + $0xcc] sm:$0x1] %v317_v27  ;;  %v9121_v31 = vld [vmem:[#allocation2 + $0x68] ss:$0 sps:$4 sm:$0x11]   ;;  %v3376_v8 = vshrl.u32 %v9098_v54, 16 }
  0xde   : > { %v2013_v0 = vsel %vm1446_vm14, %v8649_v38, %v1901_v52  ;;  %v3526_v38 = vsel %vm1365_vm9, %v3524_v45, %v3525_v14  ;;  %v3531_v52 = vrot.slane %v9079_v58, 1  ;;  %v3380_v10 = vrot.slane %v3378_v62, 1 }
  0xdf   : > { %1361 = vrot.lane.b32.xlu0 %v1320_v11, %s8345_s28  ;;  %1444 = vrot.lane.b32.xlu1 %v1413_v19, %s8344_s27  ;;  %v3359_v11 = vshll.u32 %v9079_v58, 16  ;;  %v3383_v2 = vshll.u32 %v9115_v59, 16  ;;  %v3528_v48 = vrot.slane %v9085_v28, 1  ;;  %v3364_v50 = vshrl.u32 %v9106_v49, 16 }
  0xe0   : > { %v3368_v45 = vrot.slane %v3366_v63, 1  ;;  %v3381_v32 = vor.u32 %v3380_v10, %v3376_v8  ;;  %v3534_v62 = vrot.slane %v9121_v31, 1  ;;  %v3388_v63 = vshrl.u32 %v9141_v13, 16  ;;  %v9179_v10 = vld [vmem:[#allocation2 + $0x98] ss:$0 sps:$4 sm:$0x11]  }
  0xe1   : > { %v1981_v24 = vpop.permute.xlu1 %1980  ;;  %v3361_v51 = vrot.slane %v3359_v11, 1  ;;  %vm375_vm2 = vcmask 60416   ;;  %vm378_vm4 = vcmask 57344  }
  0xe2   : > { %vm9456_vm8 = vmand %vm378_vm4, %vm263_vm1  ;;  %376 = vst.msk [vmem:[#allocation3] sm:$0xf] %vm375_vm2, %v8343_v9 }
  0xe3   : > { %1442 = vrot.lane.b32.xlu0 %v1410_v7, %s8344_s27  ;;  %3485 = vrot.lane.b32.xlu1 %v3314_v56, %s8345_s28  ;;  %v3347_v7 = vshll.u32 %v9085_v28, 16  ;;  %v3357_v56 = vor.u32 %v3356_v26, %v3352_v60  ;;  %v9144_v60 = vld [vmem:[#allocation2 + $0x8c] ss:$0 sps:$4 sm:$0x11]   ;;  %v3402_v28 = vshll.u32 %v9132_v47, 16  ;;  %vm9475_vm1 = vmand %vm378_vm4, %vm319_vm3 }
  0xe4   : > { %377 = vst.msk [vmem:[#allocation3 + $0x4] sm:$0xf] %vm375_vm2, %v8343_v9  ;;  %381 = vst.msk [vmem:[#allocation3 + $0xcc] sm:$0xf] %vm375_vm2, %v8343_v9 }
  0xe5   : > { %v3349_v61 = vrot.slane %v3347_v7, 1  ;;  %v3362_v17 = vsel %vm1140_vm10, %v3357_v56, %v3361_v51  ;;  %v3407_v56 = vshll.u32 %v9144_v60, 16  ;;  %379 = vst.msk [vmem:[#allocation3 + $0x8] sm:$0x1] %vm378_vm4, %v8343_v9  ;;  %383 = vst.msk [vmem:[#allocation3 + $0xd4] sm:$0x1] %vm378_vm4, %v8343_v9 }
  0xe6   : > { %382 = vst.msk [vmem:[#allocation3 + $0xd0] sm:$0xf] %vm375_vm2, %v8343_v9  ;;  %vm9596_vm6 = vmand %vm375_vm2, %vm319_vm3 }
  0xe7   : > { %v1899_v19 = vpop.permute.xlu0 %1898  ;;  %3483 = vrot.lane.b32.xlu0 %v3302_v57, %s8345_s28  ;;  %3565 = vrot.lane.b32.xlu1 %v3520_v42, %s8344_s27  ;;  %v3530_v57 = vrot.slane %v9069_v37, 1  ;;  %v3350_v14 = vsel %vm1140_vm10, %v3345_v6, %v3349_v61 }
  0xe8   : > { %v2011_v20 = vsel %vm1446_vm14, %v8688_v39, %v1899_v19  ;;  %v2045_v39 = vsel %vm1479_vm0, %v2013_v0, %v1981_v24  ;;  %v3371_v19 = vshll.u32 %v9121_v31, 16  ;;  %v3369_v0 = vor.u32 %v3368_v45, %v3364_v50 }
  0xe9   : > { %v3532_v27 = vsel %vm1365_vm9, %v3530_v57, %v3531_v52  ;;  %v3542_v50 = vrot.slane %v9132_v47, 1  ;;  %v3543_v45 = vrot.slane %v9144_v60, 1 }
  0xea   : > { %v3373_v24 = vrot.slane %v3371_v19, 1 }
  0xeb   : > { %v1979_v21 = vpop.permute.xlu0 %1978  ;;  %3563 = vrot.lane.b32.xlu0 %v3517_v46, %s8344_s27  ;;  %3489 = vrot.lane.b32.xlu1 %v3338_v29, %s8345_s28  ;;  %v3527_v46 = vrot.slane %v9077_v36, 1  ;;  %v3385_v29 = vrot.slane %v3383_v2, 1  ;;  %v3544_v60 = vsel %vm1365_vm9, %v3542_v50, %v3543_v45 }
  0xec   : > { %v2043_v35 = vsel %vm1479_vm0, %v2011_v20, %v1979_v21  ;;  %v1905_v42 = vpop.permute.xlu1 %1904  ;;  %v3537_v20 = vrot.slane %v9115_v59, 1  ;;  %v8126_v21 = vld [vmem:[#allocation2 + $0x80] ss:$0 sps:$4 sm:$0x11]   ;;  %v3533_v59 = vrot.slane %v9106_v49, 1  ;;  %v3374_v61 = vsel %vm1140_vm10, %v3369_v0, %v3373_v24 }
  0xed   : > { %7667 = vmatprep.mubr.msk.bf16.mxu0 %vm2066_vm5, %v2043_v35  ;;  %v3529_v26 = vsel %vm1365_vm9, %v3527_v46, %v3528_v48  ;;  %v2017_v11 = vsel %vm1446_vm14, %v8702_v3, %v1905_v42  ;;  %v3400_v3 = vshrl.u32 %v9132_v47, 16  ;;  %v3386_v15 = vsel %vm1140_vm10, %v3381_v32, %v3385_v29  ;;  %v9189_v29 = vld [vmem:[#allocation2 + $0xb4] sm:$0xff]  }
  0xee   : > { %7668 = vmatmul.mubr.msk.bf16.gmra.mrb[16].mxu0 %vm2066_vm5, %v2045_v39  ;;  %v3404_v35 = vrot.slane %v3402_v28, 1  ;;  %v9168_v39 = vld [vmem:[#allocation2 + $0x90] sm:$0xff]   ;;  %v3395_v6 = vshll.u32 %v8126_v21, 16  ;;  %v3538_v57 = vsel %vm1365_vm9, %v3536_v4, %v3537_v20  ;;  %v3409_v42 = vrot.slane %v3407_v56, 1  ;;  %v9197_v4 = vld [vmem:[#allocation2 + $0xa8] sm:$0xff]  }
  0xef   : > { %3487 = vrot.lane.b32.xlu0 %v3326_v55, %s8345_s28  ;;  %3569 = vrot.lane.b32.xlu1 %v3526_v38, %s8344_s27  ;;  %v3390_v55 = vshll.u32 %v9141_v13, 16  ;;  %v3535_v8 = vsel %vm1365_vm9, %v3533_v59, %v3534_v62  ;;  %v3414_v2 = vshll.u32 %v9168_v39, 16  ;;  %v3539_v28 = vrot.slane %v9141_v13, 1 }
  0xf0   : > { %v1985_v44 = vpop.permute.xlu1 %1984  ;;  %v3405_v52 = vor.u32 %v3404_v35, %v3400_v3  ;;  %v3397_v48 = vrot.slane %v3395_v6, 1  ;;  %v3419_v0 = vshll.u32 %v9179_v10, 16 }
  0xf1   : > { %v2049_v51 = vsel %vm1479_vm0, %v2017_v11, %v1985_v44  ;;  %v3412_v11 = vshrl.u32 %v9168_v39, 16  ;;  %v3416_v44 = vrot.slane %v3414_v2, 1  ;;  %v3546_v2 = vrot.slane %v9179_v10, 1 }
  0xf2   : > { %v3421_v56 = vrot.slane %v3419_v0, 1  ;;  %v3554_v0 = vrot.slane %v9189_v29, 1 }
  0xf3   : > { %3567 = vrot.lane.b32.xlu0 %v3523_v5, %s8344_s27  ;;  %3493 = vrot.lane.b32.xlu1 %v3362_v17, %s8345_s28  ;;  %v3392_v5 = vrot.slane %v3390_v55, 1  ;;  %v9175_v17 = vld [vmem:[#allocation2 + $0xa4] ss:$0 sps:$4 sm:$0x11]   ;;  %v3417_v35 = vor.u32 %v3416_v44, %v3412_v11 }
  0xf4   : > { %v1903_v58 = vpop.permute.xlu0 %1902  ;;  %v3431_v32 = vshll.u32 %v9175_v17, 16  ;;  %v9200_v55 = vld [vmem:[#allocation2 + $0xbc] ss:$0 sps:$4 sm:$0x11]  }
  0xf5   : > { %v2015_v40 = vsel %vm1446_vm14, %v8723_v53, %v1903_v58  ;;  %v9161_v53 = vld [vmem:[#allocation2 + $0x9c] sm:$0xff]   ;;  %v3393_v46 = vor.u32 %v3392_v5, %v3388_v63  ;;  %v3410_v58 = vsel %vm1140_vm10, %v3405_v52, %v3409_v42  ;;  %v9212_v63 = vld [vmem:[#allocation2 + $0xb0] ss:$0 sps:$4 sm:$0x11]   ;;  %v3438_v5 = vshll.u32 %v9197_v4, 16 }
  0xf6   : > { %v3426_v31 = vshll.u32 %v9161_v53, 16  ;;  %v3433_v20 = vrot.slane %v3431_v32, 1  ;;  %v8140_v32 = vld [vmem:[#allocation2 + $0xd4] ss:$0 sps:$4 sm:$0x11]  }
  0xf7   : > { %3491 = vrot.lane.b32.xlu0 %v3350_v14, %s8345_s28  ;;  %3573 = vrot.lane.b32.xlu1 %v3532_v27, %s8344_s27  ;;  %v3424_v14 = vshrl.u32 %v9161_v53, 16  ;;  %v3440_v45 = vrot.slane %v3438_v5, 1 }
  0xf8   : > { %v1983_v7 = vpop.permute.xlu0 %1982  ;;  %v3428_v27 = vrot.slane %v3426_v31, 1  ;;  %v9221_v31 = vld [vmem:[#allocation2 + $0xcc] sm:$0xff]  }
  0xf9   : > { %v2047_v38 = vsel %vm1479_vm0, %v2015_v40, %v1983_v7  ;;  %v3398_v40 = vsel %vm1140_vm10, %v3393_v46, %v3397_v48  ;;  %v3436_v46 = vshrl.u32 %v9197_v4, 16  ;;  %v3443_v48 = vshll.u32 %v9212_v63, 16 }
  0xfa   : > { %7671 = vmatprep.mubr.msk.bf16.mxu0 %vm2066_vm5, %v2047_v38  ;;  %v3429_v7 = vor.u32 %v3428_v27, %v3424_v14  ;;  %v9232_v14 = vld [vmem:[#allocation2 + $0xc0] sm:$0xff]  }
  0xfb   : > { %7672 = vmatmul.mubr.msk.bf16.gmra.mrb[20].mxu0 %vm2066_vm5, %v2049_v51  ;;  %3571 = vrot.lane.b32.xlu0 %v3529_v26, %s8344_s27  ;;  %v1909_v19 = vpop.permute.xlu1 %1908  ;;  %v3540_v26 = vrot.slane %v8126_v21, 1  ;;  %v3450_v21 = vshll.u32 %v9189_v29, 16  ;;  %v3548_v51 = vrot.slane %v9161_v53, 1  ;;  %v3445_v10 = vrot.slane %v3443_v48, 1 }
  0xfc   : > { %3497 = vrot.lane.b32.xlu1 %v3386_v15, %s8345_s28  ;;  %v2021_v38 = vsel %vm1446_vm14, %v8741_v22, %v1909_v19  ;;  %v3448_v22 = vshrl.u32 %v9189_v29, 16  ;;  %v3441_v11 = vor.u32 %v3440_v45, %v3436_v46  ;;  %v3560_v46 = vrot.slane %v9221_v31, 1 }
  0xfd   : > { %v3541_v3 = vsel %vm1365_vm9, %v3539_v28, %v3540_v26  ;;  %v3452_v52 = vrot.slane %v3450_v21, 1  ;;  %v3474_v28 = vshll.u32 %v9221_v31, 16  ;;  %v3472_v21 = vshrl.u32 %v9221_v31, 16 }
  0xfe   : > { %v3561_v48 = vrot.slane %v8140_v32, 1 }
  0xff   : > { %3495 = vrot.lane.b32.xlu0 %v3374_v61, %s8345_s28  ;;  %v1989_v15 = vpop.permute.xlu1 %1988  ;;  %v3549_v61 = vrot.slane %v9175_v17, 1  ;;  %v3545_v17 = vrot.slane %v9168_v39, 1  ;;  %v3453_v19 = vor.u32 %v3452_v52, %v3448_v22 }
 0x100   : > { %3577 = vrot.lane.b32.xlu1 %v3538_v57, %s8344_s27  ;;  %v3434_v57 = vsel %vm1140_vm10, %v3429_v7, %v3433_v20  ;;  %v2053_v42 = vsel %vm1479_vm0, %v2021_v38, %v1989_v15  ;;  %v3555_v20 = vrot.slane %v9200_v55, 1  ;;  %v3479_v38 = vshll.u32 %v8140_v32, 16 }
 0x101   : > { %v3550_v50 = vsel %vm1365_vm9, %v3548_v51, %v3549_v61  ;;  %v3547_v26 = vsel %vm1365_vm9, %v3545_v17, %v3546_v2  ;;  %v3551_v15 = vrot.slane %v9197_v4, 1 }
 0x102   : > { %v3481_v52 = vrot.slane %v3479_v38, 1 }
 0x103   : > { %v1907_v24 = vpop.permute.xlu0 %1906  ;;  %3575 = vrot.lane.b32.xlu0 %v3535_v8, %s8344_s27  ;;  %v3422_v8 = vsel %vm1140_vm10, %v3417_v35, %v3421_v56  ;;  %v3552_v35 = vrot.slane %v9212_v63, 1  ;;  %v3460_v56 = vshrl.u32 %v9232_v14, 16 }
 0x104   : > { %3501 = vrot.lane.b32.xlu1 %v3410_v58, %s8345_s28  ;;  %v2019_v59 = vsel %vm1446_vm14, %v8765_v30, %v1907_v24  ;;  %v3455_v30 = vshll.u32 %v9200_v55, 16  ;;  %v8138_v24 = vld [vmem:[#allocation2 + $0xc8] ss:$0 sps:$4 sm:$0x11]  }
 0x106   : > { %v3457_v58 = vrot.slane %v3455_v30, 1 }
 0x107   : > { %v1987_v62 = vpop.permute.xlu0 %1986  ;;  %3499 = vrot.lane.b32.xlu0 %v3398_v40, %s8345_s28 }
 0x108   : > { %3581 = vrot.lane.b32.xlu1 %v3544_v60, %s8344_s27  ;;  %v2051_v6 = vsel %vm1479_vm0, %v2019_v59, %v1987_v62  ;;  %v3458_v44 = vsel %vm1140_vm10, %v3453_v19, %v3457_v58  ;;  %v3462_v60 = vshll.u32 %v9232_v14, 16  ;;  %v3446_v59 = vsel %vm1140_vm10, %v3441_v11, %v3445_v10 }
 0x109   : > { %7675 = vmatprep.mubr.msk.bf16.mxu0 %vm2066_vm5, %v2051_v6  ;;  %v3467_v62 = vshll.u32 %v8138_v24, 16  ;;  %v3556_v6 = vsel %vm1365_vm9, %v3554_v0, %v3555_v20  ;;  %v3557_v58 = vrot.slane %v9232_v14, 1  ;;  %v9274_v0 = vld [vmem:[%s10884_s1 + $0x10] sm:$0x3f]   ;;  %v8246_v20 = vld [vmem:[#allocation2 + $0x24] sm:$0xff]  }
 0x10a   : > { %7676 = vmatmul.mubr.msk.bf16.gmra.mrb[24].mxu0 %vm2066_vm5, %v2053_v42  ;;  %v3464_v55 = vrot.slane %v3462_v60, 1 }
 0x10b   : > { %3579 = vrot.lane.b32.xlu0 %v3541_v3, %s8344_s27  ;;  %v3476_v3 = vrot.slane %v3474_v28, 1  ;;  %v3469_v42 = vrot.slane %v3467_v62, 1  ;;  %v8245_v28 = vld [vmem:[#allocation2] sm:$0xff]  }
 0x10c   : > { %3505 = vrot.lane.b32.xlu1 %v3434_v57, %s8345_s28 }
 0x10d   : > { %v1913_v27 = vpop.permute.xlu1 %1912  ;;  %v3477_v57 = vor.u32 %v3476_v3, %v3472_v21  ;;  %v8247_v3 = vld [vmem:[#allocation2 + $0x18] sm:$0xff]  }
 0x10e   : > { %v2025_v51 = vsel %vm1446_vm14, %v8796_v16, %v1913_v27  ;;  %v3553_v16 = vsel %vm1365_vm9, %v3551_v15, %v3552_v35  ;;  %v3558_v27 = vrot.slane %v8138_v24, 1 }
 0x10f   : > { %3503 = vrot.lane.b32.xlu0 %v3422_v8, %s8345_s28  ;;  %v3482_v2 = vsel %vm1140_vm10, %v3477_v57, %v3481_v52 }
 0x110   : > { %3585 = vrot.lane.b32.xlu1 %v3550_v50, %s8344_s27  ;;  %v8244_v50 = vld [vmem:[#allocation2 + $0xc] sm:$0xff]   ;;  %v3559_v24 = vsel %vm1365_vm9, %v3557_v58, %v3558_v27  ;;  %v8253_v27 = vld [vmem:[#allocation2 + $0x60] sm:$0xff]  }
 0x111   : > { %v1911_v40 = vpop.permute.xlu0 %1910  ;;  %v1993_v7 = vpop.permute.xlu1 %1992 }
 0x112   : > { %v2023_v61 = vsel %vm1446_vm14, %v8805_v34, %v1911_v40  ;;  %v2057_v30 = vsel %vm1479_vm0, %v2025_v51, %v1993_v7  ;;  %v3465_v34 = vor.u32 %v3464_v55, %v3460_v56  ;;  %v8248_v55 = vld [vmem:[#allocation2 + $0x3c] sm:$0xff]  }
 0x113   : > { %3583 = vrot.lane.b32.xlu0 %v3547_v26, %s8344_s27 }
 0x114   : > { %3509 = vrot.lane.b32.xlu1 %v3458_v44, %s8345_s28  ;;  %v3470_v19 = vsel %vm1140_vm10, %v3465_v34, %v3469_v42  ;;  %v3562_v44 = vsel %vm1365_vm9, %v3560_v46, %v3561_v48  ;;  %v8251_v42 = vld [vmem:[#allocation2 + $0x48] sm:$0xff]  }
 0x115   : > { %v1991_v5 = vpop.permute.xlu0 %1990  ;;  %v1336_v22 = vpop.permute.xlu1 %1335 }
 0x116   : > { %v2055_v63 = vsel %vm1479_vm0, %v2023_v61, %v1991_v5  ;;  %v1450_v45 = vsel %vm1446_vm14, %v8244_v50, %v1336_v22  ;;  %v8249_v61 = vld [vmem:[#allocation2 + $0x30] sm:$0xff]  }
 0x117   : > { %7679 = vmatprep.mubr.msk.bf16.mxu0 %vm2066_vm5, %v2055_v63  ;;  %3507 = vrot.lane.b32.xlu0 %v3446_v59, %s8345_s28 }
 0x118   : > { %7680 = vmatmul.mubr.msk.bf16.gmra.mrb[28].mxu0 %vm2066_vm5, %v2057_v30  ;;  %3589 = vrot.lane.b32.xlu1 %v3556_v6, %s8344_s27 }
 0x119   : > { %v1334_v17 = vpop.permute.xlu0 %1333  ;;  %v1417_v8 = vpop.permute.xlu1 %1416 }
 0x11a   : > { %v1448_v26 = vsel %vm1446_vm14, %v8245_v28, %v1334_v17  ;;  %v1483_v60 = vsel %vm1479_vm0, %v1450_v45, %v1417_v8 }
 0x11b   : > { %3587 = vrot.lane.b32.xlu0 %v3553_v16, %s8344_s27  ;;  %v8250_v16 = vld [vmem:[#allocation2 + $0x54] sm:$0xff]  }
 0x11c   : > { %3513 = vrot.lane.b32.xlu1 %v3482_v2, %s8345_s28 }
 0x11d   : > { %v1415_v10 = vpop.permute.xlu0 %1414  ;;  %v1340_v11 = vpop.permute.xlu1 %1339 }
 0x11e   : > { %v1481_v32 = vsel %vm1479_vm0, %v1448_v26, %v1415_v10  ;;  %v1454_v21 = vsel %vm1446_vm14, %v8246_v20, %v1340_v11  ;;  %v8254_v11 = vld [vmem:[#allocation2 + $0xc] sm:$0xf] }
 0x11f   : > { %7685 = vmatprep.mubr.msk.bf16.mxu0 %vm2066_vm5, %v1481_v32  ;;  %3511 = vrot.lane.b32.xlu0 %v3470_v19, %s8345_s28  ;;  %v8252_v19 = vld [vmem:[#allocation2 + $0x6c] sm:$0xff]  }
 0x120   : > { %7686 = vmatmul.mubr.msk.bf16.vlgmr.msra.gmra.mrb[0].mxu0 %vm2066_vm5, %v1483_v60  ;;  %3593 = vrot.lane.b32.xlu1 %v3562_v44, %s8344_s27  ;;  %v2469_v44 = vshrl.u32 %v8254_v11, 16  ;;  %v2472_v60 = vshll.u32 %v8254_v11, 16 }
 0x121   : > { %7718 = vmatpush3.bf16.msra.mxu0 %v9024_v33  ;;  %v1338_v40 = vpop.permute.xlu0 %1337  ;;  %v1421_v7 = vpop.permute.xlu1 %1420 }
 0x122   : > { %8027 = vmatprep.subr.msk.bf16.mxu0 %vm2099_vm15, %v9274_v0  ;;  %v1452_v38 = vsel %vm1446_vm14, %v8247_v3, %v1338_v40  ;;  %v1487_v51 = vsel %vm1479_vm0, %v1454_v21, %v1421_v7 }
 0x123   : > { %3591 = vrot.lane.b32.xlu0 %v3559_v24, %s8344_s27  ;;  %v8255_v24 = vld [vmem:[#allocation2 + $0x10] sm:$0xf] }
 0x124   : > { %v2478_v40 = vshll.u32 %v8255_v24, 16  ;;  %v2482_v7 = vshrl.u32 %v8255_v24, 16 }
 0x125   : > { %v1419_v15 = vpop.permute.xlu0 %1418  ;;  %v1344_v35 = vpop.permute.xlu1 %1343 }
 0x126   : > { %v1485_v56 = vsel %vm1479_vm0, %v1452_v38, %v1419_v15  ;;  %v1458_v62 = vsel %vm1446_vm14, %v8248_v55, %v1344_v35  ;;  %v2471_v38 = vrot.slane %v2469_v44, 4  ;;  %v2474_v15 = vrot.slane %v2472_v60, 5 }
 0x127   : > { %7689 = vmatprep.mubr.msk.bf16.mxu0 %vm2066_vm5, %v1485_v56  ;;  %v2480_v35 = vrot.slane %v2478_v40, 5  ;;  %v2484_v56 = vrot.slane %v2482_v7, 4  ;;  %v8262_v7 = vld [vmem:[#allocation2 + $0x30] sm:$0xf] }
 0x128   : > { %7690 = vmatmul.mubr.msk.bf16.gmra.mrb[4].mxu0 %vm2066_vm5, %v1487_v51  ;;  %v8256_v51 = vld [vmem:[#allocation2 + $0x84] sm:$0xff]  }
 0x129   : > { %v1342_v33 = vpop.permute.xlu0 %1341  ;;  %v1425_v59 = vpop.permute.xlu1 %1424 }
 0x12a   : > { %v1456_v5 = vsel %vm1446_vm14, %v8249_v61, %v1342_v33  ;;  %v1491_v52 = vsel %vm1479_vm0, %v1458_v62, %v1425_v59  ;;  %v8257_v59 = vld [vmem:[#allocation2 + $0x78] sm:$0xff]  }
 0x12d   : > { %v1423_v22 = vpop.permute.xlu0 %1422  ;;  %v1348_v6 = vpop.permute.xlu1 %1347 }
 0x12e   : > { %v1489_v57 = vsel %vm1479_vm0, %v1456_v5, %v1423_v22  ;;  %v1462_v34 = vsel %vm1446_vm14, %v8250_v16, %v1348_v6  ;;  %v8258_v5 = vld [vmem:[#allocation2 + $0x14] sm:$0x1] }
 0x12f   : > { %7693 = vmatprep.mubr.msk.bf16.mxu0 %vm2066_vm5, %v1489_v57  ;;  %v2488_v22 = vshll.u32 %v8258_v5, 16  ;;  %v2475_v57 = vor.u32 %v2474_v15, %v2471_v38 }
 0x130   : > { %7694 = vmatmul.mubr.msk.bf16.gmra.mrb[8].mxu0 %vm2066_vm5, %v1491_v52  ;;  %v2485_v52 = vor.u32 %v2484_v56, %v2480_v35 }
 0x131   : > { %v1346_v63 = vpop.permute.xlu0 %1345  ;;  %v1429_v30 = vpop.permute.xlu1 %1428 }
 0x132   : > { %v1460_v17 = vsel %vm1446_vm14, %v8251_v42, %v1346_v63  ;;  %v1495_v48 = vsel %vm1479_vm0, %v1462_v34, %v1429_v30  ;;  %v8259_v30 = vld [vmem:[#allocation2 + $0x24] sm:$0xf] }
 0x133   : > { %v2517_v16 = vshrl.u32 %v8259_v30, 16  ;;  %v2520_v34 = vshll.u32 %v8259_v30, 16 }
 0x135   : > { %v1427_v8 = vpop.permute.xlu0 %1426  ;;  %v1352_v2 = vpop.permute.xlu1 %1351 }
 0x136   : > { %v1493_v46 = vsel %vm1479_vm0, %v1460_v17, %v1427_v8  ;;  %v1466_v58 = vsel %vm1446_vm14, %v8252_v19, %v1352_v2  ;;  %v8260_v8 = vld [vmem:[#allocation2 + $0x28] sm:$0xf] }
 0x137   : > { %7697 = vmatprep.mubr.msk.bf16.mxu0 %vm2066_vm5, %v1493_v46  ;;  %v2526_v2 = vshll.u32 %v8260_v8, 16  ;;  %v2530_v46 = vshrl.u32 %v8260_v8, 16 }
 0x138   : > { %7698 = vmatmul.mubr.msk.bf16.gmra.mrb[12].mxu0 %vm2066_vm5, %v1495_v48  ;;  %v2490_v48 = vrot.slane %v2488_v22, 5 }
 0x139   : > { %v1350_v50 = vpop.permute.xlu0 %1349  ;;  %v1433_v45 = vpop.permute.xlu1 %1432  ;;  %v9320_v44 = vrot.slane %v2526_v2, 5 }
 0x13a   : > { %v1464_v28 = vsel %vm1446_vm14, %v8253_v27, %v1350_v50  ;;  %v1499_v20 = vsel %vm1479_vm0, %v1466_v58, %v1433_v45  ;;  %v2476_v50 = vrot.slane %v2475_v57, 4  ;;  %v2486_v45 = vrot.slane %v2485_v52, 4 }
 0x13b   : > { %v2519_v58 = vrot.slane %v2517_v16, 4  ;;  %v2522_v27 = vrot.slane %v2520_v34, 5  ;;  %v8266_v16 = vld [vmem:[#allocation2 + $0xb4] sm:$0xff]  }
 0x13c   : > { %v2481_v40 = vsel %vm8505_vm13, %v2476_v50, %v2480_v35 }
 0x13d   : > { %v1431_v26 = vpop.permute.xlu0 %1430  ;;  %v1356_v10 = vpop.permute.xlu1 %1355  ;;  %v2523_v56 = vor.u32 %v2522_v27, %v2519_v58  ;;  %v8267_v58 = vld [vmem:[#allocation2 + $0x38] sm:$0x1] }
 0x13e   : > { %v1497_v32 = vsel %vm1479_vm0, %v1464_v28, %v1431_v26  ;;  %v1470_v33 = vsel %vm1446_vm14, %v8256_v51, %v1356_v10  ;;  %v8261_v28 = vld [vmem:[#allocation2 + $0x2c] sm:$0x1]  ;;  %v8264_v51 = vld [vmem:[#allocation2 + $0x3c] sm:$0xf]  ;;  %v2560_v27 = vshll.u32 %v8267_v58, 16 }
 0x13f   : > { %7701 = vmatprep.mubr.msk.bf16.mxu0 %vm2066_vm5, %v1497_v32  ;;  %v2536_v26 = vshll.u32 %v8261_v28, 16  ;;  %v2532_v32 = vrot.slane %v2530_v46, 4 }
 0x140   : > { %7702 = vmatmul.mubr.msk.bf16.gmra.mrb[16].mxu0 %vm2066_vm5, %v1499_v20  ;;  %v2541_v20 = vshrl.u32 %v8262_v7, 16 }
 0x141   : > { %v1354_v21 = vpop.permute.xlu0 %1353  ;;  %v1437_v3 = vpop.permute.xlu1 %1436  ;;  %v2538_v22 = vrot.slane %v2536_v26, 5 }
 0x142   : > { %v1468_v55 = vsel %vm1446_vm14, %v8257_v59, %v1354_v21  ;;  %v1503_v63 = vsel %vm1479_vm0, %v1470_v33, %v1437_v3  ;;  %v8263_v3 = vld [vmem:[#allocation2 + $0x34] sm:$0xf]  ;;  %v2565_v33 = vshrl.u32 %v8264_v51, 16  ;;  %v2568_v59 = vshll.u32 %v8264_v51, 16 }
 0x143   : > { %v2550_v38 = vshll.u32 %v8263_v3, 16  ;;  %v2554_v15 = vshrl.u32 %v8263_v3, 16  ;;  %v2543_v57 = vrot.slane %v2541_v20, 4  ;;  %v8270_v20 = vld [vmem:[#allocation2 + $0x44] sm:$0x1] }
 0x144   : > { %v2567_v8 = vrot.slane %v2565_v33, 4  ;;  %v2570_v2 = vrot.slane %v2568_v59, 5  ;;  %v8272_v59 = vld [vmem:[#allocation2 + $0x58] sm:$0xf] }
 0x145   : > { %v1435_v62 = vpop.permute.xlu0 %1434  ;;  %v1360_v61 = vpop.permute.xlu1 %1359  ;;  %v2556_v30 = vrot.slane %v2554_v15, 4 }
 0x146   : > { %v1501_v6 = vsel %vm1479_vm0, %v1468_v55, %v1435_v62  ;;  %v1474_v19 = vsel %vm1446_vm14, %v8941_v23, %v1360_v61  ;;  %v2491_v23 = vsel %vm8505_vm13, %v2486_v45, %v2490_v48  ;;  %v2533_v55 = vor.u32 %v2532_v32, %v9320_v44  ;;  %v8265_v62 = vld [vmem:[#allocation2 + $0x40] sm:$0xf]  ;;  %v8268_v32 = vld [vmem:[#allocation2 + $0x48] sm:$0xf] }
 0x147   : > { %7705 = vmatprep.mubr.msk.bf16.mxu0 %vm2066_vm5, %v1501_v6  ;;  %v2574_v61 = vshll.u32 %v8265_v62, 16  ;;  %v2578_v5 = vshrl.u32 %v8265_v62, 16  ;;  %v7218_v6 = vcombine.low %v2481_v40, %v2491_v23  ;;  %v8269_v40 = vld [vmem:[#allocation2 + $0x4c] sm:$0xf] }
 0x148   : > { %7706 = vmatmul.mubr.msk.bf16.gmra.mrb[20].mxu0 %vm2066_vm5, %v1503_v63  ;;  %v9331_v63 = vrot.slane %v2550_v38, 5  ;;  %v2534_v50 = vrot.slane %v2533_v55, 4  ;;  %v2598_v23 = vshll.u32 %v8269_v40, 16  ;;  %v2626_v55 = vshrl.u32 %v8272_v59, 16 }
 0x149   : > { %v1358_v42 = vpop.permute.xlu0 %1357  ;;  %v1441_v17 = vpop.permute.xlu1 %1440  ;;  %v9336_v45 = vrot.slane %v2574_v61, 5  ;;  %v2562_v61 = vrot.slane %v2560_v27, 5 }
 0x14a   : > { %v1472_v10 = vsel %vm1446_vm14, %v8957_v43, %v1358_v42  ;;  %v1507_v21 = vsel %vm1479_vm0, %v1474_v19, %v1441_v17  ;;  %v2544_v43 = vshll.u32 %v8262_v7, 16  ;;  %v2524_v17 = vrot.slane %v2523_v56, 4  ;;  %v8271_v56 = vld [vmem:[#allocation2 + $0x54] sm:$0xf] }
 0x14b   : > { %v2580_v19 = vrot.slane %v2578_v5, 4  ;;  %v2602_v7 = vshrl.u32 %v8269_v40, 16  ;;  %v2539_v3 = vsel %vm8505_vm13, %v2534_v50, %v2538_v22  ;;  %v2613_v51 = vshrl.u32 %v8271_v56, 16 }
 0x14c   : > { %v2546_v52 = vrot.slane %v2544_v43, 5  ;;  %v2529_v43 = vsel %vm8505_vm13, %v2524_v17, %v9320_v44  ;;  %v2616_v33 = vshll.u32 %v8271_v56, 16  ;;  %v2628_v50 = vrot.slane %v2626_v55, 4 }
 0x14d   : > { %v1439_v11 = vpop.permute.xlu0 %1438  ;;  %v1364_v24 = vpop.permute.xlu1 %1363  ;;  %v2581_v38 = vor.u32 %v2580_v19, %v9336_v45  ;;  %v2604_v22 = vrot.slane %v2602_v7, 4  ;;  %v8273_v19 = vld [vmem:[#allocation2 + $0x50] sm:$0x1]  ;;  %v8276_v7 = vld [vmem:[#allocation2 + $0x5c] sm:$0x1] }
 0x14e   : > { %v1505_v60 = vsel %vm1479_vm0, %v1472_v10, %v1439_v11  ;;  %v1478_v34 = vsel %vm1446_vm14, %v8266_v16, %v1364_v24  ;;  %v2547_v10 = vor.u32 %v2546_v52, %v2543_v57  ;;  %v2557_v11 = vor.u32 %v2556_v30, %v9331_v63 }
 0x14f   : > { %7709 = vmatprep.mubr.msk.bf16.mxu0 %vm2066_vm5, %v1505_v60  ;;  %v2589_v60 = vshrl.u32 %v8268_v32, 16  ;;  %v2592_v24 = vshll.u32 %v8268_v32, 16  ;;  %v2600_v30 = vrot.slane %v2598_v23, 5  ;;  %v2582_v17 = vrot.slane %v2581_v38, 4 }
 0x150   : > { %7710 = vmatmul.mubr.msk.bf16.gmra.mrb[24].mxu0 %vm2066_vm5, %v1507_v21  ;;  %v2584_v21 = vshll.u32 %v8270_v20, 16  ;;  %v2548_v5 = vrot.slane %v2547_v10, 4  ;;  %v2608_v58 = vshll.u32 %v8273_v19, 16  ;;  %v2632_v20 = vshll.u32 %v8276_v7, 16 }
 0x151   : > { %v1362_v35 = vpop.permute.xlu0 %1361  ;;  %v1445_v42 = vpop.permute.xlu1 %1444  ;;  %v2591_v57 = vrot.slane %v2589_v60, 4  ;;  %v2594_v52 = vrot.slane %v2592_v24, 5  ;;  %v2605_v10 = vor.u32 %v2604_v22, %v2600_v30  ;;  %v8275_v24 = vld [vmem:[#allocation2 + $0x64] sm:$0xf] }
 0x152   : > { %v1476_v46 = vsel %vm1446_vm14, %v8989_v18, %v1362_v35  ;;  %v1511_v26 = vsel %vm1479_vm0, %v1478_v34, %v1445_v42  ;;  %v2571_v18 = vor.u32 %v2570_v2, %v2567_v8  ;;  %v2622_v35 = vshll.u32 %v8272_v59, 16 }
 0x153   : > { %v2586_v16 = vrot.slane %v2584_v21, 5  ;;  %v3700_v34 = vsel %vm2099_vm15, %v9274_v0, 0  ;;  %v7220_v42 = vcombine.low %v2529_v43, %v2539_v3  ;;  %v2615_v2 = vrot.slane %v2613_v51, 4 }
 0x154   : > { %v2572_v44 = vrot.slane %v2571_v18, 4  ;;  %v2553_v27 = vsel %vm8505_vm13, %v2548_v5, %v9331_v63  ;;  %v2646_v40 = vshll.u32 %v8275_v24, 16  ;;  %v2610_v43 = vrot.slane %v2608_v58, 5 }
 0x155   : > { %v1443_v48 = vpop.permute.xlu0 %1442  ;;  %v9352_v62 = vpop.permute.xlu1 %3485  ;;  %v2587_v63 = vsel %vm8505_vm13, %v2582_v17, %v2586_v16  ;;  %v2606_v51 = vrot.slane %v2605_v10, 4  ;;  %v2634_v5 = vrot.slane %v2632_v20, 5 }
 0x156   : > { %v1509_v28 = vsel %vm1479_vm0, %v1476_v46, %v1443_v48  ;;  %v2618_v46 = vrot.slane %v2616_v33, 5  ;;  %v2624_v48 = vrot.slane %v2622_v35, 5  ;;  %v2577_v0 = vsel %vm8505_vm13, %v2572_v44, %v9336_v45 }
 0x157   : > { %7713 = vmatprep.mubr.msk.bf16.mxu0 %vm2066_vm5, %v1509_v28  ;;  %v7222_v38 = vcombine.low %v2577_v0, %v2587_v63  ;;  %v2648_v35 = vrot.slane %v2646_v40, 5 }
 0x158   : > { %7714 = vmatmul.mubr.msk.bf16.gmra.mrb[28].mxu0 %vm2066_vm5, %v1511_v26  ;;  %v2595_v26 = vor.u32 %v2594_v52, %v2591_v57  ;;  %v2619_v45 = vor.u32 %v2618_v46, %v2615_v2  ;;  %v2629_v21 = vor.u32 %v2628_v50, %v2624_v48  ;;  %v8277_v52 = vld [vmem:[#allocation2 + $0x68] sm:$0x1] }
 0x159   : > { %7719 = vmatprep.mubr.msk.bf16.mxu0 %vm1446_vm14, %v7218_v6  ;;  %v9350_v15 = vpop.permute.xlu0 %3483  ;;  %v2558_v6 = vrot.slane %v2557_v11, 4  ;;  %v8274_v11 = vld [vmem:[#allocation2 + $0x60] sm:$0xf]  ;;  %v9368_v60 = vpop.permute.xlu1 %3565  ;;  %v2656_v22 = vshll.u32 %v8277_v52, 16 }
 0x15a   : > { %v2637_v32 = vshrl.u32 %v8274_v11, 16  ;;  %v2640_v18 = vshll.u32 %v8274_v11, 16  ;;  %v2596_v56 = vrot.slane %v2595_v26, 4  ;;  %v2630_v57 = vrot.slane %v2629_v21, 4 }
 0x15b   : > { %v2563_v28 = vsel %vm8505_vm13, %v2558_v6, %v2562_v61  ;;  %v2620_v6 = vrot.slane %v2619_v45, 4  ;;  %v8279_v45 = vld [vmem:[#allocation2 + $0x24] sm:$0xff]  }
 0x15c   : > { %v7221_v3 = vcombine.low %v2553_v27, %v2563_v28  ;;  %v2639_v33 = vrot.slane %v2637_v32, 4  ;;  %v2642_v59 = vrot.slane %v2640_v18, 5  ;;  %v2601_v16 = vsel %vm8505_vm13, %v2596_v56, %v2600_v30  ;;  %v8278_v32 = vld [vmem:[#allocation2 + $0x18] sm:$0xff]  }
 0x15d   : > { %v9356_v8 = vpop.permute.xlu0 %3563  ;;  %v3490_v44 = vpop.permute.xlu1 %3489  ;;  %v2625_v46 = vsel %vm8505_vm13, %v2620_v6, %v2624_v48  ;;  %v2635_v50 = vsel %vm8505_vm13, %v2630_v57, %v2634_v5  ;;  %v2658_v27 = vrot.slane %v2656_v22, 5  ;;  %v3596_v63 = vsel %vm1446_vm14, %v8278_v32, %v9350_v15 }
 0x15e   : > { %v7224_v28 = vcombine.low %v2625_v46, %v2635_v50  ;;  %v3628_v40 = vsel %vm1479_vm0, %v3596_v63, %v9356_v8  ;;  %v3598_v21 = vsel %vm1446_vm14, %v8279_v45, %v9352_v62 }
 0x160   : > { %7720 = vmatmul.mubr.msk.bf16.vlgmr.msra.gmra.mrb[32].mxu0 %vm1446_vm14, %v8529_v41  ;;  %v2650_v41 = vshrl.u32 %v8275_v24, 16 }
 0x161   : > { %7752 = vmatpush3.bf16.msra.mxu0 %v3700_v34  ;;  %7723 = vmatprep.mubr.msk.bf16.mxu0 %vm1446_vm14, %v7220_v42  ;;  %v3488_v23 = vpop.permute.xlu0 %3487  ;;  %v2611_v34 = vsel %vm8505_vm13, %v2606_v51, %v2610_v43  ;;  %v2643_v42 = vor.u32 %v2642_v59, %v2639_v33  ;;  %v3570_v58 = vpop.permute.xlu1 %3569 }
 0x162   : > { %v2652_v55 = vrot.slane %v2650_v41, 4  ;;  %v7223_v19 = vcombine.low %v2601_v16, %v2611_v34  ;;  %v3600_v7 = vsel %vm1446_vm14, %v9047_v12, %v3488_v23  ;;  %v8280_v12 = vld [vmem:[#allocation2 + $0x3c] sm:$0xff]  }
 0x163   : > { %v2644_v0 = vrot.slane %v2643_v42, 4  ;;  %v3602_v23 = vsel %vm1446_vm14, %v8280_v12, %v3490_v44  ;;  %v401_v12 = vld [vmem:[#allocation3 + $0x3c] sm:$0x1] }
 0x164   : > { %v2653_v17 = vor.u32 %v2652_v55, %v2648_v35  ;;  %v3634_v51 = vsel %vm1479_vm0, %v3602_v23, %v3570_v58  ;;  %v402_v23 = vsel %vm9456_vm8, 0, %v401_v12 }
 0x165   : > { %v3568_v61 = vpop.permute.xlu0 %3567  ;;  %v2649_v30 = vsel %vm8505_vm13, %v2644_v0, %v2648_v35  ;;  %v3494_v11 = vpop.permute.xlu1 %3493  ;;  %403 = vst [vmem:[#allocation3 + $0x3c] sm:$0x1] %v402_v23 }
 0x166   : > { %v2654_v26 = vrot.slane %v2653_v17, 4  ;;  %v3632_v15 = vsel %vm1479_vm0, %v3600_v7, %v3568_v61 }
 0x168   : > { %7724 = vmatmul.mubr.msk.bf16.gmra.mrb[36].mxu0 %vm1446_vm14, %v7221_v3  ;;  %v2659_v48 = vsel %vm8505_vm13, %v2654_v26, %v2658_v27  ;;  %v3630_v3 = vsel %vm1479_vm0, %v3598_v21, %v9368_v60  ;;  %v453_v21 = vld [vmem:[#allocation3 + $0x38] sm:$0x1] }
 0x169   : > { %7727 = vmatprep.mubr.msk.bf16.mxu0 %vm1446_vm14, %v7222_v38  ;;  %v3492_v2 = vpop.permute.xlu0 %3491  ;;  %v7225_v18 = vcombine.low %v2649_v30, %v2659_v48  ;;  %v3574_v41 = vpop.permute.xlu1 %3573 }
 0x16a   : > { %v3604_v38 = vsel %vm1446_vm14, %v9077_v36, %v3492_v2  ;;  %v3606_v36 = vsel %vm1446_vm14, %v9069_v37, %v3494_v11  ;;  %v389_v11 = vld [vmem:[#allocation3 + $0xc] sm:$0x1] }
 0x16b   : > { %v3638_v61 = vsel %vm1479_vm0, %v3606_v36, %v3574_v41  ;;  %v390_v32 = vsel %vm9456_vm8, 0, %v389_v11  ;;  %v398_v41 = vld [vmem:[#allocation3 + $0x30] sm:$0x1]  ;;  %v407_v36 = vld [vmem:[#allocation3 + $0x54] sm:$0x1] }
 0x16c   : > { %391 = vst [vmem:[#allocation3 + $0xc] sm:$0x1] %v390_v32  ;;  %v399_v7 = vsel %vm9456_vm8, 0, %v398_v41  ;;  %v434_v11 = vld [vmem:[#allocation3 + $0xc0] sm:$0x1] }
 0x16d   : > { %v3572_v10 = vpop.permute.xlu0 %3571  ;;  %400 = vst [vmem:[#allocation3 + $0x30] sm:$0x1] %v399_v7  ;;  %v489_v7 = vld [vmem:[#allocation3 + $0xc8] sm:$0x1] }
 0x16e   : > { %v3498_v43 = vpop.permute.xlu1 %3497  ;;  %v3636_v62 = vsel %vm1479_vm0, %v3604_v38, %v3572_v10 }
 0x170   : > { %7728 = vmatmul.mubr.msk.bf16.gmra.mrb[40].mxu0 %vm1446_vm14, %v7223_v19 }
 0x171   : > { %7731 = vmatprep.mubr.msk.bf16.mxu0 %vm1446_vm14, %v7224_v28  ;;  %v3496_v24 = vpop.permute.xlu0 %3495 }
 0x172   : > { %v3578_v56 = vpop.permute.xlu1 %3577  ;;  %v3608_v59 = vsel %vm1446_vm14, %v9106_v49, %v3496_v24  ;;  %v3610_v49 = vsel %vm1446_vm14, %v9098_v54, %v3498_v43  ;;  %v450_v43 = vld [vmem:[#allocation3 + $0x2c] sm:$0x1] }
 0x173   : > { %v3642_v52 = vsel %vm1479_vm0, %v3610_v49, %v3578_v56  ;;  %v459_v56 = vld [vmem:[#allocation3 + $0x50] sm:$0x1] }
 0x175   : > { %v3576_v20 = vpop.permute.xlu0 %3575 }
 0x176   : > { %v3502_v60 = vpop.permute.xlu1 %3501  ;;  %v3640_v55 = vsel %vm1479_vm0, %v3608_v59, %v3576_v20  ;;  %v395_v20 = vld [vmem:[#allocation3 + $0x24] sm:$0x1] }
 0x177   : > { %v396_v45 = vsel %vm9456_vm8, 0, %v395_v20 }
 0x178   : > { %7732 = vmatmul.mubr.msk.bf16.gmra.mrb[44].mxu0 %vm1446_vm14, %v7225_v18  ;;  %v447_v18 = vld [vmem:[#allocation3 + $0x20] sm:$0x1]  ;;  %397 = vst [vmem:[#allocation3 + $0x24] sm:$0x1] %v396_v45  ;;  %v490_v45 = vsel %vm9475_vm1, 0, %v489_v7 }
 0x179   : > { %7753 = vmatprep.mubr.msk.bf16.mxu0 %vm2066_vm5, %v3628_v40  ;;  %v3500_v8 = vpop.permute.xlu0 %3499  ;;  %v448_v24 = vsel %vm9475_vm1, 0, %v447_v18  ;;  %v444_v40 = vld [vmem:[#allocation3 + $0x14] sm:$0x1]  ;;  %v435_v18 = vsel %vm9456_vm8, 0, %v434_v11  ;;  %491 = vst [vmem:[#allocation3 + $0xc8] sm:$0x1] %v490_v45 }
 0x17a   : > { %v3582_v5 = vpop.permute.xlu1 %3581  ;;  %v3612_v6 = vsel %vm1446_vm14, %v9141_v13, %v3500_v8  ;;  %v3614_v13 = vsel %vm1446_vm14, %v9132_v47, %v3502_v60  ;;  %449 = vst [vmem:[#allocation3 + $0x20] sm:$0x1] %v448_v24  ;;  %v445_v9 = vsel %vm9475_vm1, 0, %v444_v40  ;;  %v404_v8 = vld [vmem:[#allocation3 + $0x48] sm:$0x1] }
 0x17b   : > { %v3646_v54 = vsel %vm1479_vm0, %v3614_v13, %v3582_v5  ;;  %446 = vst [vmem:[#allocation3 + $0x14] sm:$0x1] %v445_v9  ;;  %v405_v38 = vsel %vm9456_vm8, 0, %v404_v8  ;;  %v410_v60 = vld [vmem:[#allocation3 + $0x60] sm:$0x1] }
 0x17c   : > { %406 = vst [vmem:[#allocation3 + $0x48] sm:$0x1] %v405_v38  ;;  %v411_v59 = vsel %vm9456_vm8, 0, %v410_v60  ;;  %v462_v5 = vld [vmem:[#allocation3 + $0x5c] sm:$0x1] }
 0x17d   : > { %v3580_v33 = vpop.permute.xlu0 %3579  ;;  %412 = vst [vmem:[#allocation3 + $0x60] sm:$0x1] %v411_v59  ;;  %436 = vst [vmem:[#allocation3 + $0xc0] sm:$0x1] %v435_v18  ;;  %v431_v40 = vld [vmem:[#allocation3 + $0xb4] sm:$0x1] }
 0x17e   : > { %v3644_v44 = vsel %vm1479_vm0, %v3612_v6, %v3580_v33  ;;  %v3506_v37 = vpop.permute.xlu1 %3505  ;;  %v463_v6 = vsel %vm9475_vm1, 0, %v462_v5  ;;  %v432_v9 = vsel %vm9456_vm8, 0, %v431_v40  ;;  %v9574_v60 = vld [vmem:[%s10885_s2] ss:$0 sm:$0xff]  ;;  %v8283_v59 = vld [vmem:[#allocation2 + $0x8c] sm:$0x1] }
 0x17f   : > { %464 = vst [vmem:[#allocation3 + $0x5c] sm:$0x1] %v463_v6  ;;  %433 = vst [vmem:[#allocation3 + $0xb4] sm:$0x1] %v432_v9 }
 0x180   : > { %7754 = vmatmul.mubr.msk.bf16.vlgmr.msra.gmra.mrb[0].mxu0 %vm2066_vm5, %v3630_v3  ;;  %v451_v3 = vsel %vm9475_vm1, 0, %v450_v43  ;;  %v486_v43 = vld [vmem:[#allocation3 + $0xbc] sm:$0x1] }
 0x181   : > { %7757 = vmatprep.mubr.msk.bf16.mxu0 %vm2066_vm5, %v3632_v15  ;;  %v3504_v35 = vpop.permute.xlu0 %3503  ;;  %v454_v15 = vsel %vm9475_vm1, 0, %v453_v21  ;;  %452 = vst [vmem:[#allocation3 + $0x2c] sm:$0x1] %v451_v3  ;;  %v487_v3 = vsel %vm9475_vm1, 0, %v486_v43 }
 0x182   : > { %v3616_v16 = vsel %vm1446_vm14, %v9168_v39, %v3504_v35  ;;  %v3586_v34 = vpop.permute.xlu1 %3585  ;;  %v3618_v39 = vsel %vm1446_vm14, %v9161_v53, %v3506_v37  ;;  %455 = vst [vmem:[#allocation3 + $0x38] sm:$0x1] %v454_v15  ;;  %v408_v35 = vsel %vm9456_vm8, 0, %v407_v36  ;;  %488 = vst [vmem:[#allocation3 + $0xbc] sm:$0x1] %v487_v3  ;;  %v2728_v36 = vshll.u32 %v8283_v59, 16 }
 0x183   : > { %v3650_v19 = vsel %vm1479_vm0, %v3618_v39, %v3586_v34  ;;  %409 = vst [vmem:[#allocation3 + $0x54] sm:$0x1] %v408_v35  ;;  %v422_v34 = vld [vmem:[#allocation3 + $0x90] sm:$0x1]  ;;  %v474_v39 = vld [vmem:[#allocation3 + $0x8c] sm:$0x1] }
 0x185   : > { %v3584_v57 = vpop.permute.xlu0 %3583 }
 0x186   : > { %v3648_v42 = vsel %vm1479_vm0, %v3616_v16, %v3584_v57  ;;  %v3510_v2 = vpop.permute.xlu1 %3509  ;;  %v416_v57 = vld [vmem:[#allocation3 + $0x78] sm:$0x1]  ;;  %v468_v16 = vld [vmem:[#allocation3 + $0x74] sm:$0x1] }
 0x187   : > { %v417_v49 = vsel %vm9456_vm8, 0, %v416_v57  ;;  %v469_v13 = vsel %vm9475_vm1, 0, %v468_v16  ;;  %v8286_v16 = vld [vmem:[#allocation2 + $0xc8] sm:$0x1] }
 0x188   : > { %7758 = vmatmul.mubr.msk.bf16.gmra.mrb[4].mxu0 %vm2066_vm5, %v3634_v51  ;;  %v456_v51 = vld [vmem:[#allocation3 + $0x44] sm:$0x1]  ;;  %418 = vst [vmem:[#allocation3 + $0x78] sm:$0x1] %v417_v49  ;;  %470 = vst [vmem:[#allocation3 + $0x74] sm:$0x1] %v469_v13 }
 0x189   : > { %7761 = vmatprep.mubr.msk.bf16.mxu0 %vm2066_vm5, %v3636_v62  ;;  %v3508_v22 = vpop.permute.xlu0 %3507  ;;  %v460_v62 = vsel %vm9475_vm1, 0, %v459_v56  ;;  %v457_v33 = vsel %vm9475_vm1, 0, %v456_v51  ;;  %v8281_v56 = vld [vmem:[#allocation2 + $0x80] sm:$0x1]  ;;  %v8282_v51 = vld [vmem:[#allocation2 + $0x98] sm:$0x1] }
 0x18a   : > { %v3620_v46 = vsel %vm1446_vm14, %v9197_v4, %v3508_v22  ;;  %v3590_v58 = vpop.permute.xlu1 %3589  ;;  %v3622_v4 = vsel %vm1446_vm14, %v9189_v29, %v3510_v2  ;;  %v392_v29 = vld [vmem:[#allocation3 + $0x18] sm:$0x1]  ;;  %461 = vst [vmem:[#allocation3 + $0x50] sm:$0x1] %v460_v62  ;;  %458 = vst [vmem:[#allocation3 + $0x44] sm:$0x1] %v457_v33 }
 0x18b   : > { %v3654_v26 = vsel %vm1479_vm0, %v3622_v4, %v3590_v58  ;;  %v477_v2 = vld [vmem:[#allocation3 + $0x98] sm:$0x1]  ;;  %v425_v58 = vld [vmem:[#allocation3 + $0x9c] sm:$0x1]  ;;  %v2704_v62 = vshll.u32 %v8281_v56, 16  ;;  %v2752_v33 = vshll.u32 %v8282_v51, 16 }
 0x18c   : > { %v2848_v13 = vshll.u32 %v8286_v16, 16  ;;  %v4449_v16 = vld [vmem:[#allocation3 + $0xc] sm:$0xf] }
 0x18d   : > { %v3588_v17 = vpop.permute.xlu0 %3587  ;;  %v9577_v57 = vrot.slane %v2704_v62, 5  ;;  %v9579_v49 = vrot.slane %v2752_v33, 5 }
 0x18e   : > { %v3652_v47 = vsel %vm1479_vm0, %v3620_v46, %v3588_v17  ;;  %v3514_v0 = vpop.permute.xlu1 %3513  ;;  %v478_v46 = vsel %vm9475_vm1, 0, %v477_v2 }
 0x18f   : > { %v3626_v10 = vsel %vm1446_vm14, %v9221_v31, %v3514_v0  ;;  %v393_v31 = vsel %vm9456_vm8, 0, %v392_v29  ;;  %479 = vst [vmem:[#allocation3 + $0x98] sm:$0x1] %v478_v46 }
 0x190   : > { %7762 = vmatmul.mubr.msk.bf16.gmra.mrb[8].mxu0 %vm2066_vm5, %v3638_v61  ;;  %394 = vst [vmem:[#allocation3 + $0x18] sm:$0x1] %v393_v31 }
 0x191   : > { %7765 = vmatprep.mubr.msk.bf16.mxu0 %vm2066_vm5, %v3640_v55  ;;  %v3512_v50 = vpop.permute.xlu0 %3511  ;;  %v465_v55 = vld [vmem:[#allocation3 + $0x68] sm:$0x1] }
 0x192   : > { %v3624_v27 = vsel %vm1446_vm14, %v9232_v14, %v3512_v50  ;;  %v3594_v30 = vpop.permute.xlu1 %3593  ;;  %v466_v61 = vsel %vm9475_vm1, 0, %v465_v55  ;;  %v475_v50 = vsel %vm9475_vm1, 0, %v474_v39  ;;  %v8284_v55 = vld [vmem:[#allocation2 + $0xb0] sm:$0x1] }
 0x193   : > { %v3658_v48 = vsel %vm1479_vm0, %v3626_v10, %v3594_v30  ;;  %467 = vst [vmem:[#allocation3 + $0x68] sm:$0x1] %v466_v61  ;;  %476 = vst [vmem:[#allocation3 + $0x8c] sm:$0x1] %v475_v50  ;;  %v480_v30 = vld [vmem:[#allocation3 + $0xa4] sm:$0x1] }
 0x194   : > { %v2800_v61 = vshll.u32 %v8284_v55, 16 }
 0x195   : > { %v3592_v28 = vpop.permute.xlu0 %3591 }
 0x196   : > { %v3656_v53 = vsel %vm1479_vm0, %v3624_v27, %v3592_v28  ;;  %v426_v27 = vsel %vm9456_vm8, 0, %v425_v58  ;;  %v483_v28 = vld [vmem:[#allocation3 + $0xb0] sm:$0x1]  ;;  %v9586_v39 = vrot.slane %v2800_v61, 5 }
 0x197   : > { %427 = vst [vmem:[#allocation3 + $0x9c] sm:$0x1] %v426_v27  ;;  %v484_v4 = vsel %vm9475_vm1, 0, %v483_v28  ;;  %v4456_v33 = vld [vmem:[#allocation3 + $0x18] sm:$0xf] }
 0x198   : > { %7766 = vmatmul.mubr.msk.bf16.gmra.mrb[12].mxu0 %vm2066_vm5, %v3642_v52  ;;  %v471_v52 = vld [vmem:[#allocation3 + $0x80] sm:$0x1]  ;;  %485 = vst [vmem:[#allocation3 + $0xb0] sm:$0x1] %v484_v4  ;;  %v9590_v4 = vrot.slane %v2848_v13, 5 }
 0x199   : > { %7769 = vmatprep.mubr.msk.bf16.mxu0 %vm2066_vm5, %v3644_v44  ;;  %v413_v44 = vld [vmem:[#allocation3 + $0x6c] sm:$0x1]  ;;  %v472_v22 = vsel %vm9475_vm1, 0, %v471_v52 }
 0x19a   : > { %v414_v37 = vsel %vm9456_vm8, 0, %v413_v44  ;;  %473 = vst [vmem:[#allocation3 + $0x80] sm:$0x1] %v472_v22  ;;  %v8285_v44 = vld [vmem:[#allocation2 + $0xa4] sm:$0x1] }
 0x19b   : > { %415 = vst [vmem:[#allocation3 + $0x6c] sm:$0x1] %v414_v37  ;;  %v2776_v37 = vshll.u32 %v8285_v44, 16 }
 0x19d   : > { %v9588_v28 = vrot.slane %v2776_v37, 5 }
 0x1a0   : > { %7770 = vmatmul.mubr.msk.bf16.gmra.mrb[16].mxu0 %vm2066_vm5, %v3646_v54  ;;  %v419_v54 = vld [vmem:[#allocation3 + $0x84] sm:$0x1] }
 0x1a1   : > { %7773 = vmatprep.mubr.msk.bf16.mxu0 %vm2066_vm5, %v3648_v42  ;;  %v423_v42 = vsel %vm9456_vm8, 0, %v422_v34  ;;  %v420_v17 = vsel %vm9456_vm8, 0, %v419_v54 }
 0x1a2   : > { %424 = vst [vmem:[#allocation3 + $0x90] sm:$0x1] %v423_v42  ;;  %421 = vst [vmem:[#allocation3 + $0x84] sm:$0x1] %v420_v17  ;;  %v9583_v17 = vrot.slane %v2728_v36, 5 }
 0x1a8   : > { %7774 = vmatmul.mubr.msk.bf16.gmra.mrb[20].mxu0 %vm2066_vm5, %v3650_v19 }
 0x1a9   : > { %7777 = vmatprep.mubr.msk.bf16.mxu0 %vm2066_vm5, %v3652_v47  ;;  %v428_v47 = vld [vmem:[#allocation3 + $0xa8] sm:$0x1] }
 0x1aa   : > { %v429_v19 = vsel %vm9456_vm8, 0, %v428_v47 }
 0x1ab   : > { %430 = vst [vmem:[#allocation3 + $0xa8] sm:$0x1] %v429_v19 }
 0x1b0   : > { %7778 = vmatmul.mubr.msk.bf16.gmra.mrb[24].mxu0 %vm2066_vm5, %v3654_v26 }
 0x1b1   : > { %7781 = vmatprep.mubr.msk.bf16.mxu0 %vm2066_vm5, %v3656_v53 }
 0x1b8   : > { %7782 = vmatmul.mubr.msk.bf16.gmra.mrb[28].mxu0 %vm2066_vm5, %v3658_v48  ;;  %v481_v48 = vsel %vm9475_vm1, 0, %v480_v30 }
 0x1b9   : > { %482 = vst [vmem:[#allocation3 + $0xa4] sm:$0x1] %v481_v48 }
 0x233   : > { %v9529_v0 = vpop.f32.mrb[32].mxu0 }
 0x234   : > { %v9531_v53 = vpop.f32.mrb[33].mxu0 }
 0x235   : > { %v9533_v26 = vpop.f32.mrb[34].mxu0 }
 0x236   : > { %v9535_v10 = vpop.f32.mrb[35].mxu0 }
 0x23b   : > { %v9539_v29 = vpop.f32.mrb[36].mxu0 }
 0x23c   : > { %v9541_v31 = vpop.f32.mrb[37].mxu0 }
 0x23d   : > { %v9543_v32 = vpop.f32.mrb[38].mxu0 }
 0x23e   : > { %v9547_v24 = vpop.f32.mrb[39].mxu0 }
 0x243   : > { %v9551_v41 = vpop.f32.mrb[40].mxu0 }
 0x244   : > { %v9553_v20 = vpop.f32.mrb[41].mxu0 }
 0x245   : > { %v9557_v21 = vpop.f32.mrb[42].mxu0 }
 0x246   : > { %v9559_v15 = vpop.f32.mrb[43].mxu0 }
 0x24b   : > { %v9563_v8 = vpop.f32.mrb[44].mxu0 }
 0x24c   : > { %10904 = vst [vmem:[#allocation4_spill] sm:$0xff] %v9563_v8  ;;  %v9565_v38 = vpop.f32.mrb[45].mxu0 }
 0x24d   : > { %10905 = vst [vmem:[#allocation5_spill] sm:$0xff] %v9565_v38  ;;  %v9567_v12 = vpop.f32.mrb[46].mxu0 }
 0x24e   : > { %10906 = vst [vmem:[#allocation6_spill] sm:$0xff] %v9567_v12  ;;  %v9569_v23 = vpop.f32.mrb[47].mxu0 }
 0x24f   : > { %10907 = vst [vmem:[#allocation7_spill] sm:$0xff] %v9569_v23 }
 0x253   : > { %v7755_v35 = vpop.f32.mrb[0].mxu0 }
 0x254   : > { %v3904_v5 = vadd.f32 %v7755_v35, %v9574_v60  ;;  %v3736_v6 = vpop.f32.mrb[1].mxu0 }
 0x255   : > { %v3902_v52 = vadd.f32 %v9574_v60, %v3736_v6  ;;  %v7756_v22 = vpop.f32.mrb[2].mxu0 }
 0x256   : > { %vm3936_vm11 = vcmp.ge.f32.partialorder %v3904_v5, 0.0  ;;  %v3968_v34 = vmul.f32 0.2, %v3904_v5  ;;  %v3905_v42 = vadd.f32 %v7756_v22, %v9574_v60  ;;  %v3739_v54 = vpop.f32.mrb[3].mxu0 }
 0x257   : > { %vm3934_vm12 = vcmp.ge.f32.partialorder %v3902_v52, 0.0  ;;  %v3966_v2 = vmul.f32 0.2, %v3902_v52  ;;  %v3903_v46 = vadd.f32 %v9574_v60, %v3739_v54 }
 0x258   : > { %v4000_v50 = vsel %vm3936_vm11, %v3904_v5, %v3968_v34  ;;  %vm3937_vm15 = vcmp.ge.f32.partialorder %v3905_v42, 0.0  ;;  %v3969_v47 = vmul.f32 0.2, %v3905_v42 }
 0x259   : > { %v7497_v19 = vpack.c.bf16 %v4000_v50, %v4000_v50  ;;  %v3998_v58 = vsel %vm3934_vm12, %v3902_v52, %v3966_v2  ;;  %vm3935_vm5 = vcmp.ge.f32.partialorder %v3903_v46, 0.0  ;;  %v3967_v27 = vmul.f32 0.2, %v3903_v46  ;;  %v4460_v2 = vld [vmem:[#allocation3 + $0x20] sm:$0x1] }
 0x25a   : > { %v7495_v30 = vpack.c.bf16 %v3998_v58, %v3998_v58  ;;  %v4001_v48 = vsel %vm3937_vm15, %v3905_v42, %v3969_v47  ;;  %v4453_v58 = vld [vmem:[#allocation3 + $0x14] sm:$0x1] }
 0x25b   : > { %v4144_v11 = vshrl.u32 %v7497_v19, 16  ;;  %v4147_v18 = vshll.u32 %v7497_v19, 16  ;;  %v7498_v40 = vpack.c.bf16 %v4001_v48, %v4001_v48  ;;  %v3999_v9 = vsel %vm3935_vm5, %v3903_v46, %v3967_v27  ;;  %v7759_v7 = vpop.f32.mrb[4].mxu0 }
 0x25c   : > { %v4127_v45 = vshrl.u32 %v7495_v30, 16  ;;  %v4130_v43 = vshll.u32 %v7495_v30, 16  ;;  %v7496_v3 = vpack.c.bf16 %v3999_v9, %v3999_v9  ;;  %v3908_v56 = vadd.f32 %v7759_v7, %v9574_v60  ;;  %v3752_v62 = vpop.f32.mrb[5].mxu0 }
 0x25d   : > { %v4146_v51 = vrot.slane %v4144_v11, 7  ;;  %v4152_v59 = vshrl.u32 %v7498_v40, 16  ;;  %v4155_v36 = vshll.u32 %v7498_v40, 16  ;;  %v3906_v35 = vadd.f32 %v9574_v60, %v3752_v62  ;;  %v7760_v55 = vpop.f32.mrb[6].mxu0 }
 0x25e   : > { %v4129_v5 = vrot.slane %v4127_v45, 7  ;;  %v4135_v6 = vshrl.u32 %v7496_v3, 16  ;;  %v4138_v44 = vshll.u32 %v7496_v3, 16  ;;  %vm3940_vm4 = vcmp.ge.f32.partialorder %v3908_v56, 0.0  ;;  %v3755_v37 = vpop.f32.mrb[7].mxu0 }
 0x25f   : > { %v4149_v52 = vor.u32 %v4147_v18, %v4146_v51  ;;  %v4150_v22 = vrot.slane %v4146_v51, 4  ;;  %v4154_v13 = vrot.slane %v4152_v59, 7  ;;  %v3972_v34 = vmul.f32 0.2, %v3908_v56 }
 0x260   : > { %v4132_v42 = vor.u32 %v4130_v43, %v4129_v5  ;;  %v4133_v54 = vrot.slane %v4129_v5, 4  ;;  %v4137_v46 = vrot.slane %v4135_v6, 7  ;;  %vm3938_vm11 = vcmp.ge.f32.partialorder %v3906_v35, 0.0 }
 0x261   : > { %v4457_v50 = vsel %vm9596_vm6, %v4149_v52, %v4456_v33  ;;  %v4157_v47 = vor.u32 %v4155_v36, %v4154_v13  ;;  %v4159_v19 = vrot.slane %v4154_v13, 4  ;;  %v4004_v27 = vsel %vm3940_vm4, %v3908_v56, %v3972_v34  ;;  %v4470_v13 = vld [vmem:[#allocation3 + $0x30] sm:$0xf] }
 0x262   : > { %4458 = vst [vmem:[#allocation3 + $0x18] sm:$0xf] %v4457_v50  ;;  %v4450_v30 = vsel %vm9596_vm6, %v4132_v42, %v4449_v16  ;;  %v4140_v48 = vor.u32 %v4138_v44, %v4137_v46  ;;  %v4142_v11 = vrot.slane %v4137_v46, 4  ;;  %v7501_v18 = vpack.c.bf16 %v4004_v27, %v4004_v27 }
 0x263   : > { %4451 = vst [vmem:[#allocation3 + $0xc] sm:$0xf] %v4450_v30  ;;  %v4158_v40 = vsel %vm8436_vm7, %v4150_v22, %v4157_v47  ;;  %v4461_v9 = vsel %vm9456_vm8, %v4159_v19, %v4460_v2  ;;  %v3970_v7 = vmul.f32 0.2, %v3906_v35  ;;  %v3909_v45 = vadd.f32 %v7760_v55, %v9574_v60  ;;  %v7763_v43 = vpop.f32.mrb[8].mxu0 }
 0x264   : > { %4459 = vst.msk [vmem:[#allocation3 + $0x1c] sm:$0xf] %vm375_vm2, %v4158_v40  ;;  %4462 = vst [vmem:[#allocation3 + $0x20] sm:$0x1] %v4461_v9  ;;  %v4141_v3 = vsel %vm8436_vm7, %v4133_v54, %v4140_v48  ;;  %v4454_v56 = vsel %vm9456_vm8, %v4142_v11, %v4453_v58  ;;  %v4178_v62 = vshrl.u32 %v7501_v18, 16  ;;  %v4181_v51 = vshll.u32 %v7501_v18, 16 }
 0x265   : > { %v3768_v33 = vpop.f32.mrb[9].mxu0  ;;  %4452 = vst.msk [vmem:[#allocation3 + $0x10] sm:$0xf] %vm375_vm2, %v4141_v3  ;;  %4455 = vst [vmem:[#allocation3 + $0x14] sm:$0x1] %v4454_v56  ;;  %v4002_v59 = vsel %vm3938_vm11, %v3906_v35, %v3970_v7  ;;  %vm3941_vm3 = vcmp.ge.f32.partialorder %v3909_v45, 0.0  ;;  %v3907_v55 = vadd.f32 %v9574_v60, %v3755_v37  ;;  %v3912_v52 = vadd.f32 %v7763_v43, %v9574_v60 }
 0x266   : > { %v3973_v36 = vmul.f32 0.2, %v3909_v45  ;;  %v7764_v5 = vpop.f32.mrb[10].mxu0  ;;  %v4180_v6 = vrot.slane %v4178_v62, 7  ;;  %v7499_v44 = vpack.c.bf16 %v4002_v59, %v4002_v59  ;;  %v3910_v22 = vadd.f32 %v9574_v60, %v3768_v33  ;;  %v4463_v37 = vld [vmem:[#allocation3 + $0x24] sm:$0xf] }
 0x267   : > { %v9620_v16 = vpop.f32.mrb[11].mxu0  ;;  %vm3939_vm12 = vcmp.ge.f32.partialorder %v3907_v55, 0.0  ;;  %v3971_v42 = vmul.f32 0.2, %v3907_v55  ;;  %v3913_v54 = vadd.f32 %v7764_v5, %v9574_v60  ;;  %vm3944_vm15 = vcmp.ge.f32.partialorder %v3912_v52, 0.0 }
 0x268   : > { %v4005_v34 = vsel %vm3941_vm3, %v3909_v45, %v3973_v36  ;;  %v4183_v35 = vor.u32 %v4181_v51, %v4180_v6  ;;  %v4184_v2 = vrot.slane %v4180_v6, 4  ;;  %v4161_v46 = vshrl.u32 %v7499_v44, 16  ;;  %v4474_v3 = vld [vmem:[#allocation3 + $0x38] sm:$0x1] }
 0x269   : > { %v4164_v50 = vshll.u32 %v7499_v44, 16  ;;  %v7502_v47 = vpack.c.bf16 %v4005_v34, %v4005_v34  ;;  %v4003_v19 = vsel %vm3939_vm12, %v3907_v55, %v3971_v42  ;;  %v3976_v58 = vmul.f32 0.2, %v3912_v52 }
 0x26a   : > { %v4471_v27 = vsel %vm9596_vm6, %v4183_v35, %v4470_v13  ;;  %v4163_v30 = vrot.slane %v4161_v46, 7  ;;  %v7500_v48 = vpack.c.bf16 %v4003_v19, %v4003_v19  ;;  %vm3942_vm5 = vcmp.ge.f32.partialorder %v3910_v22, 0.0  ;;  %v4467_v35 = vld [vmem:[#allocation3 + $0x2c] sm:$0x1] }
 0x26b   : > { %4472 = vst [vmem:[#allocation3 + $0x30] sm:$0xf] %v4471_v27  ;;  %v4186_v11 = vshrl.u32 %v7502_v47, 16  ;;  %v4189_v18 = vshll.u32 %v7502_v47, 16  ;;  %v4008_v40 = vsel %vm3944_vm15, %v3912_v52, %v3976_v58  ;;  %v3974_v9 = vmul.f32 0.2, %v3910_v22 }
 0x26c   : > { %v7767_v7 = vpop.f32.mrb[12].mxu0  ;;  %v4166_v45 = vor.u32 %v4164_v50, %v4163_v30  ;;  %v4167_v43 = vrot.slane %v4163_v30, 4  ;;  %v4169_v56 = vshrl.u32 %v7500_v48, 16  ;;  %v4172_v62 = vshll.u32 %v7500_v48, 16  ;;  %v4484_v48 = vld [vmem:[#allocation3 + $0x48] sm:$0xf] }
 0x26d   : > { %v3784_v51 = vpop.f32.mrb[13].mxu0  ;;  %v4188_v33 = vrot.slane %v4186_v11, 7  ;;  %v7505_v59 = vpack.c.bf16 %v4008_v40, %v4008_v40  ;;  %v4006_v36 = vsel %vm3942_vm5, %v3910_v22, %v3974_v9  ;;  %vm3945_vm4 = vcmp.ge.f32.partialorder %v3913_v54, 0.0 }
 0x26e   : > { %v7768_v55 = vpop.f32.mrb[14].mxu0  ;;  %v4464_v5 = vsel %vm9596_vm6, %v4166_v45, %v4463_v37  ;;  %v4171_v6 = vrot.slane %v4169_v56, 7  ;;  %v7503_v44 = vpack.c.bf16 %v4006_v36, %v4006_v36  ;;  %v3977_v13 = vmul.f32 0.2, %v3913_v54  ;;  %v4477_v56 = vld [vmem:[#allocation3 + $0x3c] sm:$0xf] }
 0x26f   : > { %v3787_v52 = vpop.f32.mrb[15].mxu0  ;;  %4465 = vst [vmem:[#allocation3 + $0x24] sm:$0xf] %v4464_v5  ;;  %v4191_v34 = vor.u32 %v4189_v18, %v4188_v33  ;;  %v4193_v42 = vrot.slane %v4188_v33, 4  ;;  %v4212_v46 = vshrl.u32 %v7505_v59, 16  ;;  %v4215_v50 = vshll.u32 %v7505_v59, 16 }
 0x270   : > { %v4174_v47 = vor.u32 %v4172_v62, %v4171_v6  ;;  %v4176_v19 = vrot.slane %v4171_v6, 4  ;;  %v4195_v58 = vshrl.u32 %v7503_v44, 16  ;;  %v4198_v27 = vshll.u32 %v7503_v44, 16 }
 0x271   : > { %v4192_v22 = vsel %vm8436_vm7, %v4184_v2, %v4191_v34  ;;  %v4475_v37 = vsel %vm9456_vm8, %v4193_v42, %v4474_v3  ;;  %v4214_v30 = vrot.slane %v4212_v46, 7  ;;  %v4009_v11 = vsel %vm3945_vm4, %v3913_v54, %v3977_v13 }
 0x272   : > { %4473 = vst.msk [vmem:[#allocation3 + $0x34] sm:$0xf] %vm375_vm2, %v4192_v22  ;;  %4476 = vst [vmem:[#allocation3 + $0x38] sm:$0x1] %v4475_v37  ;;  %v4175_v18 = vsel %vm8436_vm7, %v4167_v43, %v4174_v47  ;;  %v4468_v40 = vsel %vm9456_vm8, %v4176_v19, %v4467_v35  ;;  %v9637_v9 = vrot.slane %v4195_v58, 7  ;;  %v7506_v45 = vpack.c.bf16 %v4009_v11, %v4009_v11 }
 0x273   : > { %4466 = vst.msk [vmem:[#allocation3 + $0x28] sm:$0xf] %vm375_vm2, %v4175_v18  ;;  %4469 = vst [vmem:[#allocation3 + $0x2c] sm:$0x1] %v4468_v40  ;;  %v4217_v2 = vor.u32 %v4215_v50, %v4214_v30  ;;  %v4218_v3 = vrot.slane %v4214_v30, 4  ;;  %v3911_v54 = vadd.f32 %v9574_v60, %v9620_v16  ;;  %v3916_v62 = vadd.f32 %v7767_v7, %v9574_v60  ;;  %v7771_v33 = vpop.f32.mrb[16].mxu0 }
 0x274   : > { %v4200_v43 = vor.u32 %v4198_v27, %v9637_v9  ;;  %v4201_v59 = vrot.slane %v9637_v9, 4  ;;  %v4220_v36 = vshrl.u32 %v7506_v45, 16  ;;  %v4223_v5 = vshll.u32 %v7506_v45, 16  ;;  %v9645_v6 = vpop.f32.mrb[17].mxu0  ;;  %v4488_v50 = vld [vmem:[#allocation3 + $0x50] sm:$0x1] }
 0x275   : > { %v4485_v44 = vsel %vm9596_vm6, %v4217_v2, %v4484_v48  ;;  %vm3943_vm11 = vcmp.ge.f32.partialorder %v3911_v54, 0.0  ;;  %v3975_v13 = vmul.f32 0.2, %v3911_v54  ;;  %vm3948_vm3 = vcmp.ge.f32.partialorder %v3916_v62, 0.0  ;;  %v9649_v34 = vpop.f32.mrb[18].mxu0 }
 0x276   : > { %4486 = vst [vmem:[#allocation3 + $0x48] sm:$0xf] %v4485_v44  ;;  %v4478_v16 = vsel %vm9596_vm6, %v4200_v43, %v4477_v56  ;;  %v4222_v7 = vrot.slane %v4220_v36, 7  ;;  %v3980_v42 = vmul.f32 0.2, %v3916_v62  ;;  %v3914_v35 = vadd.f32 %v9574_v60, %v3784_v51  ;;  %v9654_v46 = vpop.f32.mrb[19].mxu0 }
 0x277   : > { %4479 = vst [vmem:[#allocation3 + $0x3c] sm:$0xf] %v4478_v16  ;;  %v4007_v47 = vsel %vm3943_vm11, %v3911_v54, %v3975_v13  ;;  %v3917_v19 = vadd.f32 %v7768_v55, %v9574_v60  ;;  %v3915_v58 = vadd.f32 %v9574_v60, %v3787_v52  ;;  %v3920_v27 = vadd.f32 %v7771_v33, %v9574_v60  ;;  %v4481_v52 = vld [vmem:[#allocation3 + $0x44] sm:$0x1] }
 0x278   : > { %v4225_v22 = vor.u32 %v4223_v5, %v4222_v7  ;;  %v4227_v37 = vrot.slane %v4222_v7, 4  ;;  %v7504_v30 = vpack.c.bf16 %v4007_v47, %v4007_v47  ;;  %v4012_v48 = vsel %vm3948_vm3, %v3916_v62, %v3980_v42  ;;  %v4498_v47 = vld [vmem:[#allocation3 + $0x60] sm:$0xf] }
 0x279   : > { %v7509_v11 = vpack.c.bf16 %v4012_v48, %v4012_v48  ;;  %vm3946_vm12 = vcmp.ge.f32.partialorder %v3914_v35, 0.0  ;;  %v3978_v18 = vmul.f32 0.2, %v3914_v35  ;;  %vm3949_vm15 = vcmp.ge.f32.partialorder %v3917_v19, 0.0 }
 0x27a   : > { %v4226_v51 = vsel %vm8436_vm7, %v4218_v3, %v4225_v22  ;;  %v4489_v40 = vsel %vm9456_vm8, %v4227_v37, %v4488_v50  ;;  %v4203_v55 = vshrl.u32 %v7504_v30, 16  ;;  %v4206_v45 = vshll.u32 %v7504_v30, 16  ;;  %v9672_v37 = vld [vmem:[#allocation3 + $0x18] sm:$0xff]  }
 0x27b   : > { %4487 = vst.msk [vmem:[#allocation3 + $0x4c] sm:$0xf] %vm375_vm2, %v4226_v51  ;;  %4490 = vst [vmem:[#allocation3 + $0x50] sm:$0x1] %v4489_v40  ;;  %v4246_v2 = vshrl.u32 %v7509_v11, 16  ;;  %v4249_v56 = vshll.u32 %v7509_v11, 16  ;;  %v4010_v54 = vsel %vm3946_vm12, %v3914_v35, %v3978_v18 }
 0x27c   : > { %v3981_v62 = vmul.f32 0.2, %v3917_v19  ;;  %v9665_v33 = vpop.f32.mrb[20].mxu0  ;;  %v4205_v43 = vrot.slane %v4203_v55, 7  ;;  %v7507_v36 = vpack.c.bf16 %v4010_v54, %v4010_v54  ;;  %vm3947_vm5 = vcmp.ge.f32.partialorder %v3915_v58, 0.0 }
 0x27d   : > { %v3979_v5 = vmul.f32 0.2, %v3915_v58  ;;  %v9667_v3 = vpop.f32.mrb[21].mxu0  ;;  %v4248_v44 = vrot.slane %v4246_v2, 7  ;;  %vm3952_vm4 = vcmp.ge.f32.partialorder %v3920_v27, 0.0 }
 0x27e   : > { %v4013_v13 = vsel %vm3949_vm15, %v3917_v19, %v3981_v62  ;;  %v3984_v16 = vmul.f32 0.2, %v3920_v27  ;;  %v9670_v7 = vpop.f32.mrb[22].mxu0  ;;  %v4208_v42 = vor.u32 %v4206_v45, %v4205_v43  ;;  %v4210_v50 = vrot.slane %v4205_v43, 4  ;;  %v4491_v11 = vld [vmem:[#allocation3 + $0x54] sm:$0xf] }
 0x27f   : > { %v4229_v35 = vshrl.u32 %v7507_v36, 16  ;;  %v4232_v22 = vshll.u32 %v7507_v36, 16  ;;  %v4251_v30 = vor.u32 %v4249_v56, %v4248_v44  ;;  %v4252_v48 = vrot.slane %v4248_v44, 4  ;;  %v9675_v40 = vpop.f32.mrb[23].mxu0  ;;  %v4502_v36 = vld [vmem:[#allocation3 + $0x68] sm:$0x1] }
 0x280   : > { %v7510_v18 = vpack.c.bf16 %v4013_v13, %v4013_v13  ;;  %v4011_v51 = vsel %vm3947_vm5, %v3915_v58, %v3979_v5  ;;  %v4209_v19 = vsel %vm8436_vm7, %v4201_v59, %v4208_v42  ;;  %v4482_v55 = vsel %vm9456_vm8, %v4210_v50, %v4481_v52  ;;  %v9683_v54 = vld [vmem:[#allocation3 + $0x20] ss:$0 sps:$4 sm:$0x11]   ;;  %v4495_v13 = vld [vmem:[#allocation3 + $0x5c] sm:$0x1] }
 0x281   : > { %v4231_v45 = vrot.slane %v4229_v35, 7  ;;  %v7508_v2 = vpack.c.bf16 %v4011_v51, %v4011_v51  ;;  %4480 = vst.msk [vmem:[#allocation3 + $0x40] sm:$0xf] %vm375_vm2, %v4209_v19  ;;  %4483 = vst [vmem:[#allocation3 + $0x44] sm:$0x1] %v4482_v55  ;;  %v4499_v58 = vsel %vm9596_vm6, %v4251_v30, %v4498_v47  ;;  %v4016_v9 = vsel %vm3952_vm4, %v3920_v27, %v3984_v16  ;;  %v8188_v27 = vld [vmem:[%s10886_s3 + $0xc] sm:$0xff]  }
 0x282   : > { %v4254_v56 = vshrl.u32 %v7510_v18, 16  ;;  %v4257_v62 = vshll.u32 %v7510_v18, 16  ;;  %4500 = vst [vmem:[#allocation3 + $0x60] sm:$0xf] %v4499_v58  ;;  %v7513_v42 = vpack.c.bf16 %v4016_v9, %v4016_v9  ;;  %v3918_v50 = vadd.f32 %v9574_v60, %v9645_v6  ;;  %7785 = vmatprep.subr.bf16.mxu1 %v8188_v27 }
 0x283   : > { %v4234_v43 = vor.u32 %v4232_v22, %v4231_v45  ;;  %v4235_v59 = vrot.slane %v4231_v45, 4  ;;  %v4237_v5 = vshrl.u32 %v7508_v2, 16  ;;  %v4240_v52 = vshll.u32 %v7508_v2, 16  ;;  %v9692_v51 = vpop.f32.mrb[24].mxu0 }
 0x284   : > { %v4256_v44 = vrot.slane %v4254_v56, 7  ;;  %v5298_v35 = vshrl.u32 %v9672_v37, 16  ;;  %v5300_v22 = vshll.u32 %v9672_v37, 16  ;;  %v5305_v30 = vshll.u32 %v9683_v54, 16  ;;  %v9701_v18 = vpop.f32.mrb[25].mxu0 }
 0x285   : > { %v4492_v16 = vsel %vm9596_vm6, %v4234_v43, %v4491_v11  ;;  %v4239_v47 = vrot.slane %v4237_v5, 7  ;;  %v4280_v55 = vshrl.u32 %v7513_v42, 16  ;;  %v4283_v45 = vshll.u32 %v7513_v42, 16  ;;  %v9703_v2 = vld [vmem:[#allocation3 + $0x14] ss:$0 sps:$4 sm:$0x11]  }
 0x286   : > { %4493 = vst [vmem:[#allocation3 + $0x54] sm:$0xf] %v4492_v16  ;;  %v4259_v6 = vor.u32 %v4257_v62, %v4256_v44  ;;  %v4261_v19 = vrot.slane %v4256_v44, 4  ;;  %vm3950_vm11 = vcmp.ge.f32.partialorder %v3918_v50, 0.0  ;;  %v3982_v9 = vmul.f32 0.2, %v3918_v50 }
 0x287   : > { %v4242_v58 = vor.u32 %v4240_v52, %v4239_v47  ;;  %v4244_v56 = vrot.slane %v4239_v47, 4  ;;  %v8144_v11 = vld [vmem:[#allocation3 + $0xc] sm:$0xff]   ;;  %v9705_v43 = vpop.f32.mrb[26].mxu0  ;;  %v9711_v62 = vrot.slane %v4280_v55, 7  ;;  %v4512_v44 = vld [vmem:[#allocation3 + $0x78] sm:$0xf]  ;;  %v3921_v55 = vadd.f32 %v9649_v34, %v9574_v60 }
 0x288   : > { %v4260_v5 = vsel %vm8436_vm7, %v4252_v48, %v4259_v6  ;;  %v4503_v16 = vsel %vm9456_vm8, %v4261_v19, %v4502_v36  ;;  %v5302_v42 = vrot.slane %v5300_v22, 1  ;;  %v9713_v23 = vpop.f32.mrb[27].mxu0  ;;  %v4014_v47 = vsel %vm3950_vm11, %v3918_v50, %v3982_v9 }
 0x289   : > { %4501 = vst.msk [vmem:[#allocation3 + $0x64] sm:$0xf] %vm375_vm2, %v4260_v5  ;;  %4504 = vst [vmem:[#allocation3 + $0x68] sm:$0x1] %v4503_v16  ;;  %v4243_v52 = vsel %vm8436_vm7, %v4235_v59, %v4242_v58  ;;  %v4496_v27 = vsel %vm9456_vm8, %v4244_v56, %v4495_v13  ;;  %v5307_v48 = vrot.slane %v5305_v30, 1  ;;  %v4285_v36 = vor.u32 %v4283_v45, %v9711_v62 }
 0x28a   : > { %4494 = vst.msk [vmem:[#allocation3 + $0x58] sm:$0xf] %vm375_vm2, %v4243_v52  ;;  %4497 = vst [vmem:[#allocation3 + $0x5c] sm:$0x1] %v4496_v27  ;;  %v7511_v6 = vpack.c.bf16 %v4014_v47, %v4014_v47  ;;  %v5303_v19 = vor.u32 %v5302_v42, %v5298_v35  ;;  %v5286_v5 = vshrl.u32 %v8144_v11, 16  ;;  %v5288_v16 = vshll.u32 %v8144_v11, 16 }
 0x28b   : > { %v5293_v59 = vshll.u32 %v9703_v2, 16  ;;  %v4513_v13 = vsel %vm9596_vm6, %v4285_v36, %v4512_v44  ;;  %v9729_v56 = vpop.f32.mrb[28].mxu0  ;;  %v4505_v45 = vld [vmem:[#allocation3 + $0x6c] sm:$0xf]  ;;  %vm3953_vm3 = vcmp.ge.f32.partialorder %v3921_v55, 0.0  ;;  %v3919_v44 = vadd.f32 %v9574_v60, %v9654_v46 }
 0x28c   : > { %v4263_v50 = vshrl.u32 %v7511_v6, 16  ;;  %v4266_v30 = vshll.u32 %v7511_v6, 16  ;;  %v5308_v58 = vsel %vm1140_vm10, %v5303_v19, %v5307_v48  ;;  %4514 = vst [vmem:[#allocation3 + $0x78] sm:$0xf] %v4513_v13  ;;  %v3985_v35 = vmul.f32 0.2, %v3921_v55 }
 0x28d   : > { %5479 = vrot.lane.b32.xlu1 %v5308_v58, %s8344_s27  ;;  %v5290_v34 = vrot.slane %v5288_v16, 1  ;;  %v5295_v9 = vrot.slane %v5293_v59, 1  ;;  %v9732_v42 = vpop.f32.mrb[29].mxu0  ;;  %v5512_v27 = vrot.slane %v9672_v37, 1  ;;  %v5513_v47 = vrot.slane %v9683_v54, 1  ;;  %v9743_v16 = vld [vmem:[#allocation3 + $0x30] sm:$0xff]  }
 0x28e   : > { %v9734_v52 = vrot.slane %v4263_v50, 7  ;;  %v9740_v48 = vpop.f32.mrb[30].mxu0  ;;  %v4017_v36 = vsel %vm3953_vm3, %v3921_v55, %v3985_v35  ;;  %v5509_v19 = vrot.slane %v8144_v11, 1  ;;  %v5510_v13 = vrot.slane %v9703_v2, 1 }
 0x28f   : > { %v5291_v6 = vor.u32 %v5290_v34, %v5286_v5  ;;  %v9745_v59 = vpop.f32.mrb[31].mxu0  ;;  %v7514_v46 = vpack.c.bf16 %v4017_v36, %v4017_v36  ;;  %vm3951_vm12 = vcmp.ge.f32.partialorder %v3919_v44, 0.0  ;;  %v3983_v54 = vmul.f32 0.2, %v3919_v44  ;;  %v4516_v34 = vld [vmem:[#allocation3 + $0x80] sm:$0x1] }
 0x290   : > { %v4268_v50 = vor.u32 %v4266_v30, %v9734_v52  ;;  %v4269_v58 = vrot.slane %v9734_v52, 4  ;;  %v5514_v22 = vsel %vm1365_vm9, %v5512_v27, %v5513_v47  ;;  %v5511_v55 = vsel %vm1365_vm9, %v5509_v19, %v5510_v13  ;;  %v9752_v11 = vld [vmem:[#allocation3 + $0x38] ss:$0 sps:$4 sm:$0x11]  }
 0x291   : > { %v5296_v37 = vsel %vm1140_vm10, %v5291_v6, %v5295_v9  ;;  %v4288_v5 = vshrl.u32 %v7514_v46, 16  ;;  %v4291_v35 = vshll.u32 %v7514_v46, 16  ;;  %5559 = vrot.lane.b32.xlu1 %v5514_v22, %s8346_s17  ;;  %v3924_v30 = vadd.f32 %v9665_v33, %v9574_v60  ;;  %v9765_v33 = vld [vmem:[#allocation3 + $0x24] sm:$0xff]  }
 0x292   : > { %v4506_v2 = vsel %vm9596_vm6, %v4268_v50, %v4505_v45  ;;  %5477 = vrot.lane.b32.xlu0 %v5296_v37, %s8344_s27  ;;  %v4015_v9 = vsel %vm3951_vm12, %v3919_v44, %v3983_v54  ;;  %v3922_v52 = vadd.f32 %v9574_v60, %v9667_v3  ;;  %v5322_v27 = vshrl.u32 %v9743_v16, 16  ;;  %v4509_v3 = vld [vmem:[#allocation3 + $0x74] sm:$0x1] }
 0x293   : > { %4507 = vst [vmem:[#allocation3 + $0x6c] sm:$0xf] %v4506_v2  ;;  %v5324_v45 = vshll.u32 %v9743_v16, 16  ;;  %v4290_v47 = vrot.slane %v4288_v5, 7  ;;  %v7512_v36 = vpack.c.bf16 %v4015_v9, %v4015_v9  ;;  %vm3956_vm15 = vcmp.ge.f32.partialorder %v3924_v30, 0.0 }
 0x294   : > { %v3988_v6 = vmul.f32 0.2, %v3924_v30  ;;  %vm3954_vm5 = vcmp.ge.f32.partialorder %v3922_v52, 0.0  ;;  %v3986_v19 = vmul.f32 0.2, %v3922_v52  ;;  %v5329_v13 = vshll.u32 %v9752_v11, 16 }
 0x295   : > { %v5326_v22 = vrot.slane %v5324_v45, 1  ;;  %v4293_v50 = vor.u32 %v4291_v35, %v4290_v47  ;;  %v4295_v44 = vrot.slane %v4290_v47, 4  ;;  %v4271_v46 = vshrl.u32 %v7512_v36, 16 }
 0x296   : > { %v4274_v37 = vshll.u32 %v7512_v36, 16  ;;  %5557 = vrot.lane.b32.xlu0 %v5511_v55, %s8346_s17  ;;  %v4020_v54 = vsel %vm3956_vm15, %v3924_v30, %v3988_v6  ;;  %v4018_v2 = vsel %vm3954_vm5, %v3922_v52, %v3986_v19  ;;  %v5331_v9 = vrot.slane %v5329_v13, 1  ;;  %v8149_v52 = vld [vmem:[#allocation3 + $0x2c] ss:$0 sps:$4 sm:$0x11]  }
 0x297   : > { %v5327_v5 = vor.u32 %v5326_v22, %v5322_v27  ;;  %v10910_v12 = vrot.slane %v9711_v62, 4  ;;  %v4517_v38 = vsel %vm9456_vm8, %v4295_v44, %v4516_v34  ;;  %v4273_v8 = vrot.slane %v4271_v46, 7  ;;  %v4519_v46 = vld [vmem:[#allocation3 + $0x84] sm:$0xf] }
 0x298   : > { %v7517_v35 = vpack.c.bf16 %v4020_v54, %v4020_v54  ;;  %4518 = vst [vmem:[#allocation3 + $0x80] sm:$0x1] %v4517_v38  ;;  %v7515_v47 = vpack.c.bf16 %v4018_v2, %v4018_v2  ;;  %v3925_v30 = vadd.f32 %v9670_v7, %v9574_v60  ;;  %v5310_v62 = vshrl.u32 %v9765_v33, 16 }
 0x299   : > { %v4294_v45 = vsel %vm8436_vm7, %v10910_v12, %v4293_v50  ;;  %v5332_v55 = vsel %vm1140_vm10, %v5327_v5, %v5331_v9  ;;  %v4276_v27 = vor.u32 %v4274_v37, %v4273_v8  ;;  %v4278_v36 = vrot.slane %v4273_v8, 4  ;;  %v4526_v8 = vld [vmem:[#allocation3 + $0x90] sm:$0xf] }
 0x29a   : > { %4515 = vst.msk [vmem:[#allocation3 + $0x7c] sm:$0xf] %vm375_vm2, %v4294_v45  ;;  %v4314_v12 = vshrl.u32 %v7517_v35, 16  ;;  %v4317_v6 = vshll.u32 %v7517_v35, 16  ;;  %5483 = vrot.lane.b32.xlu1 %v5332_v55, %s8344_s27  ;;  %v4297_v34 = vshrl.u32 %v7515_v47, 16  ;;  %v4300_v19 = vshll.u32 %v7515_v47, 16 }
 0x29b   : > { %vm3957_vm4 = vcmp.ge.f32.partialorder %v3925_v30, 0.0  ;;  %v3989_v22 = vmul.f32 0.2, %v3925_v30  ;;  %v4277_v38 = vsel %vm8436_vm7, %v4269_v58, %v4276_v27  ;;  %v4510_v13 = vsel %vm9456_vm8, %v4278_v36, %v4509_v3 }
 0x29c   : > { %v4316_v7 = vrot.slane %v4314_v12, 7  ;;  %v5312_v50 = vshll.u32 %v9765_v33, 16  ;;  %4508 = vst.msk [vmem:[#allocation3 + $0x70] sm:$0xf] %vm375_vm2, %v4277_v38  ;;  %4511 = vst [vmem:[#allocation3 + $0x74] sm:$0x1] %v4510_v13  ;;  %v3923_v2 = vadd.f32 %v9574_v60, %v9675_v40 }
 0x29d   : > { %v9786_v44 = vrot.slane %v4297_v34, 7  ;;  %v4021_v37 = vsel %vm3957_vm4, %v3925_v30, %v3989_v22  ;;  %v5317_v54 = vshll.u32 %v8149_v52, 16  ;;  %v5519_v34 = vrot.slane %v9752_v11, 1  ;;  %v4530_v22 = vld [vmem:[#allocation3 + $0x98] sm:$0x1]  ;;  %v9807_v11 = vld [vmem:[#allocation3 + $0x48] sm:$0xff]  }
 0x29e   : > { %v4319_v5 = vor.u32 %v4317_v6, %v4316_v7  ;;  %v4320_v58 = vrot.slane %v4316_v7, 4  ;;  %v7518_v9 = vpack.c.bf16 %v4021_v37, %v4021_v37  ;;  %v5314_v45 = vrot.slane %v5312_v50, 1 }
 0x29f   : > { %v4302_v3 = vor.u32 %v4300_v19, %v9786_v44  ;;  %v4303_v35 = vrot.slane %v9786_v44, 4  ;;  %v5319_v47 = vrot.slane %v5317_v54, 1  ;;  %vm3955_vm11 = vcmp.ge.f32.partialorder %v3923_v2, 0.0  ;;  %v9840_v44 = vld [vmem:[#allocation2 + $0xbc] sm:$0x1] }
 0x2a0   : > { %v4527_v55 = vsel %vm9596_vm6, %v4319_v5, %v4526_v8  ;;  %v4322_v27 = vshrl.u32 %v7518_v9, 16  ;;  %v4325_v36 = vshll.u32 %v7518_v9, 16  ;;  %v5315_v30 = vor.u32 %v5314_v45, %v5310_v62 }
 0x2a1   : > { %4528 = vst [vmem:[#allocation3 + $0x90] sm:$0xf] %v4527_v55  ;;  %v4520_v40 = vsel %vm9596_vm6, %v4302_v3, %v4519_v46  ;;  %v3987_v12 = vmul.f32 0.2, %v3923_v2  ;;  %v5518_v6 = vrot.slane %v9743_v16, 1  ;;  %v5515_v13 = vrot.slane %v9765_v33, 1 }
 0x2a2   : > { %4521 = vst [vmem:[#allocation3 + $0x84] sm:$0xf] %v4520_v40  ;;  %v4324_v19 = vrot.slane %v4322_v27, 7  ;;  %v5320_v38 = vsel %vm1140_vm10, %v5315_v30, %v5319_v47  ;;  %v5516_v7 = vrot.slane %v8149_v52, 1  ;;  %v3928_v8 = vadd.f32 %v9692_v51, %v9574_v60  ;;  %v4523_v47 = vld [vmem:[#allocation3 + $0x8c] sm:$0x1] }
 0x2a3   : > { %5481 = vrot.lane.b32.xlu0 %v5320_v38, %s8344_s27  ;;  %v4019_v62 = vsel %vm3955_vm11, %v3923_v2, %v3987_v12  ;;  %v5520_v50 = vsel %vm1365_vm9, %v5518_v6, %v5519_v34  ;;  %v3926_v16 = vadd.f32 %v9574_v60, %v9701_v18  ;;  %v9809_v46 = vld [vmem:[#allocation3 + $0x50] ss:$0 sps:$4 sm:$0x11]   ;;  %v9813_v2 = vld [vmem:[#allocation3 + $0x3c] sm:$0xff]   ;;  %v5348_v30 = vshll.u32 %v9807_v11, 16 }
 0x2a4   : > { %v4327_v37 = vor.u32 %v4325_v36, %v4324_v19  ;;  %v4329_v54 = vrot.slane %v4324_v19, 4  ;;  %v7516_v33 = vpack.c.bf16 %v4019_v62, %v4019_v62  ;;  %5563 = vrot.lane.b32.xlu1 %v5520_v50, %s8346_s17  ;;  %v5517_v52 = vsel %vm1365_vm9, %v5515_v13, %v5516_v7 }
 0x2a5   : > { %vm3960_vm3 = vcmp.ge.f32.partialorder %v3928_v8, 0.0  ;;  %v3992_v5 = vmul.f32 0.2, %v3928_v8  ;;  %vm3958_vm12 = vcmp.ge.f32.partialorder %v3926_v16, 0.0  ;;  %v3990_v51 = vmul.f32 0.2, %v3926_v16 }
 0x2a6   : > { %v4328_v18 = vsel %vm8436_vm7, %v4320_v58, %v4327_v37  ;;  %v4531_v9 = vsel %vm9456_vm8, %v4329_v54, %v4530_v22  ;;  %v4305_v45 = vshrl.u32 %v7516_v33, 16  ;;  %v4308_v3 = vshll.u32 %v7516_v33, 16 }
 0x2a7   : > { %4529 = vst.msk [vmem:[#allocation3 + $0x94] sm:$0xf] %vm375_vm2, %v4328_v18  ;;  %4532 = vst [vmem:[#allocation3 + $0x98] sm:$0x1] %v4531_v9  ;;  %5561 = vrot.lane.b32.xlu0 %v5517_v52, %s8346_s17  ;;  %v4024_v55 = vsel %vm3960_vm3, %v3928_v8, %v3992_v5  ;;  %v4022_v27 = vsel %vm3958_vm12, %v3926_v16, %v3990_v51  ;;  %v5346_v36 = vshrl.u32 %v9807_v11, 16  ;;  %v5353_v6 = vshll.u32 %v9809_v46, 16 }
 0x2a8   : > { %v4307_v40 = vrot.slane %v4305_v45, 7  ;;  %v7521_v12 = vpack.c.bf16 %v4024_v55, %v4024_v55  ;;  %v7519_v58 = vpack.c.bf16 %v4022_v27, %v4022_v27  ;;  %v5350_v34 = vrot.slane %v5348_v30, 1  ;;  %v8153_v8 = vld [vmem:[#allocation3 + $0x44] ss:$0 sps:$4 sm:$0x11]  }
 0x2a9   : > { %v3929_v19 = vadd.f32 %v9705_v43, %v9574_v60  ;;  %v5334_v22 = vshrl.u32 %v9813_v2, 16  ;;  %v5336_v38 = vshll.u32 %v9813_v2, 16  ;;  %v4540_v16 = vld [vmem:[#allocation3 + $0xa8] sm:$0xf]  ;;  %v5355_v52 = vrot.slane %v5353_v6, 1 }
 0x2aa   : > { %v4310_v13 = vor.u32 %v4308_v3, %v4307_v40  ;;  %v4312_v7 = vrot.slane %v4307_v40, 4  ;;  %v4348_v62 = vshrl.u32 %v7521_v12, 16  ;;  %v4351_v50 = vshll.u32 %v7521_v12, 16  ;;  %v4533_v18 = vld [vmem:[#allocation3 + $0x9c] sm:$0xf] }
 0x2ab   : > { %v4331_v37 = vshrl.u32 %v7519_v58, 16  ;;  %v4334_v54 = vshll.u32 %v7519_v58, 16  ;;  %v5351_v33 = vor.u32 %v5350_v34, %v5346_v36  ;;  %vm3961_vm15 = vcmp.ge.f32.partialorder %v3929_v19, 0.0  ;;  %v9848_v27 = vld [vmem:[%s10885_s2] ss:$0 sm:$0xff] }
 0x2ac   : > { %v4311_v5 = vsel %vm8436_vm7, %v4303_v35, %v4310_v13  ;;  %v4524_v60 = vsel %vm9456_vm8, %v4312_v7, %v4523_v47  ;;  %v9834_v43 = vrot.slane %v4348_v62, 7  ;;  %v3993_v45 = vmul.f32 0.2, %v3929_v19  ;;  %v9857_v13 = vld [vmem:[#allocation3 + $0x60] sm:$0xff]  }
 0x2ad   : > { %4522 = vst.msk [vmem:[#allocation3 + $0x88] sm:$0xf] %vm375_vm2, %v4311_v5  ;;  %4525 = vst [vmem:[#allocation3 + $0x8c] sm:$0x1] %v4524_v60  ;;  %v9837_v51 = vrot.slane %v4331_v37, 7  ;;  %v5356_v9 = vsel %vm1140_vm10, %v5351_v33, %v5355_v52  ;;  %v5338_v3 = vrot.slane %v5336_v38, 1  ;;  %v3927_v36 = vadd.f32 %v9848_v27, %v9713_v23 }
 0x2ae   : > { %v2824_v35 = vshll.u32 %v9840_v44, 16  ;;  %v4353_v55 = vor.u32 %v4351_v50, %v9834_v43  ;;  %5487 = vrot.lane.b32.xlu1 %v5356_v9, %s8344_s27  ;;  %v5341_v47 = vshll.u32 %v8153_v8, 16  ;;  %v4354_v30 = vrot.slane %v9834_v43, 4  ;;  %v9869_v60 = vld [vmem:[#allocation3 + $0x68] ss:$0 sps:$4 sm:$0x11]  }
 0x2af   : > { %v4336_v40 = vor.u32 %v4334_v54, %v9837_v51  ;;  %v4025_v12 = vsel %vm3961_vm15, %v3929_v19, %v3993_v45  ;;  %v5339_v58 = vor.u32 %v5338_v3, %v5334_v22  ;;  %vm3959_vm5 = vcmp.ge.f32.partialorder %v3927_v36, 0.0 }
 0x2b0   : > { %v4541_v6 = vsel %vm9596_vm6, %v4353_v55, %v4540_v16  ;;  %v7522_v34 = vpack.c.bf16 %v4025_v12, %v4025_v12  ;;  %v5343_v38 = vrot.slane %v5341_v47, 1  ;;  %v3991_v23 = vmul.f32 0.2, %v3927_v36 }
 0x2b1   : > { %4542 = vst [vmem:[#allocation3 + $0xa8] sm:$0xf] %v4541_v6  ;;  %v4534_v7 = vsel %vm9596_vm6, %v4336_v40, %v4533_v18  ;;  %v5524_v62 = vrot.slane %v9807_v11, 1  ;;  %v5525_v50 = vrot.slane %v9809_v46, 1  ;;  %v5521_v16 = vrot.slane %v9813_v2, 1 }
 0x2b2   : > { %4535 = vst [vmem:[#allocation3 + $0x9c] sm:$0xf] %v4534_v7  ;;  %v4356_v19 = vshrl.u32 %v7522_v34, 16  ;;  %v4359_v22 = vshll.u32 %v7522_v34, 16  ;;  %v5344_v37 = vsel %vm1140_vm10, %v5339_v58, %v5343_v38  ;;  %v4023_v54 = vsel %vm3959_vm5, %v3927_v36, %v3991_v23  ;;  %v4544_v18 = vld [vmem:[#allocation3 + $0xb0] sm:$0x1] }
 0x2b3   : > { %5485 = vrot.lane.b32.xlu0 %v5344_v37, %s8344_s27  ;;  %v5526_v33 = vsel %vm1365_vm9, %v5524_v62, %v5525_v50  ;;  %v5522_v52 = vrot.slane %v8153_v8, 1  ;;  %v3932_v5 = vadd.f32 %v9848_v27, %v9729_v56  ;;  %v7520_v46 = vpack.c.bf16 %v4023_v54, %v4023_v54  ;;  %v4537_v36 = vld [vmem:[#allocation3 + $0xa4] sm:$0x1]  ;;  %v9889_v54 = vld [vmem:[#allocation3 + $0x54] sm:$0xff]  }
 0x2b4   : > { %v4358_v11 = vrot.slane %v4356_v19, 7  ;;  %5567 = vrot.lane.b32.xlu1 %v5526_v33, %s8346_s17  ;;  %v3930_v43 = vadd.f32 %v9848_v27, %v9732_v42  ;;  %v5370_v2 = vshrl.u32 %v9857_v13, 16  ;;  %v5372_v8 = vshll.u32 %v9857_v13, 16  ;;  %v9886_v19 = vld [vmem:[#allocation3 + $0x5c] ss:$0 sps:$4 sm:$0x11]  }
 0x2b5   : > { %v5523_v9 = vsel %vm1365_vm9, %v5521_v16, %v5522_v52  ;;  %vm3964_vm4 = vcmp.ge.f32.partialorder %v3932_v5, 0.0  ;;  %v3996_v45 = vmul.f32 0.2, %v3932_v5  ;;  %v4339_v55 = vshrl.u32 %v7520_v46, 16 }
 0x2b6   : > { %v4361_v3 = vor.u32 %v4359_v22, %v4358_v11  ;;  %v4363_v56 = vrot.slane %v4358_v11, 4  ;;  %v4342_v47 = vshll.u32 %v7520_v46, 16  ;;  %vm3962_vm11 = vcmp.ge.f32.partialorder %v3930_v43, 0.0 }
 0x2b7   : > { %5565 = vrot.lane.b32.xlu0 %v5523_v9, %s8346_s17  ;;  %v4028_v40 = vsel %vm3964_vm4, %v3932_v5, %v3996_v45  ;;  %v3994_v12 = vmul.f32 0.2, %v3930_v43  ;;  %v5374_v42 = vrot.slane %v5372_v8, 1  ;;  %v4341_v34 = vrot.slane %v4339_v55, 7 }
 0x2b8   : > { %v4362_v58 = vsel %vm8436_vm7, %v4354_v30, %v4361_v3  ;;  %v4545_v6 = vsel %vm9456_vm8, %v4363_v56, %v4544_v18  ;;  %v7525_v38 = vpack.c.bf16 %v4028_v40, %v4028_v40  ;;  %v5377_v62 = vshll.u32 %v9869_v60, 16  ;;  %v4547_v3 = vld [vmem:[#allocation3 + $0xb4] sm:$0xf] }
 0x2b9   : > { %4543 = vst.msk [vmem:[#allocation3 + $0xac] sm:$0xf] %vm375_vm2, %v4362_v58  ;;  %4546 = vst [vmem:[#allocation3 + $0xb0] sm:$0x1] %v4545_v6  ;;  %v4026_v7 = vsel %vm3962_vm11, %v3930_v43, %v3994_v12  ;;  %v5375_v23 = vor.u32 %v5374_v42, %v5370_v2  ;;  %v3933_v50 = vadd.f32 %v9848_v27, %v9740_v48  ;;  %v4337_v22 = vrot.slane %v9837_v51, 4 }
 0x2ba   : > { %v4344_v30 = vor.u32 %v4342_v47, %v4341_v34  ;;  %v4346_v37 = vrot.slane %v4341_v34, 4  ;;  %v4382_v16 = vshrl.u32 %v7525_v38, 16  ;;  %v7523_v33 = vpack.c.bf16 %v4026_v7, %v4026_v7  ;;  %v4554_v2 = vld [vmem:[#allocation3 + $0xc0] sm:$0xf]  ;;  %v9912_v34 = vld [vmem:[#allocation3 + $0x78] sm:$0xff]  }
 0x2bb   : > { %v5379_v52 = vrot.slane %v5377_v62, 1  ;;  %vm3965_vm3 = vcmp.ge.f32.partialorder %v3933_v50, 0.0  ;;  %v3997_v5 = vmul.f32 0.2, %v3933_v50  ;;  %v4385_v43 = vshll.u32 %v7525_v38, 16 }
 0x2bc   : > { %v4345_v11 = vsel %vm8436_vm7, %v4337_v22, %v4344_v30  ;;  %v4538_v46 = vsel %vm9456_vm8, %v4346_v37, %v4537_v36  ;;  %v4384_v48 = vrot.slane %v4382_v16, 7  ;;  %v9897_v51 = vrot.slane %v2824_v35, 5  ;;  %v9914_v38 = vld [vmem:[#allocation3 + $0x80] ss:$0 sps:$4 sm:$0x11]   ;;  %v9917_v22 = vld [vmem:[#allocation3 + $0x6c] sm:$0xff]  }
 0x2bd   : > { %4536 = vst.msk [vmem:[#allocation3 + $0xa0] sm:$0xf] %vm375_vm2, %v4345_v11  ;;  %4539 = vst [vmem:[#allocation3 + $0xa4] sm:$0x1] %v4538_v46  ;;  %v4365_v18 = vshrl.u32 %v7523_v33, 16  ;;  %v5380_v9 = vsel %vm1140_vm10, %v5375_v23, %v5379_v52  ;;  %v4029_v45 = vsel %vm3965_vm3, %v3933_v50, %v3997_v5  ;;  %v5358_v55 = vshrl.u32 %v9889_v54, 16 }
 0x2be   : > { %v4387_v8 = vor.u32 %v4385_v43, %v4384_v48  ;;  %5491 = vrot.lane.b32.xlu1 %v5380_v9, %s8344_s27  ;;  %v7526_v56 = vpack.c.bf16 %v4029_v45, %v4029_v45  ;;  %v5360_v47 = vshll.u32 %v9889_v54, 16  ;;  %v4368_v35 = vshll.u32 %v7523_v33, 16  ;;  %v4558_v62 = vld [vmem:[#allocation3 + $0xc8] sm:$0x1] }
 0x2bf   : > { %v9904_v44 = vrot.slane %v4365_v18, 7  ;;  %v5365_v36 = vshll.u32 %v9886_v19, 16  ;;  %v3931_v40 = vadd.f32 %v9848_v27, %v9745_v59  ;;  %v5530_v6 = vrot.slane %v9857_v13, 1  ;;  %v8161_v5 = vld [vmem:[#allocation3 + $0x74] ss:$0 sps:$4 sm:$0x11]  }
 0x2c0   : > { %v4555_v12 = vsel %vm9596_vm6, %v4387_v8, %v4554_v2  ;;  %v4390_v42 = vshrl.u32 %v7526_v56, 16  ;;  %v5362_v58 = vrot.slane %v5360_v47, 1  ;;  %v4393_v23 = vshll.u32 %v7526_v56, 16  ;;  %v9936_v8 = vld [vmem:[#allocation3 + $0x90] sm:$0xff]  }
 0x2c1   : > { %4556 = vst [vmem:[#allocation3 + $0xc0] sm:$0xf] %v4555_v12  ;;  %v4370_v7 = vor.u32 %v4368_v35, %v9904_v44  ;;  %v5367_v50 = vrot.slane %v5365_v36, 1  ;;  %vm3963_vm12 = vcmp.ge.f32.partialorder %v3931_v40, 0.0  ;;  %v3995_v30 = vmul.f32 0.2, %v3931_v40 }
 0x2c2   : > { %v4392_v59 = vrot.slane %v4390_v42, 7  ;;  %v5363_v27 = vor.u32 %v5362_v58, %v5358_v55  ;;  %v5531_v37 = vrot.slane %v9869_v60, 1  ;;  %v4388_v16 = vrot.slane %v4384_v48, 4  ;;  %v9943_v36 = vld [vmem:[#allocation3 + $0x84] sm:$0xff]  }
 0x2c3   : > { %v4548_v13 = vsel %vm9596_vm6, %v4370_v7, %v4547_v3  ;;  %v5527_v33 = vrot.slane %v9889_v54, 1  ;;  %v5528_v52 = vrot.slane %v9886_v19, 1  ;;  %v4027_v2 = vsel %vm3963_vm12, %v3931_v40, %v3995_v30  ;;  %v9938_v3 = vld [vmem:[#allocation3 + $0x98] ss:$0 sps:$4 sm:$0x11]  }
 0x2c4   : > { %4549 = vst [vmem:[#allocation3 + $0xb4] sm:$0xf] %v4548_v13  ;;  %v4395_v11 = vor.u32 %v4393_v23, %v4392_v59  ;;  %v4397_v46 = vrot.slane %v4392_v59, 4  ;;  %v5368_v43 = vsel %vm1140_vm10, %v5363_v27, %v5367_v50  ;;  %v7524_v18 = vpack.c.bf16 %v4027_v2, %v4027_v2  ;;  %v9948_v50 = vld [vmem:[#allocation3 + $0x8c] ss:$0 sps:$4 sm:$0x11]  }
 0x2c5   : > { %5489 = vrot.lane.b32.xlu0 %v5368_v43, %s8344_s27  ;;  %v5532_v60 = vsel %vm1365_vm9, %v5530_v6, %v5531_v37  ;;  %v5394_v48 = vshrl.u32 %v9912_v34, 16  ;;  %v5396_v61 = vshll.u32 %v9912_v34, 16  ;;  %v5529_v9 = vsel %vm1365_vm9, %v5527_v33, %v5528_v52  ;;  %v4551_v27 = vld [vmem:[#allocation3 + $0xbc] sm:$0x1]  ;;  %v9960_v2 = vld [vmem:[#allocation3 + $0xa8] sm:$0xff]  }
 0x2c6   : > { %v4396_v54 = vsel %vm8436_vm7, %v4388_v16, %v4395_v11  ;;  %v4559_v19 = vsel %vm9456_vm8, %v4397_v46, %v4558_v62  ;;  %5571 = vrot.lane.b32.xlu1 %v5532_v60, %s8346_s17  ;;  %v5401_v45 = vshll.u32 %v9914_v38, 16  ;;  %v4373_v56 = vshrl.u32 %v7524_v18, 16  ;;  %v9953_v52 = vld [vmem:[#allocation3 + $0xb0] ss:$0 sps:$4 sm:$0x11]  }
 0x2c7   : > { %4557 = vst.msk [vmem:[#allocation3 + $0xc4] sm:$0xf] %vm375_vm2, %v4396_v54  ;;  %4560 = vst [vmem:[#allocation3 + $0xc8] sm:$0x1] %v4559_v19  ;;  %v5398_v55 = vrot.slane %v5396_v61, 1  ;;  %v5382_v47 = vshrl.u32 %v9917_v22, 16 }
 0x2c8   : > { %v5384_v35 = vshll.u32 %v9917_v22, 16  ;;  %v4376_v40 = vshll.u32 %v7524_v18, 16  ;;  %v5389_v12 = vshll.u32 %v8161_v5, 16  ;;  %v5536_v42 = vrot.slane %v9912_v34, 1 }
 0x2c9   : > { %v5537_v58 = vrot.slane %v9914_v38, 1  ;;  %v4375_v6 = vrot.slane %v4373_v56, 7  ;;  %5569 = vrot.lane.b32.xlu0 %v5529_v9, %s8346_s17  ;;  %v5399_v7 = vor.u32 %v5398_v55, %v5394_v48  ;;  %v5403_v23 = vrot.slane %v5401_v45, 1  ;;  %v8169_v48 = vld [vmem:[#allocation3 + $0xa4] ss:$0 sps:$4 sm:$0x11]  }
 0x2ca   : > { %v5386_v62 = vrot.slane %v5384_v35, 1  ;;  %v4371_v59 = vrot.slane %v9904_v44, 4  ;;  %v5391_v30 = vrot.slane %v5389_v12, 1  ;;  %v5533_v37 = vrot.slane %v9917_v22, 1  ;;  %v8168_v9 = vld [vmem:[#allocation3 + $0x9c] sm:$0xff]  }
 0x2cb   : > { %v5534_v16 = vrot.slane %v8161_v5, 1  ;;  %v4378_v13 = vor.u32 %v4376_v40, %v4375_v6  ;;  %v4380_v33 = vrot.slane %v4375_v6, 4  ;;  %v5404_v34 = vsel %vm1140_vm10, %v5399_v7, %v5403_v23 }
 0x2cc   : > { %v5387_v38 = vor.u32 %v5386_v62, %v5382_v47  ;;  %5495 = vrot.lane.b32.xlu1 %v5404_v34, %s8344_s27  ;;  %v5538_v11 = vsel %vm1365_vm9, %v5536_v42, %v5537_v58  ;;  %v5418_v46 = vshrl.u32 %v9936_v8, 16  ;;  %v5420_v44 = vshll.u32 %v9936_v8, 16 }
 0x2cd   : > { %v5425_v43 = vshll.u32 %v9938_v3, 16  ;;  %v4379_v22 = vsel %vm8436_vm7, %v4371_v59, %v4378_v13  ;;  %v4552_v5 = vsel %vm9456_vm8, %v4380_v33, %v4551_v27  ;;  %v5408_v60 = vshll.u32 %v9943_v36, 16 }
 0x2ce   : > { %v5392_v18 = vsel %vm1140_vm10, %v5387_v38, %v5391_v30  ;;  %4550 = vst.msk [vmem:[#allocation3 + $0xb8] sm:$0xf] %vm375_vm2, %v4379_v22  ;;  %4553 = vst [vmem:[#allocation3 + $0xbc] sm:$0x1] %v4552_v5  ;;  %v5535_v61 = vsel %vm1365_vm9, %v5533_v37, %v5534_v16  ;;  %v5422_v54 = vrot.slane %v5420_v44, 1  ;;  %v5406_v19 = vshrl.u32 %v9943_v36, 16 }
 0x2cf   : > { %5493 = vrot.lane.b32.xlu0 %v5392_v18, %s8344_s27  ;;  %v5413_v25 = vshll.u32 %v9948_v50, 16  ;;  %v5427_v45 = vrot.slane %v5425_v43, 1  ;;  %v5410_v56 = vrot.slane %v5408_v60, 1  ;;  %v5542_v55 = vrot.slane %v9936_v8, 1  ;;  %v8170_v62 = vld [vmem:[#allocation3 + $0xc0] sm:$0xff]  }
 0x2d0   : > { %v5543_v47 = vrot.slane %v9938_v3, 1  ;;  %5575 = vrot.lane.b32.xlu1 %v5538_v11, %s8346_s17  ;;  %v5423_v35 = vor.u32 %v5422_v54, %v5418_v46  ;;  %v5539_v40 = vrot.slane %v9943_v36, 1  ;;  %v5540_v12 = vrot.slane %v9948_v50, 1  ;;  %v8171_v30 = vld [vmem:[#allocation3 + $0xc8] ss:$0 sps:$4 sm:$0x11]  }
 0x2d1   : > { %v5444_v42 = vshll.u32 %v9960_v2, 16  ;;  %v5411_v58 = vor.u32 %v5410_v56, %v5406_v19  ;;  %v5415_v6 = vrot.slane %v5413_v25, 1  ;;  %v5442_v7 = vshrl.u32 %v9960_v2, 16  ;;  %v9987_v11 = vld [vmem:[#allocation3 + $0xc] sm:$0xff]   ;;  %v386_v19 = vld [vmem:[#allocation3] sm:$0x1] }
 0x2d2   : > { %v5449_v23 = vshll.u32 %v9953_v52, 16  ;;  %v5428_v8 = vsel %vm1140_vm10, %v5423_v35, %v5427_v45  ;;  %v5430_v59 = vshrl.u32 %v8168_v9, 16  ;;  %v5432_v27 = vshll.u32 %v8168_v9, 16  ;;  %v8175_v5 = vld [vmem:[#allocation3 + $0x14] ss:$0 sps:$4 sm:$0x11]  }
 0x2d3   : > { %5573 = vrot.lane.b32.xlu0 %v5535_v61, %s8346_s17  ;;  %v5446_v3 = vrot.slane %v5444_v42, 1  ;;  %v5416_v36 = vsel %vm1140_vm10, %v5411_v58, %v5415_v6  ;;  %v5437_v37 = vshll.u32 %v8169_v48, 16  ;;  %v5548_v16 = vrot.slane %v9960_v2, 1 }
 0x2d4   : > { %v5451_v50 = vrot.slane %v5449_v23, 1  ;;  %5499 = vrot.lane.b32.xlu1 %v5428_v8, %s8344_s27  ;;  %v5434_v33 = vrot.slane %v5432_v27, 1  ;;  %v5549_v34 = vrot.slane %v9953_v52, 1  ;;  %v5545_v38 = vrot.slane %v8168_v9, 1  ;;  %v9999_v8 = vld [vmem:[#allocation3 + $0x18] sm:$0xff]  }
 0x2d5   : > { %v5447_v13 = vor.u32 %v5446_v3, %v5442_v7  ;;  %v5439_v46 = vrot.slane %v5437_v37, 1  ;;  %v5546_v44 = vrot.slane %v8169_v48, 1  ;;  %v5466_v43 = vshrl.u32 %v8170_v62, 16  ;;  %v8172_v54 = vld [vmem:[#allocation3 + $0xb4] sm:$0xff]  }
 0x2d6   : > { %v5468_v22 = vshll.u32 %v8170_v62, 16  ;;  %v5544_v18 = vsel %vm1365_vm9, %v5542_v55, %v5543_v47  ;;  %v5541_v2 = vsel %vm1365_vm9, %v5539_v40, %v5540_v12  ;;  %v5435_v60 = vor.u32 %v5434_v33, %v5430_v59  ;;  %v8173_v9 = vld [vmem:[#allocation3 + $0xbc] ss:$0 sps:$4 sm:$0x11]   ;;  %v441_v40 = vld [vmem:[#allocation3 + $0x8] sm:$0x1] }
 0x2d7   : > { %5497 = vrot.lane.b32.xlu0 %v5416_v36, %s8344_s27  ;;  %v5473_v61 = vshll.u32 %v8171_v30, 16  ;;  %v5452_v52 = vsel %vm1140_vm10, %v5447_v13, %v5451_v50  ;;  %v5554_v45 = vrot.slane %v8170_v62, 1  ;;  %v5555_v56 = vrot.slane %v8171_v30, 1  ;;  %v9997_v12 = vld [vmem:[#allocation3 + $0x24] sm:$0xff]  }
 0x2d8   : > { %v5470_v25 = vrot.slane %v5468_v22, 1  ;;  %5579 = vrot.lane.b32.xlu1 %v5544_v18, %s8346_s17  ;;  %v5440_v48 = vsel %vm1140_vm10, %v5435_v60, %v5439_v46  ;;  %v5550_v35 = vsel %vm1365_vm9, %v5548_v16, %v5549_v34  ;;  %v5547_v55 = vsel %vm1365_vm9, %v5545_v38, %v5546_v44  ;;  %v8179_v23 = vld [vmem:[#allocation3 + $0x2c] ss:$0 sps:$4 sm:$0x11]  }
 0x2d9   : > { %v5456_v47 = vshll.u32 %v8172_v54, 16  ;;  %v5475_v58 = vrot.slane %v5473_v61, 1  ;;  %v5461_v6 = vshll.u32 %v8173_v9, 16  ;;  %v5551_v7 = vrot.slane %v8172_v54, 1 }
 0x2da   : > { %v5471_v42 = vor.u32 %v5470_v25, %v5466_v43  ;;  %v5454_v62 = vshrl.u32 %v8172_v54, 16  ;;  %v5552_v59 = vrot.slane %v8173_v9, 1  ;;  %v4752_v27 = vshll.u32 %v9987_v11, 16  ;;  %v8181_v16 = vld [vmem:[#allocation3 + $0x20] ss:$0 sps:$4 sm:$0x11]  }
 0x2db   : > { %5577 = vrot.lane.b32.xlu0 %v5541_v2, %s8346_s17  ;;  %v5458_v3 = vrot.slane %v5456_v47, 1  ;;  %v10004_v30 = vsel %vm1365_vm9, %v5554_v45, %v5555_v56  ;;  %v4750_v36 = vshrl.u32 %v9987_v11, 16  ;;  %v4757_v50 = vshll.u32 %v8175_v5, 16  ;;  %v10017_v18 = vld [vmem:[#allocation3 + $0x44] ss:$0 sps:$4 sm:$0x11]  }
 0x2dc   : > { %v387_v37 = vsel %vm9456_vm8, 0, %v386_v19  ;;  %5503 = vrot.lane.b32.xlu1 %v5452_v52, %s8344_s27  ;;  %v5476_v13 = vsel %vm1140_vm10, %v5471_v42, %v5475_v58  ;;  %v4754_v34 = vrot.slane %v4752_v27, 1  ;;  %v442_v38 = vsel %vm9475_vm1, 0, %v441_v40  ;;  %v10022_v19 = vld [vmem:[#allocation3 + $0x3c] sm:$0xff]  }
 0x2dd   : > { %v5459_v33 = vor.u32 %v5458_v3, %v5454_v62  ;;  %388 = vst [vmem:[#allocation3] sm:$0x1] %v387_v37  ;;  %v5463_v46 = vrot.slane %v5461_v6, 1  ;;  %v10014_v44 = vsel %vm1365_vm9, %v5551_v7, %v5552_v59  ;;  %443 = vst [vmem:[#allocation3 + $0x8] sm:$0x1] %v442_v38  ;;  %v4964_v43 = vrot.slane %v9987_v11, 1 }
 0x2de   : > { %v4965_v22 = vrot.slane %v8175_v5, 1  ;;  %v4759_v2 = vrot.slane %v4757_v50, 1  ;;  %v4774_v60 = vshrl.u32 %v9997_v12, 16  ;;  %v4776_v61 = vshll.u32 %v9997_v12, 16  ;;  %v10026_v11 = vld [vmem:[#allocation3 + $0x30] sm:$0xff]  }
 0x2df   : > { %5501 = vrot.lane.b32.xlu0 %v5440_v48, %s8344_s27  ;;  %v4781_v54 = vshll.u32 %v8179_v23, 16  ;;  %v5464_v52 = vsel %vm1140_vm10, %v5459_v33, %v5463_v46  ;;  %v4755_v25 = vor.u32 %v4754_v34, %v4750_v36  ;;  %v4764_v9 = vshll.u32 %v9999_v8, 16  ;;  %v8185_v59 = vld [vmem:[#allocation3 + $0x38] ss:$0 sps:$4 sm:$0x11]  }
 0x2e0   : > { %v4769_v45 = vshll.u32 %v8181_v16, 16  ;;  %5583 = vrot.lane.b32.xlu1 %v5550_v35, %s8346_s17  ;;  %v10030_v5 = vsel %vm1365_vm9, %v4964_v43, %v4965_v22  ;;  %v4778_v56 = vrot.slane %v4776_v61, 1  ;;  %v4762_v48 = vshrl.u32 %v9999_v8, 16 }
 0x2e1   : > { %v4970_v47 = vrot.slane %v9997_v12, 1  ;;  %v4783_v40 = vrot.slane %v4781_v54, 1  ;;  %v4766_v42 = vrot.slane %v4764_v9, 1  ;;  %v4971_v58 = vrot.slane %v8179_v23, 1 }
 0x2e2   : > { %v4967_v6 = vrot.slane %v9999_v8, 1  ;;  %v4779_v7 = vor.u32 %v4778_v56, %v4774_v60  ;;  %v4771_v62 = vrot.slane %v4769_v45, 1  ;;  %v4968_v3 = vrot.slane %v8181_v16, 1 }
 0x2e3   : > { %5581 = vrot.lane.b32.xlu0 %v5547_v55, %s8346_s17  ;;  %v4800_v35 = vshll.u32 %v10022_v19, 16  ;;  %v4767_v36 = vor.u32 %v4766_v42, %v4762_v48  ;;  %v4798_v50 = vshrl.u32 %v10022_v19, 16  ;;  %v4805_v37 = vshll.u32 %v10017_v18, 16 }
 0x2e4   : > { %v8176_v27 = vld [vmem:[#allocation3] sm:$0xff]   ;;  %v4786_v12 = vshrl.u32 %v10026_v11, 16  ;;  %5507 = vrot.lane.b32.xlu1 %v5476_v13, %s8344_s27  ;;  %v4760_v23 = vsel %vm1140_vm10, %v4755_v25, %v4759_v2  ;;  %v8177_v8 = vld [vmem:[#allocation3 + $0x8] ss:$0 sps:$4 sm:$0x11]   ;;  %v10043_v55 = vsel %vm1140_vm10, %v4779_v7, %v4783_v40  ;;  %v10046_v16 = vsel %vm1365_vm9, %v4970_v47, %v4971_v58 }
 0x2e5   : > { %v4802_v33 = vrot.slane %v4800_v35, 1  ;;  %v4738_v34 = vshrl.u32 %v8176_v27, 16  ;;  %v4740_v38 = vshll.u32 %v8176_v27, 16  ;;  %v4961_v46 = vrot.slane %v8176_v27, 1  ;;  %v10067_v35 = vld [vmem:[#allocation3 + $0x54] sm:$0xff]  }
 0x2e6   : > { %v10049_v43 = vsel %vm1365_vm9, %v4967_v6, %v4968_v3  ;;  %v4745_v22 = vshll.u32 %v8177_v8, 16  ;;  %v4962_v13 = vrot.slane %v8177_v8, 1  ;;  %v10053_v2 = vsel %vm1140_vm10, %v4767_v36, %v4771_v62  ;;  %v8290_v27 = vld [vmem:[#allocation2 + $0x70] sm:$0xf]  ;;  %v8291_v8 = vld [vmem:[#allocation2 + $0x74] sm:$0x1] }
 0x2e7   : > { %5505 = vrot.lane.b32.xlu0 %v5464_v52, %s8344_s27  ;;  %v4803_v60 = vor.u32 %v4802_v33, %v4798_v50  ;;  %v4742_v61 = vrot.slane %v4740_v38, 1  ;;  %v4807_v54 = vrot.slane %v4805_v37, 1  ;;  %v4788_v25 = vshll.u32 %v10026_v11, 16  ;;  %v8187_v33 = vld [vmem:[#allocation3 + $0x5c] ss:$0 sps:$4 sm:$0x11]  }
 0x2e8   : > { %v4793_v9 = vshll.u32 %v8185_v59, 16  ;;  %5587 = vrot.lane.b32.xlu1 %v10004_v30, %s8346_s17  ;;  %v4747_v45 = vrot.slane %v4745_v22, 1  ;;  %v4963_v56 = vsel %vm1365_vm9, %v4961_v46, %v4962_v13  ;;  %v4976_v48 = vrot.slane %v10022_v19, 1  ;;  %v8289_v30 = vld [vmem:[#allocation2 + $0x6c] sm:$0xf] }
 0x2e9   : > { %v4977_v52 = vrot.slane %v10017_v18, 1  ;;  %v4743_v47 = vor.u32 %v4742_v61, %v4738_v34  ;;  %v10062_v40 = vsel %vm1140_vm10, %v4803_v60, %v4807_v54  ;;  %v4790_v42 = vrot.slane %v4788_v25, 1  ;;  %v8292_v22 = vld [vmem:[#allocation2 + $0x78] sm:$0xf]  ;;  %v8293_v61 = vld [vmem:[#allocation2 + $0x7c] sm:$0xf] }
 0x2ea   : > { %v4973_v58 = vrot.slane %v10026_v11, 1  ;;  %v4795_v6 = vrot.slane %v4793_v9, 1  ;;  %v4974_v7 = vrot.slane %v8185_v59, 1  ;;  %v2661_v62 = vshrl.u32 %v8289_v30, 16  ;;  %v10081_v25 = vld [vmem:[#allocation3 + $0x48] sm:$0xff]  }
 0x2eb   : > { %5585 = vrot.lane.b32.xlu0 %v10014_v44, %s8346_s17  ;;  %v2664_v3 = vshll.u32 %v8289_v30, 16  ;;  %v4748_v19 = vsel %vm1140_vm10, %v4743_v47, %v4747_v45  ;;  %v4791_v18 = vor.u32 %v4790_v42, %v4786_v12  ;;  %v2670_v36 = vshll.u32 %v8290_v27, 16  ;;  %v10083_v47 = vld [vmem:[#allocation3 + $0x50] ss:$0 sps:$4 sm:$0x11]  }
 0x2ec   : > { %v2674_v50 = vshrl.u32 %v8290_v27, 16  ;;  %4931 = vrot.lane.b32.xlu1 %v4760_v23, %s8344_s27  ;;  %v10072_v11 = vsel %vm1365_vm9, %v4976_v48, %v4977_v52  ;;  %v2663_v37 = vrot.slane %v2661_v62, 4  ;;  %v2680_v59 = vshll.u32 %v8291_v8, 16 }
 0x2ed   : > { %v2666_v44 = vrot.slane %v2664_v3, 5  ;;  %v10075_v34 = vsel %vm1365_vm9, %v4973_v58, %v4974_v7  ;;  %v2672_v38 = vrot.slane %v2670_v36, 5  ;;  %v2685_v12 = vshrl.u32 %v8292_v22, 16 }
 0x2ee   : > { %v2676_v46 = vrot.slane %v2674_v50, 4  ;;  %v10079_v13 = vsel %vm1140_vm10, %v4791_v18, %v4795_v6  ;;  %v2688_v60 = vshll.u32 %v8292_v22, 16  ;;  %v2694_v54 = vshll.u32 %v8293_v61, 16 }
 0x2ef   : > { %4929 = vrot.lane.b32.xlu0 %v4748_v19, %s8344_s27  ;;  %v2667_v23 = vor.u32 %v2666_v44, %v2663_v37  ;;  %v2682_v45 = vrot.slane %v2680_v59, 5  ;;  %v2687_v48 = vrot.slane %v2685_v12, 4  ;;  %v2698_v52 = vshrl.u32 %v8293_v61, 16 }
 0x2f0   : > { %v2677_v9 = vor.u32 %v2676_v46, %v2672_v38  ;;  %5011 = vrot.lane.b32.xlu1 %v10030_v5, %s8346_s17  ;;  %v2690_v58 = vrot.slane %v2688_v60, 5  ;;  %v2696_v7 = vrot.slane %v2694_v54, 5  ;;  %v4824_v6 = vshll.u32 %v10067_v35, 16 }
 0x2f1   : > { %v2668_v42 = vrot.slane %v2667_v23, 4  ;;  %v2700_v62 = vrot.slane %v2698_v52, 4  ;;  %v4822_v3 = vshrl.u32 %v10067_v35, 16  ;;  %v4829_v19 = vshll.u32 %v8187_v33, 16 }
 0x2f2   : > { %v2678_v30 = vrot.slane %v2677_v9, 4  ;;  %v2691_v27 = vor.u32 %v2690_v58, %v2687_v48  ;;  %v4826_v36 = vrot.slane %v4824_v6, 1  ;;  %v4812_v50 = vshll.u32 %v10081_v25, 16  ;;  %v10118_v6 = vld [vmem:[#allocation3 + $0x6c] sm:$0xff]  }
 0x2f3   : > { %5009 = vrot.lane.b32.xlu0 %v4963_v56, %s8346_s17  ;;  %v2673_v18 = vsel %vm8505_vm13, %v2668_v42, %v2672_v38  ;;  %v2701_v37 = vor.u32 %v2700_v62, %v2696_v7  ;;  %v4810_v44 = vshrl.u32 %v10081_v25, 16  ;;  %v4817_v8 = vshll.u32 %v10083_v47, 16 }
 0x2f4   : > { %v2683_v5 = vsel %vm8505_vm13, %v2678_v30, %v2682_v45  ;;  %4935 = vrot.lane.b32.xlu1 %v10043_v55, %s8344_s27  ;;  %v2692_v56 = vrot.slane %v2691_v27, 4  ;;  %v4827_v46 = vor.u32 %v4826_v36, %v4822_v3  ;;  %v4814_v22 = vrot.slane %v4812_v50, 1  ;;  %v8296_v3 = vld [vmem:[#allocation2 + $0x90] sm:$0xf] }
 0x2f5   : > { %v7226_v59 = vcombine.low %v2673_v18, %v2683_v5  ;;  %v2702_v38 = vrot.slane %v2701_v37, 4  ;;  %v4831_v12 = vrot.slane %v4829_v19, 1  ;;  %v4982_v23 = vrot.slane %v10067_v35, 1  ;;  %v10125_v18 = vld [vmem:[#allocation3 + $0x60] sm:$0xff]   ;;  %v8297_v5 = vld [vmem:[#allocation2 + $0x94] sm:$0xf] }
 0x2f6   : > { %v4983_v60 = vrot.slane %v8187_v33, 1  ;;  %v2697_v61 = vsel %vm8505_vm13, %v2692_v56, %v2696_v7  ;;  %v4815_v54 = vor.u32 %v4814_v22, %v4810_v44  ;;  %v4819_v9 = vrot.slane %v4817_v8, 1  ;;  %v8294_v33 = vld [vmem:[#allocation2 + $0x84] sm:$0xf]  ;;  %v8298_v44 = vld [vmem:[%s10886_s3 + $0xc] sm:$0xff]  }
 0x2f7   : > { %4933 = vrot.lane.b32.xlu0 %v10053_v2, %s8344_s27  ;;  %7735 = vmatprep.mubr.msk.bf16.mxu1 %vm1446_vm14, %v7226_v59  ;;  %v4979_v55 = vrot.slane %v10081_v25, 1  ;;  %v2707_v45 = vsel %vm8505_vm13, %v2702_v38, %v9577_v57  ;;  %v10110_v48 = vsel %vm1140_vm10, %v4827_v46, %v4831_v12  ;;  %v4980_v35 = vrot.slane %v10083_v47, 1  ;;  %v8295_v25 = vld [vmem:[#allocation2 + $0x88] sm:$0xf] }
 0x2f8   : > { %v2709_v2 = vshrl.u32 %v8294_v33, 16  ;;  %5015 = vrot.lane.b32.xlu1 %v10046_v16, %s8346_s17  ;;  %v7227_v52 = vcombine.low %v2697_v61, %v2707_v45  ;;  %v10116_v42 = vsel %vm1365_vm9, %v4982_v23, %v4983_v60  ;;  %v2712_v58 = vshll.u32 %v8294_v33, 16  ;;  %v10120_v57 = vld [vmem:[#allocation3 + $0x74] ss:$0 sps:$4 sm:$0x11]  }
 0x2f9   : > { %v2718_v7 = vshll.u32 %v8295_v25, 16  ;;  %v10123_v30 = vsel %vm1140_vm10, %v4815_v54, %v4819_v9  ;;  %v2722_v62 = vshrl.u32 %v8295_v25, 16  ;;  %v2733_v19 = vshrl.u32 %v8296_v3, 16  ;;  %v10127_v16 = vld [vmem:[#allocation3 + $0x68] ss:$0 sps:$4 sm:$0x11]  }
 0x2fa   : > { %v2711_v47 = vrot.slane %v2709_v2, 4  ;;  %7736 = vmatmul.mubr.msk.bf16.vlgmr.msra.gmra.mrb[0].mxu1 %vm1446_vm14, %v7227_v52  ;;  %v2714_v27 = vrot.slane %v2712_v58, 5  ;;  %v2736_v50 = vshll.u32 %v8296_v3, 16  ;;  %v2742_v37 = vshll.u32 %v8297_v5, 16 }
 0x2fb   : > { %5013 = vrot.lane.b32.xlu0 %v10049_v43, %s8346_s17  ;;  %v2720_v36 = vrot.slane %v2718_v7, 5  ;;  %7786 = vmatpush3.bf16.msra.mxu1 %v8298_v44  ;;  %v10136_v8 = vsel %vm1365_vm9, %v4979_v55, %v4980_v35  ;;  %v2724_v59 = vrot.slane %v2722_v62, 4  ;;  %v2735_v56 = vrot.slane %v2733_v19, 4 }
 0x2fc   : > { %v2746_v46 = vshrl.u32 %v8297_v5, 16  ;;  %4939 = vrot.lane.b32.xlu1 %v10062_v40, %s8344_s27  ;;  %v2715_v43 = vor.u32 %v2714_v27, %v2711_v47  ;;  %v2738_v22 = vrot.slane %v2736_v50, 5  ;;  %v2744_v38 = vrot.slane %v2742_v37, 5 }
 0x2fd   : > { %v4848_v12 = vshll.u32 %v10118_v6, 16  ;;  %v2725_v23 = vor.u32 %v2724_v59, %v2720_v36  ;;  %v4846_v61 = vshrl.u32 %v10118_v6, 16  ;;  %v4853_v54 = vshll.u32 %v10120_v57, 16  ;;  %v8299_v59 = vld [vmem:[#allocation2 + $0x9c] sm:$0xf] }
 0x2fe   : > { %v2748_v60 = vrot.slane %v2746_v46, 4  ;;  %v2716_v9 = vrot.slane %v2715_v43, 4  ;;  %v2739_v55 = vor.u32 %v2738_v22, %v2735_v56  ;;  %v4836_v35 = vshll.u32 %v10125_v18, 16  ;;  %v10170_v43 = vld [vmem:[#allocation3 + $0x84] sm:$0xff]  }
 0x2ff   : > { %4937 = vrot.lane.b32.xlu0 %v10079_v13, %s8344_s27  ;;  %v4850_v45 = vrot.slane %v4848_v12, 1  ;;  %v2726_v40 = vrot.slane %v2725_v23, 4  ;;  %v4834_v2 = vshrl.u32 %v10125_v18, 16  ;;  %v4841_v52 = vshll.u32 %v10127_v16, 16  ;;  %v8301_v23 = vld [vmem:[#allocation2 + $0xa8] sm:$0xf] }
 0x300   : > { %v2749_v33 = vor.u32 %v2748_v60, %v2744_v38  ;;  %5019 = vrot.lane.b32.xlu1 %v10072_v11, %s8346_s17  ;;  %v2721_v58 = vsel %vm8505_vm13, %v2716_v9, %v2720_v36  ;;  %v2740_v25 = vrot.slane %v2739_v55, 4  ;;  %v4838_v13 = vrot.slane %v4836_v35, 1  ;;  %v10174_v12 = vld [vmem:[#allocation3 + $0x8c] ss:$0 sps:$4 sm:$0x11]  }
 0x301   : > { %v4851_v7 = vor.u32 %v4850_v45, %v4846_v61  ;;  %v2731_v47 = vsel %vm8505_vm13, %v2726_v40, %v9583_v17  ;;  %v4855_v3 = vrot.slane %v4853_v54, 1  ;;  %v4988_v19 = vrot.slane %v10118_v6, 1  ;;  %v8302_v55 = vld [vmem:[#allocation2 + $0xac] sm:$0xf]  ;;  %v8197_v40 = vld [vmem:[%s10886_s3 + $0x14] ss:$0 sps:$4 sm:$0xff]  }
 0x302   : > { %v2750_v62 = vrot.slane %v2749_v33, 4  ;;  %v7228_v27 = vcombine.low %v2721_v58, %v2731_v47  ;;  %v2745_v11 = vsel %vm8505_vm13, %v2740_v25, %v2744_v38  ;;  %v4839_v50 = vor.u32 %v4838_v13, %v4834_v2  ;;  %v10185_v58 = vld [vmem:[#allocation3 + $0x78] sm:$0xff]  }
 0x303   : > { %5017 = vrot.lane.b32.xlu0 %v10075_v34, %s8346_s17  ;;  %v4843_v36 = vrot.slane %v4841_v52, 1  ;;  %v4856_v37 = vsel %vm1140_vm10, %v4851_v7, %v4855_v3  ;;  %v4989_v17 = vrot.slane %v10120_v57, 1  ;;  %v4985_v44 = vrot.slane %v10125_v18, 1  ;;  %v8300_v57 = vld [vmem:[#allocation2 + $0xa0] sm:$0xf] }
 0x304   : > { %v2755_v5 = vsel %vm8505_vm13, %v2750_v62, %v9579_v49  ;;  %4943 = vrot.lane.b32.xlu1 %v10110_v48, %s8344_s27  ;;  %7739 = vmatprep.mubr.msk.bf16.mxu1 %vm1446_vm14, %v7228_v27  ;;  %v4986_v6 = vrot.slane %v10127_v16, 1  ;;  %v2757_v56 = vshrl.u32 %v8299_v59, 16  ;;  %v2760_v46 = vshll.u32 %v8299_v59, 16  ;;  %v10188_v62 = vld [vmem:[#allocation3 + $0x80] ss:$0 sps:$4 sm:$0x11]  }
 0x305   : > { %v7229_v34 = vcombine.low %v2745_v11, %v2755_v5  ;;  %v4844_v49 = vsel %vm1140_vm10, %v4839_v50, %v4843_v36  ;;  %v4990_v22 = vsel %vm1365_vm9, %v4988_v19, %v4989_v17  ;;  %v2766_v38 = vshll.u32 %v8300_v57, 16 }
 0x306   : > { %v2770_v18 = vshrl.u32 %v8300_v57, 16  ;;  %v2759_v48 = vrot.slane %v2757_v56, 4  ;;  %v2762_v16 = vrot.slane %v2760_v46, 5  ;;  %v2781_v60 = vshrl.u32 %v8301_v23, 16  ;;  %v10204_v46 = vpop.permute.xlu0 %5477 }
 0x307   : > { %4941 = vrot.lane.b32.xlu0 %v10123_v30, %s8344_s27  ;;  %7740 = vmatmul.mubr.msk.bf16.gmra.mrb[4].mxu1 %vm1446_vm14, %v7229_v34  ;;  %v2784_v61 = vshll.u32 %v8301_v23, 16  ;;  %v2768_v54 = vrot.slane %v2766_v38, 5  ;;  %v2790_v45 = vshll.u32 %v8302_v55, 16  ;;  %v2794_v35 = vshrl.u32 %v8302_v55, 16 }
 0x308   : > { %v2772_v9 = vrot.slane %v2770_v18, 4  ;;  %5023 = vrot.lane.b32.xlu1 %v10116_v42, %s8346_s17  ;;  %v4987_v30 = vsel %vm1365_vm9, %v4985_v44, %v4986_v6  ;;  %v2763_v33 = vor.u32 %v2762_v16, %v2759_v48  ;;  %v2783_v2 = vrot.slane %v2781_v60, 4  ;;  %v10215_v48 = vpop.permute.xlu1 %5479 }
 0x309   : > { %v2786_v52 = vrot.slane %v2784_v61, 5  ;;  %v2792_v7 = vrot.slane %v2790_v45, 5  ;;  %v2796_v13 = vrot.slane %v2794_v35, 4  ;;  %v4872_v47 = vshll.u32 %v10170_v43, 16  ;;  %v8303_v35 = vld [vmem:[#allocation2 + $0xb4] sm:$0xf] }
 0x30a   : > { %v2773_v25 = vor.u32 %v2772_v9, %v2768_v54  ;;  %v2764_v3 = vrot.slane %v2763_v33, 4  ;;  %v4870_v42 = vshrl.u32 %v10170_v43, 16  ;;  %vm5699_vm7 = vcmask 1043456   ;;  %v8304_v33 = vld [vmem:[#allocation2 + $0xb8] sm:$0xf] }
 0x30b   : > { %5021 = vrot.lane.b32.xlu0 %v10136_v8, %s8346_s17  ;;  %v2787_v19 = vor.u32 %v2786_v52, %v2783_v2  ;;  %v2797_v11 = vor.u32 %v2796_v13, %v2792_v7  ;;  %v4874_v50 = vrot.slane %v4872_v47, 1  ;;  %v4877_v36 = vshll.u32 %v10174_v12, 16  ;;  %8028 = vmatprep.subr.msk.bf16.mxu1 %vm5699_vm7, %v8197_v40  ;;  %v10226_v52 = vld [vmem:[#allocation3 + $0x9c] sm:$0xff]  }
 0x30c   : > { %v2774_v27 = vrot.slane %v2773_v25, 4  ;;  %4947 = vrot.lane.b32.xlu1 %v4856_v37, %s8344_s27  ;;  %v2769_v5 = vsel %vm8505_vm13, %v2764_v3, %v2768_v54  ;;  %v4858_v8 = vshrl.u32 %v10185_v58, 16  ;;  %v4860_v44 = vshll.u32 %v10185_v58, 16  ;;  %v10209_v37 = vld [vmem:[%s10886_s3] sm:$0xff]  }
 0x30d   : > { %v2788_v17 = vrot.slane %v2787_v19, 4  ;;  %v2798_v6 = vrot.slane %v2797_v11, 4  ;;  %v4875_v59 = vor.u32 %v4874_v50, %v4870_v42  ;;  %v4865_v56 = vshll.u32 %v10188_v62, 16  ;;  %v10236_v19 = vpop.permute.xlu0 %5557  ;;  %v8306_v11 = vld [vmem:[#allocation2 + $0xc4] sm:$0xf] }
 0x30e   : > { %v2779_v34 = vsel %vm8505_vm13, %v2774_v27, %v9588_v28  ;;  %v4862_v18 = vrot.slane %v4860_v44, 1  ;;  %v5701_v28 = vsel %vm5699_vm7, %v8197_v40, 0  ;;  %v4879_v23 = vrot.slane %v4877_v36, 1  ;;  %v10239_v36 = vld [vmem:[#allocation3 + $0x90] sm:$0xff]  }
 0x30f   : > { %4945 = vrot.lane.b32.xlu0 %v4844_v49, %s8344_s27  ;;  %v7230_v57 = vcombine.low %v2769_v5, %v2779_v34  ;;  %v2793_v38 = vsel %vm8505_vm13, %v2788_v17, %v2792_v7  ;;  %v2803_v16 = vsel %vm8505_vm13, %v2798_v6, %v9586_v39  ;;  %v4867_v60 = vrot.slane %v4865_v56, 1  ;;  %7788 = vmatpush3.bf16.msra.mxu1 %v5701_v28  ;;  %v10233_v7 = vld [vmem:[#allocation3 + $0xa4] ss:$0 sps:$4 sm:$0x11]   ;;  %v10241_v5 = vpop.permute.xlu1 %5559 }
 0x310   : > { %v4994_v61 = vrot.slane %v10170_v43, 1  ;;  %5027 = vrot.lane.b32.xlu1 %v4990_v22, %s8346_s17  ;;  %v7231_v49 = vcombine.low %v2793_v38, %v2803_v16  ;;  %v4863_v54 = vor.u32 %v4862_v18, %v4858_v8  ;;  %v4995_v9 = vrot.slane %v10174_v12, 1  ;;  %7821 = vmatprep.subr.bf16.mxu1 %v10209_v37  ;;  %v10245_v6 = vld [vmem:[#allocation3 + $0x98] ss:$0 sps:$4 sm:$0x11]  }
 0x311   : > { %7743 = vmatprep.mubr.msk.bf16.mxu1 %vm1446_vm14, %v7230_v57  ;;  %v4991_v55 = vrot.slane %v10185_v58, 1  ;;  %v4992_v45 = vrot.slane %v10188_v62, 1  ;;  %v2805_v40 = vshrl.u32 %v8303_v35, 16  ;;  %v2808_v39 = vshll.u32 %v8303_v35, 16  ;;  %v8305_v58 = vld [vmem:[#allocation2 + $0xc0] sm:$0xf] }
 0x312   : > { %v2814_v2 = vshll.u32 %v8304_v33, 16  ;;  %7744 = vmatmul.mubr.msk.bf16.gmra.mrb[8].mxu1 %vm1446_vm14, %v7231_v49  ;;  %v4880_v43 = vsel %vm1140_vm10, %v4875_v59, %v4879_v23  ;;  %v4868_v22 = vsel %vm1140_vm10, %v4863_v54, %v4867_v60  ;;  %v2818_v12 = vshrl.u32 %v8304_v33, 16 }
 0x313   : > { %5025 = vrot.lane.b32.xlu0 %v4987_v30, %s8346_s17  ;;  %v2829_v25 = vshrl.u32 %v8305_v58, 16  ;;  %v4996_v13 = vsel %vm1365_vm9, %v4994_v61, %v4995_v9  ;;  %v2807_v47 = vrot.slane %v2805_v40, 4  ;;  %v2810_v62 = vrot.slane %v2808_v39, 5 }
 0x314   : > { %v2816_v3 = vrot.slane %v2814_v2, 5  ;;  %4951 = vrot.lane.b32.xlu1 %v4880_v43, %s8344_s27  ;;  %v2820_v30 = vrot.slane %v2818_v12, 4  ;;  %v2832_v27 = vshll.u32 %v8305_v58, 16  ;;  %v2838_v50 = vshll.u32 %v8306_v11, 16 }
 0x315   : > { %v2831_v42 = vrot.slane %v2829_v25, 4  ;;  %v4993_v17 = vsel %vm1365_vm9, %v4991_v55, %v4992_v45  ;;  %v2811_v8 = vor.u32 %v2810_v62, %v2807_v47  ;;  %v2842_v44 = vshrl.u32 %v8306_v11, 16  ;;  %v5482_v40 = vpop.permute.xlu0 %5481 }
 0x316   : > { %v4896_v34 = vshll.u32 %v10226_v52, 16  ;;  %v2821_v59 = vor.u32 %v2820_v30, %v2816_v3  ;;  %v2834_v56 = vrot.slane %v2832_v27, 5  ;;  %v2840_v57 = vrot.slane %v2838_v50, 5  ;;  %v10269_v30 = vld [vmem:[#allocation3 + $0xbc] ss:$0 sps:$4 sm:$0x11]  }
 0x317   : > { %4949 = vrot.lane.b32.xlu0 %v4868_v22, %s8344_s27  ;;  %v4901_v38 = vshll.u32 %v10233_v7, 16  ;;  %v2812_v18 = vrot.slane %v2811_v8, 4  ;;  %v2844_v28 = vrot.slane %v2842_v44, 4  ;;  %v4894_v16 = vshrl.u32 %v10226_v52, 16  ;;  %v10260_v22 = vpop.permute.xlu1 %5483  ;;  %v8307_v27 = vld [vmem:[#allocation3 + $0xc] sm:$0xff]  }
 0x318   : > { %v4898_v23 = vrot.slane %v4896_v34, 1  ;;  %5031 = vrot.lane.b32.xlu1 %v4996_v13, %s8346_s17  ;;  %v2822_v60 = vrot.slane %v2821_v59, 4  ;;  %v2835_v61 = vor.u32 %v2834_v56, %v2831_v42  ;;  %v4884_v54 = vshll.u32 %v10239_v36, 16  ;;  %v10279_v8 = vld [vmem:[#allocation3 + $0xa8] sm:$0xff]  }
 0x319   : > { %v4903_v49 = vrot.slane %v4901_v38, 1  ;;  %v2817_v9 = vsel %vm8505_vm13, %v2812_v18, %v2816_v3  ;;  %v2845_v55 = vor.u32 %v2844_v28, %v2840_v57  ;;  %v4889_v35 = vshll.u32 %v10245_v6, 16  ;;  %v10281_v44 = vld [vmem:[#allocation3 + $0xb0] ss:$0 sps:$4 sm:$0x11]   ;;  %v10296_v28 = vld [vmem:[#allocation3 + $0x24] sm:$0xff]  }
 0x31a   : > { %v4899_v45 = vor.u32 %v4898_v23, %v4894_v16  ;;  %v2827_v39 = vsel %vm8505_vm13, %v2822_v60, %v9897_v51  ;;  %v2836_v33 = vrot.slane %v2835_v61, 4  ;;  %v4882_v2 = vshrl.u32 %v10239_v36, 16  ;;  %v10267_v51 = vld [vmem:[#allocation3 + $0xb4] sm:$0xff]  }
 0x31b   : > { %5029 = vrot.lane.b32.xlu0 %v4993_v17, %s8346_s17  ;;  %v4886_v43 = vrot.slane %v4884_v54, 1  ;;  %v7232_v12 = vcombine.low %v2817_v9, %v2827_v39  ;;  %v2846_v58 = vrot.slane %v2845_v55, 4  ;;  %v4891_v62 = vrot.slane %v4889_v35, 1  ;;  %v5564_v38 = vpop.permute.xlu1 %5563  ;;  %v10300_v60 = vld [vmem:[#allocation3 + $0x18] sm:$0xff]   ;;  %v8309_v39 = vld [vmem:[#allocation3 + $0x24] sm:$0xff]  }
 0x31c   : > { %v4904_v25 = vsel %vm1140_vm10, %v4899_v45, %v4903_v49  ;;  %v2841_v13 = vsel %vm8505_vm13, %v2836_v33, %v2840_v57  ;;  %v5000_v3 = vrot.slane %v10226_v52, 1  ;;  %v5590_v11 = vsel %vm1479_vm0, %v8307_v27, %v10204_v46  ;;  %v5562_v46 = vpop.permute.xlu0 %5561  ;;  %v8308_v61 = vld [vmem:[#allocation3 + $0x18] sm:$0xff]  }
 0x31d   : > { %4955 = vrot.lane.b32.xlu1 %v4904_v25, %s8344_s27  ;;  %v4887_v47 = vor.u32 %v4886_v43, %v4882_v2  ;;  %7747 = vmatprep.mubr.msk.bf16.mxu1 %vm1446_vm14, %v7232_v12  ;;  %v2851_v42 = vsel %vm8505_vm13, %v2846_v58, %v9590_v4  ;;  %v5001_v50 = vrot.slane %v10233_v7, 1  ;;  %v4997_v17 = vrot.slane %v10239_v36, 1  ;;  %v10309_v2 = vld [vmem:[#allocation3 + $0x2c] ss:$0 sps:$4 sm:$0x11]  }
 0x31e   : > { %v7233_v34 = vcombine.low %v2841_v13, %v2851_v42  ;;  %v4998_v56 = vrot.slane %v10245_v6, 1  ;;  %vm5073_vm2 = vcmask 130048   ;;  %v4920_v7 = vshll.u32 %v10267_v51, 16  ;;  %v10313_v25 = vld [vmem:[#allocation3 + $0x20] ss:$0 sps:$4 sm:$0x11]  }
 0x31f   : > { %v4892_v59 = vsel %vm1140_vm10, %v4887_v47, %v4891_v62  ;;  %v5002_v1 = vsel %vm1365_vm9, %v5000_v3, %v5001_v50  ;;  %v5622_v4 = vsel %vm5073_vm2, %v5590_v11, %v10236_v19  ;;  %v4925_v57 = vshll.u32 %v10269_v30, 16  ;;  %v10324_v42 = vld [vmem:[%s10886_s3 + $0x8] ss:$0 sps:$4 sm:$0xff]  }
 0x320   : > { %4953 = vrot.lane.b32.xlu0 %v4892_v59, %s8344_s27  ;;  %7748 = vmatmul.mubr.msk.bf16.gmra.mrb[12].mxu1 %vm1446_vm14, %v7233_v34  ;;  %vm5666_vm13 = vcmask 195584   ;;  %v4908_v6 = vshll.u32 %v10279_v8, 16  ;;  %v4913_v18 = vshll.u32 %v10281_v44, 16  ;;  %v4999_v19 = vsel %vm1365_vm9, %v4997_v17, %v4998_v56  ;;  %v10330_v17 = vld [vmem:[#allocation3 + $0x3c] sm:$0xff]  }
 0x321   : > { %5035 = vrot.lane.b32.xlu1 %v5002_v1, %s8346_s17  ;;  %7789 = vmatprep.mubr.msk.bf16.mxu1 %vm5666_vm13, %v5622_v4  ;;  %v4918_v16 = vshrl.u32 %v10267_v51, 16  ;;  %v4922_v23 = vrot.slane %v4920_v7, 1  ;;  %v5592_v49 = vsel %vm1479_vm0, %v8308_v61, %v10215_v48  ;;  %v4906_v54 = vshrl.u32 %v10279_v8, 16 }
 0x322   : > { %v4910_v9 = vrot.slane %v4908_v6, 1  ;;  %v5624_v55 = vsel %vm5073_vm2, %v5592_v49, %v10241_v5  ;;  %v4927_v35 = vrot.slane %v4925_v57, 1  ;;  %v5594_v33 = vsel %vm1479_vm0, %v8309_v39, %v5482_v40  ;;  %v10319_v40 = vpop.permute.xlu1 %5487  ;;  %v8310_v57 = vld [vmem:[#allocation3 + $0x30] sm:$0xff]  }
 0x323   : > { %v4923_v45 = vor.u32 %v4922_v23, %v4918_v16  ;;  %v4915_v12 = vrot.slane %v4913_v18, 1  ;;  %v5006_v58 = vrot.slane %v10267_v51, 1  ;;  %v6261_v48 = vshll.u32 %v10296_v28, 16 }
 0x324   : > { %5033 = vrot.lane.b32.xlu0 %v4999_v19, %s8346_s17  ;;  %v4911_v43 = vor.u32 %v4910_v9, %v4906_v54  ;;  %v5007_v5 = vrot.slane %v10269_v30, 1  ;;  %v5626_v62 = vsel %vm5073_vm2, %v5594_v33, %v5562_v46  ;;  %v6249_v3 = vshll.u32 %v10300_v60, 16  ;;  %v10352_v54 = vld [vmem:[#allocation3 + $0x44] ss:$0 sps:$4 sm:$0x11]  }
 0x325   : > { %v5486_v13 = vpop.permute.xlu0 %5485  ;;  %v4928_v47 = vsel %vm1140_vm10, %v4923_v45, %v4927_v35  ;;  %v5003_v11 = vrot.slane %v10279_v8, 1  ;;  %v5004_v50 = vrot.slane %v10281_v44, 1  ;;  %v6263_v30 = vrot.slane %v6261_v48, 1  ;;  %v10340_v44 = vld [vmem:[#allocation3 + $0x30] sm:$0xff]  }
 0x326   : > { %4959 = vrot.lane.b32.xlu1 %v4928_v47, %s8344_s27  ;;  %v4916_v27 = vsel %vm1140_vm10, %v4911_v43, %v4915_v12  ;;  %v6259_v34 = vshrl.u32 %v10296_v28, 16  ;;  %v6266_v59 = vshll.u32 %v10309_v2, 16  ;;  %v6251_v56 = vrot.slane %v6249_v3, 1  ;;  %v5568_v49 = vpop.permute.xlu1 %5567  ;;  %v10356_v35 = vld [vmem:[#allocation3 + $0x38] ss:$0 sps:$4 sm:$0x11]  }
 0x327   : > { %v6247_v1 = vshrl.u32 %v10300_v60, 16  ;;  %v6254_v4 = vshll.u32 %v10313_v25, 16  ;;  %v5008_v46 = vsel %vm1365_vm9, %v5006_v58, %v5007_v5  ;;  %v5596_v6 = vsel %vm1479_vm0, %v8310_v57, %v10260_v22  ;;  %v10362_v58 = vld [vmem:[#allocation3 + $0x54] sm:$0xff]   ;;  %v10385_v57 = vld [vmem:[#allocation3 + $0x5c] ss:$0 sps:$4 sm:$0x11]  }
 0x328   : > { %4957 = vrot.lane.b32.xlu0 %v4916_v27, %s8344_s27  ;;  %7790 = vmatmul.mubr.msk.bf16.vlgmr.msra.gmra.mrb[16].mxu1 %vm5666_vm13, %v5624_v55  ;;  %v6264_v7 = vor.u32 %v6263_v30, %v6259_v34  ;;  %v6285_v16 = vshll.u32 %v10330_v17, 16  ;;  %v5628_v23 = vsel %vm5073_vm2, %v5596_v6, %v5564_v38  ;;  %v6268_v61 = vrot.slane %v6266_v59, 1  ;;  %v8311_v55 = vld [vmem:[#allocation3 + $0x3c] sm:$0xff]  }
 0x329   : > { %7822 = vmatpush3.bf16.msra.mxu1 %v10209_v37  ;;  %7793 = vmatprep.mubr.msk.bf16.mxu1 %vm5666_vm13, %v5626_v62  ;;  %v5005_v37 = vsel %vm1365_vm9, %v5003_v11, %v5004_v50  ;;  %v6252_v18 = vor.u32 %v6251_v56, %v6247_v1  ;;  %v5566_v19 = vpop.permute.xlu0 %5565  ;;  %v6256_v9 = vrot.slane %v6254_v4, 1  ;;  %v5598_v22 = vsel %vm1479_vm0, %v8311_v55, %v5486_v13  ;;  %v10368_v62 = vld [vmem:[#allocation3 + $0x48] sm:$0xff]  }
 0x32a   : > { %8029 = vmatprep.subr.msk.bf16.mxu1 %vm5699_vm7, %v10324_v42  ;;  %5039 = vrot.lane.b32.xlu1 %v5008_v46, %s8346_s17  ;;  %v6473_v45 = vrot.slane %v10296_v28, 1  ;;  %v6273_v39 = vshll.u32 %v10340_v44, 16  ;;  %v6269_v33 = vsel %vm1140_vm10, %v6264_v7, %v6268_v61  ;;  %v6474_v43 = vrot.slane %v10309_v2, 1  ;;  %v8312_v4 = vld [vmem:[#allocation3 + $0x48] sm:$0xff]  }
 0x32b   : > { %v5630_v38 = vsel %vm5073_vm2, %v5598_v22, %v5566_v19  ;;  %v6287_v12 = vrot.slane %v6285_v16, 1  ;;  %v6257_v48 = vsel %vm1140_vm10, %v6252_v18, %v6256_v9  ;;  %v6470_v13 = vrot.slane %v10300_v60, 1  ;;  %v10388_v18 = vld [vmem:[#allocation3 + $0x50] ss:$0 sps:$4 sm:$0x11]  }
 0x32c   : > { %5037 = vrot.lane.b32.xlu0 %v5005_v37, %s8346_s17  ;;  %v6471_v47 = vrot.slane %v10313_v25, 1  ;;  %v6275_v5 = vrot.slane %v6273_v39, 1  ;;  %v6283_v2 = vshrl.u32 %v10330_v17, 16  ;;  %v6290_v3 = vshll.u32 %v10352_v54, 16  ;;  %v10393_v9 = vld [vmem:[#allocation3 + $0x6c] sm:$0xff]  }
 0x32d   : > { %v6271_v27 = vshrl.u32 %v10340_v44, 16  ;;  %v6278_v11 = vshll.u32 %v10356_v35, 16  ;;  %v6475_v50 = vsel %vm1365_vm9, %v6473_v45, %v6474_v43  ;;  %v6309_v34 = vshll.u32 %v10362_v58, 16 }
 0x32e   : > { %6440 = vrot.lane.b32.xlu1 %v6269_v33, %s8344_s27  ;;  %v6288_v25 = vor.u32 %v6287_v12, %v6283_v2  ;;  %v6472_v59 = vsel %vm1365_vm9, %v6470_v13, %v6471_v47  ;;  %v6297_v1 = vshll.u32 %v10368_v62, 16  ;;  %v5600_v46 = vsel %vm1479_vm0, %v8312_v4, %v10319_v40  ;;  %v10398_v40 = vld [vmem:[%s10886_s3 + $0x18] sm:$0xff]   ;;  %v8313_v2 = vld [vmem:[#allocation3 + $0x54] sm:$0xff]  }
 0x32f   : > { %v6276_v56 = vor.u32 %v6275_v5, %v6271_v27  ;;  %v6292_v7 = vrot.slane %v6290_v3, 1  ;;  %v5632_v6 = vsel %vm5073_vm2, %v5600_v46, %v5568_v49  ;;  %v6280_v37 = vrot.slane %v6278_v11, 1  ;;  %v10404_v33 = vld [vmem:[#allocation3 + $0x60] sm:$0xff]  }
 0x330   : > { %6438 = vrot.lane.b32.xlu0 %v6257_v48, %s8344_s27  ;;  %7794 = vmatmul.mubr.msk.bf16.gmra.mrb[20].mxu1 %vm5666_vm13, %v5628_v23  ;;  %v5492_v30 = vpop.permute.xlu1 %5491  ;;  %v6479_v16 = vrot.slane %v10330_v17, 1  ;;  %v6480_v23 = vrot.slane %v10352_v54, 1  ;;  %v6311_v61 = vrot.slane %v6309_v34, 1  ;;  %v6476_v22 = vrot.slane %v10340_v44, 1 }
 0x331   : > { %7797 = vmatprep.mubr.msk.bf16.mxu1 %vm5666_vm13, %v5630_v38  ;;  %v6293_v19 = vsel %vm1140_vm10, %v6288_v25, %v6292_v7  ;;  %v6281_v49 = vsel %vm1140_vm10, %v6276_v56, %v6280_v37  ;;  %v6477_v45 = vrot.slane %v10356_v35, 1  ;;  %v6299_v39 = vrot.slane %v6297_v1, 1  ;;  %v8314_v56 = vld [vmem:[#allocation3 + $0x60] sm:$0xff]   ;;  %v10428_v7 = vld [vmem:[#allocation3 + $0x68] ss:$0 sps:$4 sm:$0x11]  }
 0x332   : > { %6520 = vrot.lane.b32.xlu1 %v6475_v50, %s8346_s17  ;;  %v6307_v43 = vshrl.u32 %v10362_v58, 16  ;;  %v6314_v38 = vshll.u32 %v10385_v57, 16  ;;  %v5906_v12 = vsel %vm5699_vm7, %v10324_v42, 0  ;;  %v6295_v48 = vshrl.u32 %v10368_v62, 16 }
 0x333   : > { %v6302_v13 = vshll.u32 %v10388_v18, 16  ;;  %7824 = vmatpush3.bf16.msra.mxu1 %v5906_v12  ;;  %v6481_v35 = vsel %vm1365_vm9, %v6479_v16, %v6480_v23  ;;  %v6333_v5 = vshll.u32 %v10393_v9, 16  ;;  %v6478_v27 = vsel %vm1365_vm9, %v6476_v22, %v6477_v45  ;;  %v10439_v45 = vld [vmem:[#allocation3 + $0x78] sm:$0xff]  }
 0x334   : > { %6518 = vrot.lane.b32.xlu0 %v6472_v59, %s8346_s17  ;;  %v6312_v47 = vor.u32 %v6311_v61, %v6307_v43  ;;  %7857 = vmatprep.subr.bf16.mxu1 %v10398_v40  ;;  %v6300_v11 = vor.u32 %v6299_v39, %v6295_v48  ;;  %v6321_v50 = vshll.u32 %v10404_v33, 16  ;;  %v6316_v34 = vrot.slane %v6314_v38, 1  ;;  %v10423_v59 = vld [vmem:[#allocation3 + $0x74] ss:$0 sps:$4 sm:$0x11]   ;;  %v10433_v61 = vld [vmem:[#allocation3 + $0x84] sm:$0xff]  }
 0x335   : > { %v5604_v1 = vsel %vm1479_vm0, %v8314_v56, %v5492_v30  ;;  %v6304_v4 = vrot.slane %v6302_v13, 1  ;;  %v6485_v46 = vrot.slane %v10362_v58, 1  ;;  %v6482_v16 = vrot.slane %v10368_v62, 1 }
 0x336   : > { %6444 = vrot.lane.b32.xlu1 %v6293_v19, %s8344_s27  ;;  %v6486_v19 = vrot.slane %v10385_v57, 1  ;;  %v6335_v23 = vrot.slane %v6333_v5, 1  ;;  %v6323_v22 = vrot.slane %v6321_v50, 1  ;;  %v6331_v39 = vshrl.u32 %v10393_v9, 16 }
 0x337   : > { %v5490_v55 = vpop.permute.xlu0 %5489  ;;  %v6305_v30 = vsel %vm1140_vm10, %v6300_v11, %v6304_v4  ;;  %v6338_v43 = vshll.u32 %v10423_v59, 16  ;;  %v6326_v38 = vshll.u32 %v10428_v7, 16  ;;  %v6357_v13 = vshll.u32 %v10433_v61, 16  ;;  %v10454_v11 = vld [vmem:[#allocation3 + $0x8c] ss:$0 sps:$4 sm:$0x11]  }
 0x338   : > { %6442 = vrot.lane.b32.xlu0 %v6281_v49, %s8344_s27  ;;  %7798 = vmatmul.mubr.msk.bf16.gmra.mrb[24].mxu1 %vm5666_vm13, %v5632_v6  ;;  %v5572_v54 = vpop.permute.xlu1 %5571  ;;  %v5602_v3 = vsel %vm1479_vm0, %v8313_v2, %v5490_v55  ;;  %v6317_v6 = vsel %vm1140_vm10, %v6312_v47, %v6316_v34  ;;  %v6483_v55 = vrot.slane %v10388_v18, 1  ;;  %v6487_v12 = vsel %vm1365_vm9, %v6485_v46, %v6486_v19  ;;  %v8315_v2 = vld [vmem:[#allocation3 + $0x6c] sm:$0xff]   ;;  %v8316_v4 = vld [vmem:[#allocation3 + $0x78] sm:$0xff]  }
 0x339   : > { %v5636_v49 = vsel %vm5073_vm2, %v5604_v1, %v5572_v54  ;;  %v6319_v54 = vshrl.u32 %v10404_v33, 16  ;;  %v6336_v18 = vor.u32 %v6335_v23, %v6331_v39  ;;  %v6345_v5 = vshll.u32 %v10439_v45, 16  ;;  %v10459_v1 = vld [vmem:[#allocation3 + $0x80] ss:$0 sps:$4 sm:$0x11]  }
 0x33a   : > { %6524 = vrot.lane.b32.xlu1 %v6481_v35, %s8346_s17  ;;  %v6484_v35 = vsel %vm1365_vm9, %v6482_v16, %v6483_v55  ;;  %v6491_v34 = vrot.slane %v10393_v9, 1  ;;  %v6492_v56 = vrot.slane %v10423_v59, 1  ;;  %v6488_v16 = vrot.slane %v10404_v33, 1 }
 0x33b   : > { %v5570_v42 = vpop.permute.xlu0 %5569  ;;  %v6324_v47 = vor.u32 %v6323_v22, %v6319_v54  ;;  %v6359_v23 = vrot.slane %v6357_v13, 1  ;;  %v6489_v55 = vrot.slane %v10428_v7, 1  ;;  %v6347_v22 = vrot.slane %v6345_v5, 1  ;;  %v437_v54 = vld [vmem:[#allocation3 + $0xcc] sm:$0x1] }
 0x33c   : > { %6522 = vrot.lane.b32.xlu0 %v6478_v27, %s8346_s17  ;;  %v5634_v25 = vsel %vm5073_vm2, %v5602_v3, %v5570_v42  ;;  %v6340_v42 = vrot.slane %v6338_v43, 1  ;;  %v6355_v39 = vshrl.u32 %v10433_v61, 16  ;;  %v6362_v43 = vshll.u32 %v10454_v11, 16 }
 0x33d   : > { %7801 = vmatprep.mubr.msk.bf16.mxu1 %vm5666_vm13, %v5634_v25  ;;  %v6328_v25 = vrot.slane %v6326_v38, 1  ;;  %v6343_v38 = vshrl.u32 %v10439_v45, 16  ;;  %v6493_v7 = vsel %vm1365_vm9, %v6491_v34, %v6492_v56  ;;  %v10488_v34 = vld [vmem:[#allocation3 + $0xa4] ss:$0 sps:$4 sm:$0x11]   ;;  %v6498_v14 = vrot.slane %v10454_v11, 1 }
 0x33e   : > { %v5496_v37 = vpop.permute.xlu1 %5495  ;;  %6448 = vrot.lane.b32.xlu1 %v6317_v6, %s8344_s27  ;;  %v6341_v6 = vsel %vm1140_vm10, %v6336_v18, %v6340_v42  ;;  %v6360_v13 = vor.u32 %v6359_v23, %v6355_v39  ;;  %v8318_v23 = vld [vmem:[#allocation3 + $0x90] sm:$0xff]   ;;  %v6494_v63 = vrot.slane %v10439_v45, 1 }
 0x33f   : > { %v5608_v46 = vsel %vm1479_vm0, %v8316_v4, %v5496_v37  ;;  %v6329_v59 = vsel %vm1140_vm10, %v6324_v47, %v6328_v25  ;;  %v10471_v37 = vld [vmem:[#allocation3 + $0x90] sm:$0xff]   ;;  %v6490_v47 = vsel %vm1365_vm9, %v6488_v16, %v6489_v55  ;;  %v6348_v5 = vor.u32 %v6347_v22, %v6343_v38  ;;  %v10495_v16 = vld [vmem:[#allocation3 + $0x98] ss:$0 sps:$4 sm:$0x11]  }
 0x340   : > { %6446 = vrot.lane.b32.xlu0 %v6305_v30, %s8344_s27  ;;  %7802 = vmatmul.mubr.msk.bf16.gmra.mrb[28].mxu1 %vm5666_vm13, %v5636_v49  ;;  %v10465_v49 = vld [vmem:[#allocation3 + $0x9c] sm:$0xff]   ;;  %v6364_v25 = vrot.slane %v6362_v43, 1  ;;  %v6495_v43 = vrot.slane %v10459_v1, 1 }
 0x341   : > { %v5494_v57 = vpop.permute.xlu0 %5493 }
 0x342   : > { %v5576_v48 = vpop.permute.xlu1 %5575  ;;  %6528 = vrot.lane.b32.xlu1 %v6487_v12, %s8346_s17  ;;  %v5606_v3 = vsel %vm1479_vm0, %v8315_v2, %v5494_v57  ;;  %v6350_v12 = vshll.u32 %v10459_v1, 16  ;;  %v6369_v2 = vshll.u32 %v10471_v37, 16 }
 0x343   : > { %v5640_v30 = vsel %vm5073_vm2, %v5608_v46, %v5576_v48  ;;  %v492_v48 = vld [vmem:[#allocation3 + $0xd4] sm:$0x1] }
 0x344   : > { %6526 = vrot.lane.b32.xlu0 %v6484_v35, %s8346_s17  ;;  %v6381_v35 = vshll.u32 %v10465_v49, 16  ;;  %v493_v56 = vsel %vm9475_vm1, 0, %v492_v48  ;;  %v6352_v46 = vrot.slane %v6350_v12, 1  ;;  %v6379_v12 = vshrl.u32 %v10465_v49, 16 }
 0x345   : > { %v5574_v27 = vpop.permute.xlu0 %5573  ;;  %494 = vst [vmem:[#allocation3 + $0xd4] sm:$0x1] %v493_v56  ;;  %v6386_v48 = vshll.u32 %v10488_v34, 16 }
 0x346   : > { %v5638_v50 = vsel %vm5073_vm2, %v5606_v3, %v5574_v27  ;;  %v5500_v19 = vpop.permute.xlu1 %5499  ;;  %6452 = vrot.lane.b32.xlu1 %v6341_v6, %s8344_s27  ;;  %v438_v3 = vsel %vm9456_vm8, 0, %v437_v54  ;;  %v8317_v27 = vld [vmem:[#allocation3 + $0x84] sm:$0xff]   ;;  %v6497_v6 = vrot.slane %v10433_v61, 1  ;;  %v6383_v22 = vrot.slane %v6381_v35, 1 }
 0x347   : > { %7805 = vmatprep.mubr.msk.bf16.mxu1 %vm5666_vm13, %v5638_v50  ;;  %439 = vst [vmem:[#allocation3 + $0xcc] sm:$0x1] %v438_v3  ;;  %v6353_v11 = vsel %vm1140_vm10, %v6348_v5, %v6352_v46  ;;  %v6371_v54 = vrot.slane %v6369_v2, 1  ;;  %v6496_v5 = vsel %vm1365_vm9, %v6494_v63, %v6495_v43  ;;  %v10519_v3 = vld [vmem:[#allocation3 + $0xbc] ss:$0 sps:$4 sm:$0x11]  }
 0x348   : > { %6450 = vrot.lane.b32.xlu0 %v6329_v59, %s8344_s27  ;;  %7806 = vmatmul.mubr.msk.bf16.gmra.mrb[32].mxu1 %vm5666_vm13, %v5640_v30  ;;  %v5612_v30 = vsel %vm1479_vm0, %v8318_v23, %v5500_v19  ;;  %v6365_v59 = vsel %vm1140_vm10, %v6360_v13, %v6364_v25  ;;  %v10507_v19 = vld [vmem:[#allocation3 + $0xa8] sm:$0xff]   ;;  %v6499_v13 = vsel %vm1365_vm9, %v6497_v6, %v6498_v14  ;;  %v6388_v56 = vrot.slane %v6386_v48, 1 }
 0x349   : > { %v5498_v57 = vpop.permute.xlu0 %5497  ;;  %v6384_v1 = vor.u32 %v6383_v22, %v6379_v12  ;;  %v6504_v23 = vrot.slane %v10488_v34, 1  ;;  %v8320_v63 = vld [vmem:[#allocation3 + $0xa8] sm:$0xff]   ;;  %v6501_v43 = vrot.slane %v10495_v16, 1  ;;  %v6410_v12 = vshll.u32 %v10519_v3, 16 }
 0x34a   : > { %v5580_v18 = vpop.permute.xlu1 %5579  ;;  %6532 = vrot.lane.b32.xlu1 %v6493_v7, %s8346_s17  ;;  %v5610_v42 = vsel %vm1479_vm0, %v8317_v27, %v5498_v57  ;;  %v10501_v57 = vld [vmem:[#allocation3 + $0xb4] sm:$0xff]   ;;  %v6367_v7 = vshrl.u32 %v10471_v37, 16  ;;  %v6393_v27 = vshll.u32 %v10507_v19, 16 }
 0x34b   : > { %v5644_v39 = vsel %vm5073_vm2, %v5612_v30, %v5580_v18  ;;  %v6374_v18 = vshll.u32 %v10495_v16, 16  ;;  %v6500_v30 = vrot.slane %v10471_v37, 1 }
 0x34c   : > { %6530 = vrot.lane.b32.xlu0 %v6490_v47, %s8346_s17  ;;  %v6405_v47 = vshll.u32 %v10501_v57, 16  ;;  %v6372_v2 = vor.u32 %v6371_v54, %v6367_v7  ;;  %v6395_v48 = vrot.slane %v6393_v27, 1  ;;  %v10540_v7 = vld [vmem:[#allocation3 + $0xc0] sm:$0xff]   ;;  %v10545_v16 = vld [vmem:[#allocation3 + $0xd4] ss:$0 sps:$4 sm:$0x11]  }
 0x34d   : > { %v5578_v50 = vpop.permute.xlu0 %5577  ;;  %v6376_v14 = vrot.slane %v6374_v18, 1  ;;  %v6403_v18 = vshrl.u32 %v10501_v57, 16  ;;  %v6502_v27 = vsel %vm1365_vm9, %v6500_v30, %v6501_v43  ;;  %v6509_v30 = vrot.slane %v10501_v57, 1  ;;  %v8241_v43 = vld [vmem:[#allocation3 + $0xc8] ss:$0 sps:$4 sm:$0x11]  }
 0x34e   : > { %v5642_v4 = vsel %vm5073_vm2, %v5610_v42, %v5578_v50  ;;  %v5504_v55 = vpop.permute.xlu1 %5503  ;;  %6456 = vrot.lane.b32.xlu1 %v6365_v59, %s8344_s27  ;;  %v8319_v42 = vld [vmem:[#allocation3 + $0x9c] sm:$0xff]   ;;  %v10525_v46 = vld [vmem:[#allocation3 + $0xcc] sm:$0xff]   ;;  %v6407_v54 = vrot.slane %v6405_v47, 1 }
 0x34f   : > { %7809 = vmatprep.mubr.msk.bf16.mxu1 %vm5666_vm13, %v5642_v4  ;;  %v6503_v4 = vrot.slane %v10465_v49, 1  ;;  %v10530_v59 = vld [vmem:[#allocation3 + $0xb0] ss:$0 sps:$4 sm:$0x11]   ;;  %v5616_v22 = vsel %vm1479_vm0, %v8320_v63, %v5504_v55  ;;  %v6377_v34 = vsel %vm1140_vm10, %v6372_v2, %v6376_v14  ;;  %v6427_v63 = vshrl.u32 %v10525_v46, 16 }
 0x350   : > { %6454 = vrot.lane.b32.xlu0 %v6353_v11, %s8344_s27  ;;  %7810 = vmatmul.mubr.msk.bf16.gmra.mrb[36].mxu1 %vm5666_vm13, %v5644_v39  ;;  %v6389_v39 = vsel %vm1140_vm10, %v6384_v1, %v6388_v56  ;;  %v6398_v1 = vshll.u32 %v10530_v59, 16  ;;  %v6408_v2 = vor.u32 %v6407_v54, %v6403_v18  ;;  %v8321_v56 = vld [vmem:[#allocation3 + $0xb4] sm:$0xff]   ;;  %v8322_v54 = vld [vmem:[#allocation3 + $0xc0] sm:$0xff]  }
 0x351   : > { %v5502_v38 = vpop.permute.xlu0 %5501  ;;  %v6505_v47 = vsel %vm1365_vm9, %v6503_v4, %v6504_v23  ;;  %v6434_v4 = vshll.u32 %v10545_v16, 16 }
 0x352   : > { %v5584_v35 = vpop.permute.xlu1 %5583  ;;  %6536 = vrot.lane.b32.xlu1 %v6499_v13, %s8346_s17  ;;  %v5614_v50 = vsel %vm1479_vm0, %v8319_v42, %v5502_v38  ;;  %v6429_v13 = vshll.u32 %v10525_v46, 16  ;;  %v6412_v42 = vrot.slane %v6410_v12, 1 }
 0x353   : > { %v5648_v38 = vsel %vm5073_vm2, %v5616_v22, %v5584_v35  ;;  %v6391_v35 = vshrl.u32 %v10507_v19, 16 }
 0x354   : > { %6534 = vrot.lane.b32.xlu0 %v6496_v5, %s8346_s17  ;;  %v6431_v22 = vrot.slane %v6429_v13, 1 }
 0x355   : > { %v5582_v25 = vpop.permute.xlu0 %5581 }
 0x356   : > { %v5646_v6 = vsel %vm5073_vm2, %v5614_v50, %v5582_v25  ;;  %v5508_v11 = vpop.permute.xlu1 %5507  ;;  %6460 = vrot.lane.b32.xlu1 %v6389_v39, %s8344_s27  ;;  %v6396_v50 = vor.u32 %v6395_v48, %v6391_v35  ;;  %v6417_v25 = vshll.u32 %v10540_v7, 16  ;;  %v6400_v39 = vrot.slane %v6398_v1, 1 }
 0x357   : > { %7813 = vmatprep.mubr.msk.bf16.mxu1 %vm5666_vm13, %v5646_v6  ;;  %v6510_v48 = vrot.slane %v10519_v3, 1  ;;  %v6507_v35 = vrot.slane %v10530_v59, 1  ;;  %v6415_v3 = vshrl.u32 %v10540_v7, 16  ;;  %v8323_v59 = vld [vmem:[#allocation3] sm:$0xff]  }
 0x358   : > { %6458 = vrot.lane.b32.xlu0 %v6377_v34, %s8344_s27  ;;  %7814 = vmatmul.mubr.msk.bf16.gmra.mrb[40].mxu1 %vm5666_vm13, %v5648_v38  ;;  %v5620_v38 = vsel %vm1479_vm0, %v8322_v54, %v5508_v11  ;;  %v6413_v34 = vsel %vm1140_vm10, %v6408_v2, %v6412_v42  ;;  %v6401_v13 = vsel %vm1140_vm10, %v6396_v50, %v6400_v39  ;;  %v6419_v1 = vrot.slane %v6417_v25, 1  ;;  %v8324_v39 = vld [vmem:[#allocation3 + $0xc] sm:$0xff]  }
 0x359   : > { %v5506_v55 = vpop.permute.xlu0 %5505  ;;  %v6436_v2 = vrot.slane %v6434_v4, 1  ;;  %v6511_v42 = vsel %vm1365_vm9, %v6509_v30, %v6510_v48 }
 0x35a   : > { %v5588_v5 = vpop.permute.xlu1 %5587  ;;  %6540 = vrot.lane.b32.xlu1 %v6505_v47, %s8346_s17  ;;  %v5618_v6 = vsel %vm1479_vm0, %v8321_v56, %v5506_v55  ;;  %v6506_v55 = vrot.slane %v10507_v19, 1  ;;  %v6432_v47 = vor.u32 %v6431_v22, %v6427_v63  ;;  %v6420_v56 = vor.u32 %v6419_v1, %v6415_v3  ;;  %v8326_v3 = vld [vmem:[#allocation3 + $0x24] sm:$0xff]  }
 0x35b   : > { %v5652_v18 = vsel %vm5073_vm2, %v5620_v38, %v5588_v5  ;;  %v6515_v63 = vrot.slane %v10525_v46, 1  ;;  %v6516_v22 = vrot.slane %v10545_v16, 1  ;;  %v8243_v38 = vld [vmem:[%s10886_s3 + $0x20] ss:$0 sps:$4 sm:$0xff]   ;;  %v6512_v16 = vrot.slane %v10540_v7, 1 }
 0x35c   : > { %6538 = vrot.lane.b32.xlu0 %v6502_v27, %s8346_s17  ;;  %v6422_v27 = vshll.u32 %v8241_v43, 16  ;;  %v6508_v50 = vsel %vm1365_vm9, %v6506_v55, %v6507_v35  ;;  %v6513_v55 = vrot.slane %v8241_v43, 1  ;;  %v6660_v35 = vsel %vm5699_vm7, %v8243_v38, 0 }
 0x35d   : > { %v5586_v14 = vpop.permute.xlu0 %5585 }
 0x35e   : > { %v5650_v23 = vsel %vm5073_vm2, %v5618_v6, %v5586_v14  ;;  %v4932_v12 = vpop.permute.xlu1 %4931  ;;  %6464 = vrot.lane.b32.xlu1 %v6413_v34, %s8344_s27  ;;  %v6437_v14 = vsel %vm1140_vm10, %v6432_v47, %v6436_v2  ;;  %v6514_v1 = vsel %vm1365_vm9, %v6512_v16, %v6513_v55 }
 0x35f   : > { %7817 = vmatprep.mubr.msk.bf16.mxu1 %vm5666_vm13, %v5650_v23  ;;  %v6424_v23 = vrot.slane %v6422_v27, 1  ;;  %v5044_v30 = vsel %vm1479_vm0, %v8324_v39, %v4932_v12 }
 0x360   : > { %6462 = vrot.lane.b32.xlu0 %v6401_v13, %s8344_s27  ;;  %7818 = vmatmul.mubr.msk.bf16.gmra.mrb[44].mxu1 %vm5666_vm13, %v5652_v18  ;;  %v6517_v18 = vsel %vm1365_vm9, %v6515_v63, %v6516_v22 }
 0x361   : > { %v4930_v11 = vpop.permute.xlu0 %4929  ;;  %v6425_v48 = vsel %vm1140_vm10, %v6420_v56, %v6424_v23  ;;  %v8327_v56 = vld [vmem:[#allocation3 + $0x30] sm:$0xff]  }
 0x362   : > { %v5012_v5 = vpop.permute.xlu1 %5011  ;;  %6544 = vrot.lane.b32.xlu1 %v6511_v42, %s8346_s17  ;;  %v5042_v25 = vsel %vm1479_vm0, %v8323_v59, %v4930_v11  ;;  %v8325_v11 = vld [vmem:[#allocation3 + $0x18] sm:$0xff]  }
 0x363   : > { %v5077_v34 = vsel %vm5073_vm2, %v5044_v30, %v5012_v5  ;;  %v8329_v30 = vld [vmem:[#allocation3 + $0x48] sm:$0xff]  }
 0x364   : > { %6542 = vrot.lane.b32.xlu0 %v6508_v50, %s8346_s17 }
 0x365   : > { %v5010_v6 = vpop.permute.xlu0 %5009 }
 0x366   : > { %v5075_v4 = vsel %vm5073_vm2, %v5042_v25, %v5010_v6  ;;  %v4936_v54 = vpop.permute.xlu1 %4935  ;;  %6468 = vrot.lane.b32.xlu1 %v6437_v14, %s8344_s27  ;;  %v8328_v14 = vld [vmem:[#allocation3 + $0x3c] sm:$0xff]  }
 0x367   : > { %7825 = vmatprep.mubr.msk.bf16.mxu1 %vm5666_vm13, %v5075_v4 }
 0x368   : > { %6466 = vrot.lane.b32.xlu0 %v6425_v48, %s8344_s27  ;;  %7826 = vmatmul.mubr.msk.bf16.vlgmr.msra.gmra.mrb[16].mxu1 %vm5666_vm13, %v5077_v34  ;;  %v8330_v48 = vld [vmem:[#allocation3 + $0x54] sm:$0xff]  }
 0x369   : > { %v4934_v12 = vpop.permute.xlu0 %4933  ;;  %7858 = vmatpush3.bf16.msra.mxu1 %v10398_v40  ;;  %v5048_v40 = vsel %vm1479_vm0, %v8326_v3, %v4936_v54 }
 0x36a   : > { %v5016_v13 = vpop.permute.xlu1 %5015  ;;  %8030 = vmatprep.subr.msk.bf16.mxu1 %vm5699_vm7, %v8243_v38  ;;  %6548 = vrot.lane.b32.xlu1 %v6517_v18, %s8346_s17  ;;  %v5046_v43 = vsel %vm1479_vm0, %v8325_v11, %v4934_v12 }
 0x36b   : > { %v5081_v42 = vsel %vm5073_vm2, %v5048_v40, %v5016_v13 }
 0x36c   : > { %6546 = vrot.lane.b32.xlu0 %v6514_v1, %s8346_s17 }
 0x36d   : > { %v5014_v47 = vpop.permute.xlu0 %5013  ;;  %7860 = vmatpush3.bf16.msra.mxu1 %v6660_v35  ;;  %v8331_v35 = vld [vmem:[#allocation3 + $0x60] sm:$0xff]  }
 0x36e   : > { %v5079_v2 = vsel %vm5073_vm2, %v5046_v43, %v5014_v47  ;;  %v4940_v27 = vpop.permute.xlu1 %4939  ;;  %v8332_v47 = vld [vmem:[#allocation3 + $0x6c] sm:$0xff]  }
 0x36f   : > { %7829 = vmatprep.mubr.msk.bf16.mxu1 %vm5666_vm13, %v5079_v2  ;;  %v5052_v63 = vsel %vm1479_vm0, %v8328_v14, %v4940_v27 }
 0x370   : > { %7830 = vmatmul.mubr.msk.bf16.gmra.mrb[20].mxu1 %vm5666_vm13, %v5081_v42 }
 0x371   : > { %v4938_v5 = vpop.permute.xlu0 %4937 }
 0x372   : > { %v5020_v50 = vpop.permute.xlu1 %5019  ;;  %v5050_v59 = vsel %vm1479_vm0, %v8327_v56, %v4938_v5  ;;  %v8333_v5 = vld [vmem:[#allocation3 + $0x78] sm:$0xff]  }
 0x373   : > { %v5085_v4 = vsel %vm5073_vm2, %v5052_v63, %v5020_v50 }
 0x375   : > { %v5018_v25 = vpop.permute.xlu0 %5017 }
 0x376   : > { %v5083_v6 = vsel %vm5073_vm2, %v5050_v59, %v5018_v25  ;;  %v4944_v22 = vpop.permute.xlu1 %4943  ;;  %v8334_v25 = vld [vmem:[#allocation3 + $0x84] sm:$0xff]  }
 0x377   : > { %7833 = vmatprep.mubr.msk.bf16.mxu1 %vm5666_vm13, %v5083_v6  ;;  %v5056_v16 = vsel %vm1479_vm0, %v8330_v48, %v4944_v22 }
 0x378   : > { %7834 = vmatmul.mubr.msk.bf16.gmra.mrb[24].mxu1 %vm5666_vm13, %v5085_v4 }
 0x379   : > { %v4942_v23 = vpop.permute.xlu0 %4941 }
 0x37a   : > { %v5024_v39 = vpop.permute.xlu1 %5023  ;;  %v5054_v54 = vsel %vm1479_vm0, %v8329_v30, %v4942_v23 }
 0x37b   : > { %v5089_v12 = vsel %vm5073_vm2, %v5056_v16, %v5024_v39 }
 0x37d   : > { %v5022_v38 = vpop.permute.xlu0 %5021 }
 0x37e   : > { %v5087_v34 = vsel %vm5073_vm2, %v5054_v54, %v5022_v38  ;;  %v4948_v55 = vpop.permute.xlu1 %4947 }
 0x37f   : > { %7837 = vmatprep.mubr.msk.bf16.mxu1 %vm5666_vm13, %v5087_v34  ;;  %v5060_v2 = vsel %vm1479_vm0, %v8332_v47, %v4948_v55 }
 0x380   : > { %7838 = vmatmul.mubr.msk.bf16.gmra.mrb[28].mxu1 %vm5666_vm13, %v5089_v12 }
 0x381   : > { %v4946_v18 = vpop.permute.xlu0 %4945 }
 0x382   : > { %v5028_v13 = vpop.permute.xlu1 %5027  ;;  %v5058_v1 = vsel %vm1479_vm0, %v8331_v35, %v4946_v18 }
 0x383   : > { %v5093_v40 = vsel %vm5073_vm2, %v5060_v2, %v5028_v13 }
 0x385   : > { %v5026_v11 = vpop.permute.xlu0 %5025 }
 0x386   : > { %v5091_v43 = vsel %vm5073_vm2, %v5058_v1, %v5026_v11  ;;  %v4952_v3 = vpop.permute.xlu1 %4951 }
 0x387   : > { %7841 = vmatprep.mubr.msk.bf16.mxu1 %vm5666_vm13, %v5091_v43  ;;  %v5064_v6 = vsel %vm1479_vm0, %v8334_v25, %v4952_v3 }
 0x388   : > { %7842 = vmatmul.mubr.msk.bf16.gmra.mrb[32].mxu1 %vm5666_vm13, %v5093_v40 }
 0x389   : > { %v4950_v27 = vpop.permute.xlu0 %4949 }
 0x38a   : > { %v5032_v42 = vpop.permute.xlu1 %5031  ;;  %v5062_v50 = vsel %vm1479_vm0, %v8333_v5, %v4950_v27 }
 0x38b   : > { %v5097_v63 = vsel %vm5073_vm2, %v5064_v6, %v5032_v42 }
 0x38d   : > { %v5030_v56 = vpop.permute.xlu0 %5029 }
 0x38e   : > { %v5095_v59 = vsel %vm5073_vm2, %v5062_v50, %v5030_v56 }
 0x38f   : > { %7845 = vmatprep.mubr.msk.bf16.mxu1 %vm5666_vm13, %v5095_v59  ;;  %v4956_v14 = vpop.permute.xlu1 %4955 }
 0x390   : > { %7846 = vmatmul.mubr.msk.bf16.gmra.mrb[36].mxu1 %vm5666_vm13, %v5097_v63  ;;  %v5068_v30 = vsel %vm1479_vm0, %v10226_v52, %v4956_v14 }
 0x392   : > { %v4954_v22 = vpop.permute.xlu0 %4953 }
 0x393   : > { %v5036_v4 = vpop.permute.xlu1 %5035  ;;  %v5066_v23 = vsel %vm1479_vm0, %v10239_v36, %v4954_v22 }
 0x394   : > { %v5101_v38 = vsel %vm5073_vm2, %v5068_v30, %v5036_v4 }
 0x396   : > { %v5034_v39 = vpop.permute.xlu0 %5033 }
 0x397   : > { %v5099_v54 = vsel %vm5073_vm2, %v5066_v23, %v5034_v39 }
 0x398   : > { %7849 = vmatprep.mubr.msk.bf16.mxu1 %vm5666_vm13, %v5099_v54  ;;  %v4960_v34 = vpop.permute.xlu1 %4959 }
 0x399   : > { %7850 = vmatmul.mubr.msk.bf16.gmra.mrb[40].mxu1 %vm5666_vm13, %v5101_v38  ;;  %v5072_v36 = vsel %vm1479_vm0, %v10267_v51, %v4960_v34 }
 0x39a   : > { %v4958_v48 = vpop.permute.xlu0 %4957 }
 0x39b   : > { %v5070_v55 = vsel %vm1479_vm0, %v10279_v8, %v4958_v48 }
 0x39c   : > { %v5040_v16 = vpop.permute.xlu1 %5039 }
 0x39d   : > { %v5105_v18 = vsel %vm5073_vm2, %v5072_v36, %v5040_v16 }
 0x39e   : > { %v5038_v12 = vpop.permute.xlu0 %5037 }
 0x39f   : > { %v5103_v52 = vsel %vm5073_vm2, %v5070_v55, %v5038_v12 }
 0x3a0   : > { %7853 = vmatprep.mubr.msk.bf16.mxu1 %vm5666_vm13, %v5103_v52  ;;  %v6441_v13 = vpop.permute.xlu1 %6440 }
 0x3a1   : > { %7854 = vmatmul.mubr.msk.bf16.gmra.mrb[44].mxu1 %vm5666_vm13, %v5105_v18  ;;  %v6553_v8 = vsel %vm1479_vm0, %v10296_v28, %v6441_v13 }
 0x3a2   : > { %v6439_v35 = vpop.permute.xlu0 %6438 }
 0x3a3   : > { %v6551_v11 = vsel %vm1479_vm0, %v10300_v60, %v6439_v35 }
 0x3a4   : > { %v6521_v1 = vpop.permute.xlu1 %6520 }
 0x3a5   : > { %v6585_v47 = vsel %vm5073_vm2, %v6553_v8, %v6521_v1 }
 0x3a6   : > { %v6519_v43 = vpop.permute.xlu0 %6518 }
 0x3a7   : > { %v6583_v51 = vsel %vm5073_vm2, %v6551_v11, %v6519_v43 }
 0x3a8   : > { %7861 = vmatprep.mubr.msk.bf16.mxu1 %vm5666_vm13, %v6583_v51  ;;  %v6445_v2 = vpop.permute.xlu1 %6444 }
 0x3a9   : > { %7862 = vmatmul.mubr.msk.bf16.vlgmr.msra.gmra.mrb[16].mxu1 %vm5666_vm13, %v6585_v47  ;;  %v6557_v60 = vsel %vm1479_vm0, %v10330_v17, %v6445_v2 }
 0x3aa   : > { %v6443_v3 = vpop.permute.xlu0 %6442 }
 0x3ab   : > { %v6555_v27 = vsel %vm1479_vm0, %v10340_v44, %v6443_v3 }
 0x3ac   : > { %v6525_v40 = vpop.permute.xlu1 %6524 }
 0x3ad   : > { %v6589_v5 = vsel %vm5073_vm2, %v6557_v60, %v6525_v40 }
 0x3ae   : > { %v6523_v42 = vpop.permute.xlu0 %6522 }
 0x3af   : > { %v6587_v28 = vsel %vm5073_vm2, %v6555_v27, %v6523_v42 }
 0x3b0   : > { %7865 = vmatprep.mubr.msk.bf16.mxu1 %vm5666_vm13, %v6587_v28  ;;  %v6449_v50 = vpop.permute.xlu1 %6448 }
 0x3b1   : > { %7866 = vmatmul.mubr.msk.bf16.gmra.mrb[20].mxu1 %vm5666_vm13, %v6589_v5  ;;  %v6561_v44 = vsel %vm1479_vm0, %v10362_v58, %v6449_v50 }
 0x3b2   : > { %v6447_v56 = vpop.permute.xlu0 %6446 }
 0x3b3   : > { %v6559_v25 = vsel %vm1479_vm0, %v10368_v62, %v6447_v56 }
 0x3b4   : > { %v6529_v59 = vpop.permute.xlu1 %6528 }
 0x3b5   : > { %v6593_v14 = vsel %vm5073_vm2, %v6561_v44, %v6529_v59 }
 0x3b6   : > { %v6527_v6 = vpop.permute.xlu0 %6526 }
 0x3b7   : > { %v6591_v17 = vsel %vm5073_vm2, %v6559_v25, %v6527_v6 }
 0x3b8   : > { %7869 = vmatprep.mubr.msk.bf16.mxu1 %vm5666_vm13, %v6591_v17  ;;  %v6453_v63 = vpop.permute.xlu1 %6452 }
 0x3b9   : > { %7870 = vmatmul.mubr.msk.bf16.gmra.mrb[24].mxu1 %vm5666_vm13, %v6593_v14  ;;  %v6565_v62 = vsel %vm1479_vm0, %v10393_v9, %v6453_v63 }
 0x3ba   : > { %v6451_v22 = vpop.permute.xlu0 %6450 }
 0x3bb   : > { %v6563_v23 = vsel %vm1479_vm0, %v10404_v33, %v6451_v22 }
 0x3bc   : > { %v6533_v4 = vpop.permute.xlu1 %6532 }
 0x3bd   : > { %v6597_v30 = vsel %vm5073_vm2, %v6565_v62, %v6533_v4 }
 0x3be   : > { %v6531_v39 = vpop.permute.xlu0 %6530 }
 0x3bf   : > { %v6595_v58 = vsel %vm5073_vm2, %v6563_v23, %v6531_v39  ;;  %v10744_v39 = vld [vmem:[%s10887_s4] ss:$0 sm:$0xff] }
 0x3c0   : > { %7873 = vmatprep.mubr.msk.bf16.mxu1 %vm5666_vm13, %v6595_v58  ;;  %v6457_v54 = vpop.permute.xlu1 %6456 }
 0x3c1   : > { %7874 = vmatmul.mubr.msk.bf16.gmra.mrb[28].mxu1 %vm5666_vm13, %v6597_v30  ;;  %v6569_v33 = vsel %vm1479_vm0, %v10433_v61, %v6457_v54 }
 0x3c2   : > { %v6455_v38 = vpop.permute.xlu0 %6454 }
 0x3c3   : > { %v6567_v48 = vsel %vm1479_vm0, %v10439_v45, %v6455_v38 }
 0x3c4   : > { %v6537_v34 = vpop.permute.xlu1 %6536 }
 0x3c5   : > { %v6601_v55 = vsel %vm5073_vm2, %v6569_v33, %v6537_v34 }
 0x3c6   : > { %v6535_v16 = vpop.permute.xlu0 %6534 }
 0x3c7   : > { %v6599_v9 = vsel %vm5073_vm2, %v6567_v48, %v6535_v16 }
 0x3c8   : > { %7877 = vmatprep.mubr.msk.bf16.mxu1 %vm5666_vm13, %v6599_v9  ;;  %v6461_v12 = vpop.permute.xlu1 %6460 }
 0x3c9   : > { %7878 = vmatmul.mubr.msk.bf16.gmra.mrb[32].mxu1 %vm5666_vm13, %v6601_v55  ;;  %v6573_v61 = vsel %vm1479_vm0, %v10465_v49, %v6461_v12 }
 0x3ca   : > { %v6459_v36 = vpop.permute.xlu0 %6458 }
 0x3cb   : > { %v6571_v45 = vsel %vm1479_vm0, %v10471_v37, %v6459_v36 }
 0x3cc   : > { %v6541_v52 = vpop.permute.xlu1 %6540 }
 0x3cd   : > { %v10685_v18 = vpop.f32.mrb[0].mxu1  ;;  %v6605_v43 = vsel %vm5073_vm2, %v6573_v61, %v6541_v52 }
 0x3ce   : > { %v6539_v13 = vpop.permute.xlu0 %6538  ;;  %v10689_v35 = vpop.f32.mrb[1].mxu1 }
 0x3cf   : > { %v6603_v1 = vsel %vm5073_vm2, %v6571_v45, %v6539_v13  ;;  %v10694_v11 = vpop.f32.mrb[2].mxu1 }
 0x3d0   : > { %7881 = vmatprep.mubr.msk.bf16.mxu1 %vm5666_vm13, %v6603_v1  ;;  %v10698_v8 = vpop.f32.mrb[3].mxu1  ;;  %v6465_v51 = vpop.permute.xlu1 %6464 }
 0x3d1   : > { %7882 = vmatmul.mubr.msk.bf16.gmra.mrb[36].mxu1 %vm5666_vm13, %v6605_v43  ;;  %v6577_v49 = vsel %vm1479_vm0, %v10501_v57, %v6465_v51 }
 0x3d2   : > { %v6463_v37 = vpop.permute.xlu0 %6462 }
 0x3d3   : > { %v6575_v2 = vsel %vm1479_vm0, %v10507_v19, %v6463_v37 }
 0x3d4   : > { %v6545_v47 = vpop.permute.xlu1 %6544 }
 0x3d5   : > { %v6609_v27 = vsel %vm5073_vm2, %v6577_v49, %v6545_v47 }
 0x3d6   : > { %v6543_v3 = vpop.permute.xlu0 %6542 }
 0x3d7   : > { %v6607_v40 = vsel %vm5073_vm2, %v6575_v2, %v6543_v3 }
 0x3d8   : > { %7885 = vmatprep.mubr.msk.bf16.mxu1 %vm5666_vm13, %v6607_v40  ;;  %v6469_v42 = vpop.permute.xlu1 %6468 }
 0x3d9   : > { %7886 = vmatmul.mubr.msk.bf16.gmra.mrb[40].mxu1 %vm5666_vm13, %v6609_v27  ;;  %v6581_v57 = vsel %vm1479_vm0, %v10525_v46, %v6469_v42 }
 0x3da   : > { %v10709_v60 = vpop.f32.mrb[4].mxu1  ;;  %v6467_v28 = vpop.permute.xlu0 %6466 }
 0x3db   : > { %v10711_v5 = vpop.f32.mrb[5].mxu1  ;;  %v6579_v59 = vsel %vm1479_vm0, %v10540_v7, %v6467_v28 }
 0x3dc   : > { %v10713_v50 = vpop.f32.mrb[6].mxu1  ;;  %v6549_v56 = vpop.permute.xlu1 %6548 }
 0x3dd   : > { %v10715_v19 = vpop.f32.mrb[7].mxu1  ;;  %v6613_v44 = vsel %vm5073_vm2, %v6581_v57, %v6549_v56 }
 0x3de   : > { %v6547_v25 = vpop.permute.xlu0 %6546 }
 0x3df   : > { %v6611_v6 = vsel %vm5073_vm2, %v6579_v59, %v6547_v25 }
 0x3e0   : > { %7889 = vmatprep.mubr.msk.bf16.mxu1 %vm5666_vm13, %v6611_v6 }
 0x3e1   : > { %7890 = vmatmul.mubr.msk.bf16.gmra.mrb[44].mxu1 %vm5666_vm13, %v6613_v44 }
 0x3e5   : > { %v10725_v17 = vpop.f32.mrb[8].mxu1 }
 0x3e6   : > { %v10727_v14 = vpop.f32.mrb[9].mxu1 }
 0x3e7   : > { %v10729_v63 = vpop.f32.mrb[10].mxu1 }
 0x3e8   : > { %v10731_v46 = vpop.f32.mrb[11].mxu1 }
 0x3f3   : > { %v10733_v22 = vpop.f32.mrb[12].mxu1 }
 0x3f4   : > { %v10735_v7 = vpop.f32.mrb[13].mxu1 }
 0x3f5   : > { %v10737_v4 = vpop.f32.mrb[14].mxu1 }
 0x3f6   : > { %v10739_v23 = vpop.f32.mrb[15].mxu1 }
 0x47c   : > { %v7863_v62 = vpop.f32.mrb[16].mxu1 }
 0x47d   : > { %v6864_v58 = vadd.f32 %v7863_v62, %v10744_v39  ;;  %v6696_v30 = vpop.f32.mrb[17].mxu1 }
 0x47e   : > { %v6862_v54 = vadd.f32 %v10744_v39, %v6696_v30  ;;  %v7864_v38 = vpop.f32.mrb[18].mxu1 }
 0x47f   : > { %vm6896_vm9 = vcmp.ge.f32.partialorder %v6864_v58, 0.0  ;;  %v6928_v34 = vmul.f32 0.2, %v6864_v58  ;;  %v6865_v48 = vadd.f32 %v7864_v38, %v10744_v39  ;;  %v6699_v16 = vpop.f32.mrb[19].mxu1 }
 0x480   : > { %vm6894_vm10 = vcmp.ge.f32.partialorder %v6862_v54, 0.0  ;;  %v6926_v33 = vmul.f32 0.2, %v6862_v54  ;;  %v6863_v9 = vadd.f32 %v10744_v39, %v6699_v16 }
 0x481   : > { %v6960_v55 = vsel %vm6896_vm9, %v6864_v58, %v6928_v34  ;;  %vm6897_vm14 = vcmp.ge.f32.partialorder %v6865_v48, 0.0  ;;  %v6929_v12 = vmul.f32 0.2, %v6865_v48 }
 0x482   : > { %v6992_v36 = vadd.f32 %v9529_v0, %v6960_v55  ;;  %v6958_v52 = vsel %vm6894_vm10, %v6862_v54, %v6926_v33  ;;  %vm6895_vm8 = vcmp.ge.f32.partialorder %v6863_v9, 0.0  ;;  %v6927_v45 = vmul.f32 0.2, %v6863_v9 }
 0x483   : > { %v6990_v13 = vadd.f32 %v6958_v52, %v9531_v53  ;;  %v6961_v61 = vsel %vm6897_vm14, %v6865_v48, %v6929_v12 }
 0x484   : > { %7024 = vst.msk [vmem:[%s10754_s15 + $0x10] sm:$0xff] %vm1479_vm0, %v6992_v36  ;;  %v6993_v1 = vadd.f32 %v9533_v26, %v6961_v61  ;;  %v6959_v43 = vsel %vm6895_vm8, %v6863_v9, %v6927_v45  ;;  %v7867_v51 = vpop.f32.mrb[20].mxu1 }
 0x485   : > { %7022 = vst.msk [vmem:[%s10754_s15] sm:$0xff] %vm1479_vm0, %v6990_v13  ;;  %v6991_v37 = vadd.f32 %v6959_v43, %v9535_v10  ;;  %v6868_v47 = vadd.f32 %v7867_v51, %v10744_v39  ;;  %v6712_v0 = vpop.f32.mrb[21].mxu1 }
 0x486   : > { %7025 = vst.msk [vmem:[%s10754_s15 + $0x18] sm:$0xff] %vm1479_vm0, %v6993_v1  ;;  %v6866_v2 = vadd.f32 %v10744_v39, %v6712_v0  ;;  %v7868_v3 = vpop.f32.mrb[22].mxu1 }
 0x487   : > { %7023 = vst.msk [vmem:[%s10754_s15 + $0x8] sm:$0xff] %vm1479_vm0, %v6991_v37  ;;  %vm6900_vm1 = vcmp.ge.f32.partialorder %v6868_v47, 0.0  ;;  %v6932_v53 = vmul.f32 0.2, %v6868_v47  ;;  %v6869_v26 = vadd.f32 %v7868_v3, %v10744_v39  ;;  %v6715_v49 = vpop.f32.mrb[23].mxu1 }
 0x488   : > { %vm6898_vm6 = vcmp.ge.f32.partialorder %v6866_v2, 0.0  ;;  %v6930_v40 = vmul.f32 0.2, %v6866_v2  ;;  %v6867_v10 = vadd.f32 %v10744_v39, %v6715_v49 }
 0x489   : > { %v6964_v27 = vsel %vm6900_vm1, %v6868_v47, %v6932_v53  ;;  %vm6901_vm15 = vcmp.ge.f32.partialorder %v6869_v26, 0.0  ;;  %v6933_v42 = vmul.f32 0.2, %v6869_v26  ;;  %v10911_v53 = vld [vmem:[#allocation4_spill] sm:$0xff] }
 0x48a   : > { %v6996_v28 = vadd.f32 %v9539_v29, %v6964_v27  ;;  %v6962_v57 = vsel %vm6898_vm6, %v6866_v2, %v6930_v40  ;;  %vm6899_vm5 = vcmp.ge.f32.partialorder %v6867_v10, 0.0  ;;  %v6931_v56 = vmul.f32 0.2, %v6867_v10 }
 0x48b   : > { %v6994_v59 = vadd.f32 %v6962_v57, %v9541_v31  ;;  %v6965_v25 = vsel %vm6901_vm15, %v6869_v26, %v6933_v42 }
 0x48c   : > { %7028 = vst.msk [vmem:[%s10754_s15 + $0x30] sm:$0xff] %vm1479_vm0, %v6996_v28  ;;  %v6997_v6 = vadd.f32 %v9543_v32, %v6965_v25  ;;  %v6963_v44 = vsel %vm6899_vm5, %v6867_v10, %v6931_v56  ;;  %v7871_v62 = vpop.f32.mrb[24].mxu1  ;;  %v10912_v10 = vld [vmem:[#allocation5_spill] sm:$0xff]  ;;  %v10913_v28 = vld [vmem:[#allocation6_spill] sm:$0xff]  ;;  %v10914_v25 = vld [vmem:[#allocation7_spill] sm:$0xff] }
 0x48d   : > { %7026 = vst.msk [vmem:[%s10754_s15 + $0x20] sm:$0xff] %vm1479_vm0, %v6994_v59  ;;  %v6995_v58 = vadd.f32 %v6963_v44, %v9547_v24  ;;  %v6872_v30 = vadd.f32 %v7871_v62, %v10744_v39  ;;  %v6728_v29 = vpop.f32.mrb[25].mxu1 }
 0x48e   : > { %7029 = vst.msk [vmem:[%s10754_s15 + $0x38] sm:$0xff] %vm1479_vm0, %v6997_v6  ;;  %v6870_v54 = vadd.f32 %v10744_v39, %v6728_v29  ;;  %v7872_v38 = vpop.f32.mrb[26].mxu1 }
 0x48f   : > { %7027 = vst.msk [vmem:[%s10754_s15 + $0x28] sm:$0xff] %vm1479_vm0, %v6995_v58  ;;  %vm6904_vm4 = vcmp.ge.f32.partialorder %v6872_v30, 0.0  ;;  %v6936_v31 = vmul.f32 0.2, %v6872_v30  ;;  %v6873_v32 = vadd.f32 %v7872_v38, %v10744_v39  ;;  %v6731_v34 = vpop.f32.mrb[27].mxu1 }
 0x490   : > { %vm6902_vm11 = vcmp.ge.f32.partialorder %v6870_v54, 0.0  ;;  %v6934_v48 = vmul.f32 0.2, %v6870_v54  ;;  %v6871_v24 = vadd.f32 %v10744_v39, %v6731_v34 }
 0x491   : > { %v6968_v16 = vsel %vm6904_vm4, %v6872_v30, %v6936_v31  ;;  %vm6905_vm3 = vcmp.ge.f32.partialorder %v6873_v32, 0.0  ;;  %v6937_v33 = vmul.f32 0.2, %v6873_v32 }
 0x492   : > { %v7000_v9 = vadd.f32 %v9551_v41, %v6968_v16  ;;  %v6966_v55 = vsel %vm6902_vm11, %v6870_v54, %v6934_v48  ;;  %vm6903_vm12 = vcmp.ge.f32.partialorder %v6871_v24, 0.0  ;;  %v6935_v12 = vmul.f32 0.2, %v6871_v24 }
 0x493   : > { %v6998_v36 = vadd.f32 %v6966_v55, %v9553_v20  ;;  %v6969_v52 = vsel %vm6905_vm3, %v6873_v32, %v6937_v33 }
 0x494   : > { %7032 = vst.msk [vmem:[%s10754_s15 + $0x50] sm:$0xff] %vm1479_vm0, %v7000_v9  ;;  %v7001_v45 = vadd.f32 %v9557_v21, %v6969_v52  ;;  %v6967_v13 = vsel %vm6903_vm12, %v6871_v24, %v6935_v12  ;;  %v7875_v61 = vpop.f32.mrb[28].mxu1 }
 0x495   : > { %7030 = vst.msk [vmem:[%s10754_s15 + $0x40] sm:$0xff] %vm1479_vm0, %v6998_v36  ;;  %v6999_v1 = vadd.f32 %v6967_v13, %v9559_v15  ;;  %v6876_v43 = vadd.f32 %v7875_v61, %v10744_v39  ;;  %v6744_v41 = vpop.f32.mrb[29].mxu1 }
 0x496   : > { %7033 = vst.msk [vmem:[%s10754_s15 + $0x58] sm:$0xff] %vm1479_vm0, %v7001_v45  ;;  %v6874_v51 = vadd.f32 %v10744_v39, %v6744_v41  ;;  %v7876_v37 = vpop.f32.mrb[30].mxu1 }
 0x497   : > { %7031 = vst.msk [vmem:[%s10754_s15 + $0x48] sm:$0xff] %vm1479_vm0, %v6999_v1  ;;  %vm6908_vm7 = vcmp.ge.f32.partialorder %v6876_v43, 0.0  ;;  %v6940_v20 = vmul.f32 0.2, %v6876_v43  ;;  %v6877_v21 = vadd.f32 %v7876_v37, %v10744_v39  ;;  %v6747_v47 = vpop.f32.mrb[31].mxu1 }
 0x498   : > { %vm6906_vm2 = vcmp.ge.f32.partialorder %v6874_v51, 0.0  ;;  %v6938_v0 = vmul.f32 0.2, %v6874_v51  ;;  %v6875_v15 = vadd.f32 %v10744_v39, %v6747_v47 }
 0x499   : > { %v6972_v2 = vsel %vm6908_vm7, %v6876_v43, %v6940_v20  ;;  %vm6909_vm13 = vcmp.ge.f32.partialorder %v6877_v21, 0.0  ;;  %v6941_v3 = vmul.f32 0.2, %v6877_v21 }
 0x49a   : > { %v7004_v26 = vadd.f32 %v10911_v53, %v6972_v2  ;;  %v6970_v49 = vsel %vm6906_vm2, %v6874_v51, %v6938_v0  ;;  %vm6907_vm9 = vcmp.ge.f32.partialorder %v6875_v15, 0.0  ;;  %v6939_v40 = vmul.f32 0.2, %v6875_v15 }
 0x49b   : > { %v7002_v27 = vadd.f32 %v6970_v49, %v10912_v10  ;;  %v6973_v42 = vsel %vm6909_vm13, %v6877_v21, %v6941_v3 }
 0x49c   : > { %7036 = vst.msk [vmem:[%s10754_s15 + $0x70] sm:$0xff] %vm1479_vm0, %v7004_v26  ;;  %v7005_v57 = vadd.f32 %v10913_v28, %v6973_v42  ;;  %v6971_v56 = vsel %vm6907_vm9, %v6875_v15, %v6939_v40  ;;  %v7879_v59 = vpop.f32.mrb[32].mxu1 }
 0x49d   : > { %7034 = vst.msk [vmem:[%s10754_s15 + $0x60] sm:$0xff] %vm1479_vm0, %v7002_v27  ;;  %v7003_v6 = vadd.f32 %v6971_v56, %v10914_v25  ;;  %v6880_v44 = vadd.f32 %v7879_v59, %v10744_v39  ;;  %v6760_v62 = vpop.f32.mrb[33].mxu1 }
 0x49e   : > { %7037 = vst.msk [vmem:[%s10754_s15 + $0x78] sm:$0xff] %vm1479_vm0, %v7005_v57  ;;  %v6878_v58 = vadd.f32 %v10744_v39, %v6760_v62  ;;  %v7880_v30 = vpop.f32.mrb[34].mxu1 }
 0x49f   : > { %7035 = vst.msk [vmem:[%s10754_s15 + $0x68] sm:$0xff] %vm1479_vm0, %v7003_v6  ;;  %vm6912_vm10 = vcmp.ge.f32.partialorder %v6880_v44, 0.0  ;;  %v6944_v29 = vmul.f32 0.2, %v6880_v44  ;;  %v6881_v54 = vadd.f32 %v7880_v30, %v10744_v39  ;;  %v6763_v38 = vpop.f32.mrb[35].mxu1 }
 0x4a0   : > { %vm6910_vm14 = vcmp.ge.f32.partialorder %v6878_v58, 0.0  ;;  %v6942_v31 = vmul.f32 0.2, %v6878_v58  ;;  %v6879_v32 = vadd.f32 %v10744_v39, %v6763_v38 }
 0x4a1   : > { %v6976_v34 = vsel %vm6912_vm10, %v6880_v44, %v6944_v29  ;;  %vm6913_vm8 = vcmp.ge.f32.partialorder %v6881_v54, 0.0  ;;  %v6945_v48 = vmul.f32 0.2, %v6881_v54 }
 0x4a2   : > { %v7008_v24 = vadd.f32 %v10685_v18, %v6976_v34  ;;  %v6974_v16 = vsel %vm6910_vm14, %v6878_v58, %v6942_v31  ;;  %vm6911_vm1 = vcmp.ge.f32.partialorder %v6879_v32, 0.0  ;;  %v6943_v33 = vmul.f32 0.2, %v6879_v32 }
 0x4a3   : > { %v7006_v9 = vadd.f32 %v6974_v16, %v10689_v35  ;;  %v6977_v55 = vsel %vm6913_vm8, %v6881_v54, %v6945_v48 }
 0x4a4   : > { %7040 = vst.msk [vmem:[%s10754_s15 + $0x90] sm:$0xff] %vm1479_vm0, %v7008_v24  ;;  %v7009_v12 = vadd.f32 %v10694_v11, %v6977_v55  ;;  %v6975_v36 = vsel %vm6911_vm1, %v6879_v32, %v6943_v33  ;;  %v7883_v52 = vpop.f32.mrb[36].mxu1 }
 0x4a5   : > { %7038 = vst.msk [vmem:[%s10754_s15 + $0x80] sm:$0xff] %vm1479_vm0, %v7006_v9  ;;  %v7007_v45 = vadd.f32 %v6975_v36, %v10698_v8  ;;  %v6884_v13 = vadd.f32 %v7883_v52, %v10744_v39  ;;  %v6776_v18 = vpop.f32.mrb[37].mxu1 }
 0x4a6   : > { %7041 = vst.msk [vmem:[%s10754_s15 + $0x98] sm:$0xff] %vm1479_vm0, %v7009_v12  ;;  %v6882_v61 = vadd.f32 %v10744_v39, %v6776_v18  ;;  %v7884_v1 = vpop.f32.mrb[38].mxu1 }
 0x4a7   : > { %7039 = vst.msk [vmem:[%s10754_s15 + $0x88] sm:$0xff] %vm1479_vm0, %v7007_v45  ;;  %vm6916_vm6 = vcmp.ge.f32.partialorder %v6884_v13, 0.0  ;;  %v6948_v35 = vmul.f32 0.2, %v6884_v13  ;;  %v6885_v11 = vadd.f32 %v7884_v1, %v10744_v39  ;;  %v6779_v43 = vpop.f32.mrb[39].mxu1 }
 0x4a8   : > { %vm6914_vm15 = vcmp.ge.f32.partialorder %v6882_v61, 0.0  ;;  %v6946_v41 = vmul.f32 0.2, %v6882_v61  ;;  %v6883_v8 = vadd.f32 %v10744_v39, %v6779_v43 }
 0x4a9   : > { %v6980_v51 = vsel %vm6916_vm6, %v6884_v13, %v6948_v35  ;;  %vm6917_vm5 = vcmp.ge.f32.partialorder %v6885_v11, 0.0  ;;  %v6949_v37 = vmul.f32 0.2, %v6885_v11 }
 0x4aa   : > { %v7012_v20 = vadd.f32 %v10709_v60, %v6980_v51  ;;  %v6978_v21 = vsel %vm6914_vm15, %v6882_v61, %v6946_v41  ;;  %vm6915_vm4 = vcmp.ge.f32.partialorder %v6883_v8, 0.0  ;;  %v6947_v47 = vmul.f32 0.2, %v6883_v8 }
 0x4ab   : > { %v7010_v0 = vadd.f32 %v6978_v21, %v10711_v5  ;;  %v6981_v15 = vsel %vm6917_vm5, %v6885_v11, %v6949_v37 }
 0x4ac   : > { %7044 = vst.msk [vmem:[%s10754_s15 + $0xb0] sm:$0xff] %vm1479_vm0, %v7012_v20  ;;  %v7013_v2 = vadd.f32 %v10713_v50, %v6981_v15  ;;  %v6979_v3 = vsel %vm6915_vm4, %v6883_v8, %v6947_v47  ;;  %v7887_v53 = vpop.f32.mrb[40].mxu1 }
 0x4ad   : > { %7042 = vst.msk [vmem:[%s10754_s15 + $0xa0] sm:$0xff] %vm1479_vm0, %v7010_v0  ;;  %v7011_v26 = vadd.f32 %v6979_v3, %v10715_v19  ;;  %v6888_v49 = vadd.f32 %v7887_v53, %v10744_v39  ;;  %v6792_v60 = vpop.f32.mrb[41].mxu1 }
 0x4ae   : > { %7045 = vst.msk [vmem:[%s10754_s15 + $0xb8] sm:$0xff] %vm1479_vm0, %v7013_v2  ;;  %v6886_v40 = vadd.f32 %v10744_v39, %v6792_v60  ;;  %v7888_v10 = vpop.f32.mrb[42].mxu1 }
 0x4af   : > { %7043 = vst.msk [vmem:[%s10754_s15 + $0xa8] sm:$0xff] %vm1479_vm0, %v7011_v26  ;;  %vm6920_vm11 = vcmp.ge.f32.partialorder %v6888_v49, 0.0  ;;  %v6952_v5 = vmul.f32 0.2, %v6888_v49  ;;  %v6889_v50 = vadd.f32 %v7888_v10, %v10744_v39  ;;  %v6795_v27 = vpop.f32.mrb[43].mxu1 }
 0x4b0   : > { %vm6918_vm3 = vcmp.ge.f32.partialorder %v6886_v40, 0.0  ;;  %v6950_v42 = vmul.f32 0.2, %v6886_v40  ;;  %v6887_v19 = vadd.f32 %v10744_v39, %v6795_v27 }
 0x4b1   : > { %v6984_v28 = vsel %vm6920_vm11, %v6888_v49, %v6952_v5  ;;  %vm6921_vm12 = vcmp.ge.f32.partialorder %v6889_v50, 0.0  ;;  %v6953_v57 = vmul.f32 0.2, %v6889_v50 }
 0x4b2   : > { %v7016_v56 = vadd.f32 %v10725_v17, %v6984_v28  ;;  %v6982_v59 = vsel %vm6918_vm3, %v6886_v40, %v6950_v42  ;;  %vm6919_vm7 = vcmp.ge.f32.partialorder %v6887_v19, 0.0  ;;  %v6951_v25 = vmul.f32 0.2, %v6887_v19 }
 0x4b3   : > { %v7014_v6 = vadd.f32 %v6982_v59, %v10727_v14  ;;  %v6985_v44 = vsel %vm6921_vm12, %v6889_v50, %v6953_v57 }
 0x4b4   : > { %7048 = vst.msk [vmem:[%s10754_s15 + $0xd0] sm:$0xff] %vm1479_vm0, %v7016_v56  ;;  %v7017_v62 = vadd.f32 %v10729_v63, %v6985_v44  ;;  %v6983_v58 = vsel %vm6919_vm7, %v6887_v19, %v6951_v25  ;;  %v7891_v30 = vpop.f32.mrb[44].mxu1 }
 0x4b5   : > { %7046 = vst.msk [vmem:[%s10754_s15 + $0xc0] sm:$0xff] %vm1479_vm0, %v7014_v6  ;;  %v7015_v29 = vadd.f32 %v6983_v58, %v10731_v46  ;;  %v6892_v54 = vadd.f32 %v7891_v30, %v10744_v39  ;;  %v6808_v17 = vpop.f32.mrb[45].mxu1 }
 0x4b6   : > { %7049 = vst.msk [vmem:[%s10754_s15 + $0xd8] sm:$0xff] %vm1479_vm0, %v7017_v62  ;;  %v6890_v38 = vadd.f32 %v10744_v39, %v6808_v17  ;;  %v7892_v31 = vpop.f32.mrb[46].mxu1 }
 0x4b7   : > { %7047 = vst.msk [vmem:[%s10754_s15 + $0xc8] sm:$0xff] %vm1479_vm0, %v7015_v29  ;;  %vm6924_vm2 = vcmp.ge.f32.partialorder %v6892_v54, 0.0  ;;  %v6956_v14 = vmul.f32 0.2, %v6892_v54  ;;  %v6893_v63 = vadd.f32 %v7892_v31, %v10744_v39  ;;  %v6811_v32 = vpop.f32.mrb[47].mxu1 }
 0x4b8   : > { %vm6922_vm13 = vcmp.ge.f32.partialorder %v6890_v38, 0.0  ;;  %v6954_v34 = vmul.f32 0.2, %v6890_v38  ;;  %v6891_v46 = vadd.f32 %v10744_v39, %v6811_v32 }
 0x4b9   : > { %v6988_v48 = vsel %vm6924_vm2, %v6892_v54, %v6956_v14  ;;  %vm6925_vm9 = vcmp.ge.f32.partialorder %v6893_v63, 0.0  ;;  %v6957_v24 = vmul.f32 0.2, %v6893_v63 }
 0x4ba   : > { %v7020_v16 = vadd.f32 %v10733_v22, %v6988_v48  ;;  %v6986_v33 = vsel %vm6922_vm13, %v6890_v38, %v6954_v34  ;;  %vm6923_vm10 = vcmp.ge.f32.partialorder %v6891_v46, 0.0  ;;  %v6955_v9 = vmul.f32 0.2, %v6891_v46 }
 0x4bb   : > { %v7018_v55 = vadd.f32 %v6986_v33, %v10735_v7  ;;  %v6989_v12 = vsel %vm6925_vm9, %v6893_v63, %v6957_v24 }
 0x4bc   : > { %7052 = vst.msk [vmem:[%s10754_s15 + $0xf0] sm:$0xff] %vm1479_vm0, %v7020_v16  ;;  %v7021_v36 = vadd.f32 %v10737_v4, %v6989_v12  ;;  %v6987_v52 = vsel %vm6923_vm10, %v6891_v46, %v6955_v9 }
 0x4bd   : > { %7050 = vst.msk [vmem:[%s10754_s15 + $0xe0] sm:$0xff] %vm1479_vm0, %v7018_v55  ;;  %v7019_v39 = vadd.f32 %v6987_v52, %v10739_v23 }
 0x4be   : > { %7053 = vst.msk [vmem:[%s10754_s15 + $0xf8] sm:$0xff] %vm1479_vm0, %v7021_v36 }
 0x4bf   : > { %7051 = vst.msk [vmem:[%s10754_s15 + $0xe8] sm:$0xff] %vm1479_vm0, %v7019_v39 }
 0x4c0 PF: > { %s16_s21 = sadd.s32 1, %s8341_s21  }
 0x4c1   : > { %p13_p4 = scmp.ge.s32.totalorder %s16_s21, 4  }
 0x4c3   :  { %15 = sbr.rel (!%p13_p4) target bundleno = 1 (0x1), region = 84 }

</bundles_post_ra>
